<compile_context>
chip_gen: v7x
topology: tpu7x:2x2x1
jax: 0.10.0
libtpu: 0.0.40
codegen_flags: <defaults>
</compile_context>

<pallas_src>
import jax
import jax.numpy as jnp
from jax.experimental import pallas as pl
from jax.experimental.pallas import tpu as pltpu


# ----------------------------- kernel ---------------------------------------

def token_embed_kernel(f_ref, w2_ref, b2_ref, w3g_ref, w3l_ref, b3_ref,
                       w4_ref, b4_ref, o_ref):
    G, N, h1 = f_ref.shape
    f = f_ref[...].reshape(G * N, h1)                      # (rows, h1) bf16

    # first_conv tail: Conv1d(h1 -> h2)
    f1 = jnp.dot(f, w2_ref[...],
                 preferred_element_type=jnp.float32) + b2_ref[...]     # (rows, h2) f32
    f1_bf = f1.astype(jnp.bfloat16)
    h2 = f1_bf.shape[1]

    # global max over points, taken on bf16 (cast is monotone -> same as max-then-cast)
    g1_bf = jnp.max(f1_bf.reshape(G, N, h2), axis=1)       # (G, h2) bf16

    # cat([broadcast(g1), f1]) @ w3 + b3  ==  (g1 @ w3_global + b3)  +  f1 @ w3_local
    g_term = jnp.dot(g1_bf, w3g_ref[...],
                     preferred_element_type=jnp.float32) + b3_ref[...]  # (G, cmid)
    local = jnp.dot(f1_bf, w3l_ref[...],
                    preferred_element_type=jnp.float32)                 # (rows, cmid)
    cmid = local.shape[1]
    f2 = jnp.maximum(local.reshape(G, N, cmid) + g_term[:, None, :], 0.0)
    f2 = f2.reshape(G * N, cmid).astype(jnp.bfloat16)

    f3 = jnp.dot(f2, w4_ref[...],
                 preferred_element_type=jnp.float32) + b4_ref[...]      # (rows, out_c)
    out_c = f3.shape[1]

    # final global max over points
    o_ref[...] = jnp.max(f3.reshape(G, N, out_c), axis=1)


# ----------------------------- wrapper ---------------------------------------

def _cdiv(a, b):
    return -(-a // b)


def _tpu_tuning():
    """(g_tile_max, vmem_limit_bytes, num_tensorcores) chosen per TPU generation."""
    vmem_cap = 128 * 1024 * 1024
    try:
        info = pltpu.get_tpu_info()
        vmem_cap = int(getattr(info, "vmem_capacity_bytes", vmem_cap))
    except Exception:
        pass
    if vmem_cap <= 64 * 1024 * 1024:
        # v7x-like: 64 MiB VMEM per TC, 2 TensorCores per chip -> smaller tile, lower
        # vmem limit, and an even number of grid steps so both TCs get work.
        return 64, 40 * 1024 * 1024, 2
    # v5e / v6e: 128 MiB VMEM, single TensorCore -> bigger tile amortizes step overhead.
    return 128, 64 * 1024 * 1024, 1


def _plan_grid(bg, g_tile_max, num_cores):
    """Pick (g_tile, bg_pad, steps): steps is a multiple of num_cores, g_tile a multiple
    of 8 and <= g_tile_max-ish, with minimal group-axis padding."""
    steps = _cdiv(bg, g_tile_max)
    steps = _cdiv(steps, num_cores) * num_cores
    g_tile = max(8, _cdiv(_cdiv(bg, steps), 8) * 8)
    return g_tile, steps * g_tile, steps


def token_embed_pallas(x_bgnc, params):
    """x_bgnc: (BG, N, C) float32. Returns (BG, out_c) float32."""
    BG, N, C = x_bgnc.shape
    w1, b1, w2, b2, w3, b3, w4, b4 = params
    h1 = w1.shape[1]
    h2 = w2.shape[1]
    cmid = w4.shape[0]
    out_c = w4.shape[1]

    # First Conv1d (+ folded BN) + ReLU hoisted to XLA: K=C is tiny (3), and this turns
    # the kernel input into a lane-dense (BG, N, h1) bf16 slab instead of a 3-lane block.
    f_bf = jnp.maximum(x_bgnc @ w1 + b1, 0.0).astype(jnp.bfloat16)

    # Split w3 so the global feature goes through the MXU once per group instead of N
    # times, and the broadcast+concat disappears. Weights cast to bf16 once (f32 accum).
    w3g = w3[:h2, :].astype(jnp.bfloat16)
    w3l = w3[h2:, :].astype(jnp.bfloat16)
    w2b = w2.astype(jnp.bfloat16)
    w4b = w4.astype(jnp.bfloat16)

    g_tile_max, vmem_limit, num_cores = _tpu_tuning()
    g_tile, bg_pad, steps = _plan_grid(BG, g_tile_max, num_cores)
    if bg_pad != BG:
        # Padded groups are sliced off below; per-group max reductions are independent,
        # so zero padding cannot contaminate real groups.
        f_bf = jnp.pad(f_bf, ((0, bg_pad - BG), (0, 0), (0, 0)))

    def const_spec(arr):
        idx = lambda i: (0,) * arr.ndim
        try:
            # Constants are fetched once; single-buffering saves VMEM + dead DMA work.
            return pl.BlockSpec(arr.shape, idx, pipeline_mode=pl.Buffered(1))
        except TypeError:
            return pl.BlockSpec(arr.shape, idx)

    rows = bg_pad * N
    flops = 2 * rows * (h1 * h2 + h2 * cmid + cmid * out_c) + 2 * bg_pad * h2 * cmid
    bytes_accessed = (rows * h1 * 2 + bg_pad * out_c * 4
                      + (w2b.size + w3g.size + w3l.size + w4b.size) * 2
                      + (b2.size + b3.size + b4.size) * 4)
    cost = pl.CostEstimate(flops=int(flops), transcendentals=0,
                           bytes_accessed=int(bytes_accessed))

    out = pl.pallas_call(
        token_embed_kernel,
        out_shape=jax.ShapeDtypeStruct((bg_pad, out_c), jnp.float32),
        grid_spec=pltpu.PrefetchScalarGridSpec(
            num_scalar_prefetch=0,
            grid=(steps,),
            in_specs=[
                pl.BlockSpec((g_tile, N, h1), lambda i: (i, 0, 0)),
                const_spec(w2b), const_spec(b2),
                const_spec(w3g), const_spec(w3l), const_spec(b3),
                const_spec(w4b), const_spec(b4),
            ],
            out_specs=pl.BlockSpec((g_tile, out_c), lambda i: (i, 0)),
        ),
        compiler_params=pltpu.CompilerParams(
            dimension_semantics=("parallel",),
            vmem_limit_bytes=vmem_limit),
        cost_estimate=cost,
    )(f_bf, w2b, b2, w3g, w3l, b3, w4b, b4)
    return out[:BG]


# ---------------- parameter construction (deterministic, synthetic) ----------------

def _fold_bn(w, b, gamma, beta, mean, var, eps=1e-5):
    """Fold eval-mode BatchNorm1d into the preceding 1x1 conv (w: [C_in, C_out])."""
    s = gamma / jnp.sqrt(var + eps)                  # (C_out,)
    w_f = w * s[None, :]
    b_f = b * s + (beta - mean * s)
    return w_f, b_f


def make_token_embed_params(in_c, out_c, key):
    """Mirror Token_Embed.__init__ channel sizes; return matmul-ready params."""
    if in_c == 3:
        h1, h2 = 128, 256
        c_mid = 512          # second_conv hidden = 512
    else:
        h1, h2 = in_c, in_c
        c_mid = out_c        # second_conv: Conv1d(2*in_c, out_c) -> ... -> Conv1d(out_c, out_c)
    cat_c = 2 * h2

    ks = jax.random.split(key, 16)

    def conv(kw, kb, cin, cout, scale=0.05):
        # PyTorch Conv1d weight is (cout, cin, 1); we store transposed (cin, cout).
        w = scale * jax.random.normal(kw, (cin, cout), jnp.float32)
        b = scale * jax.random.normal(kb, (cout,), jnp.float32)
        return w, b

    def bn(kg, kb, km, kv, c):
        gamma = 1.0 + 0.1 * jax.random.normal(kg, (c,), jnp.float32)
        beta = 0.1 * jax.random.normal(kb, (c,), jnp.float32)
        mean = 0.1 * jax.random.normal(km, (c,), jnp.float32)
        var = 0.5 + jnp.abs(jax.random.normal(kv, (c,), jnp.float32))
        return gamma, beta, mean, var

    # first_conv
    w1, b1 = conv(ks[0], ks[1], in_c, h1)
    g1_, bt1, m1, v1 = bn(ks[2], ks[3], ks[4], ks[5], h1)
    w2, b2 = conv(ks[6], ks[7], h1, h2)
    # second_conv
    w3, b3 = conv(ks[8], ks[9], cat_c, c_mid)
    g3_, bt3, m3, v3 = bn(ks[10], ks[11], ks[12], ks[13], c_mid)
    w4, b4 = conv(ks[14], ks[15], c_mid, out_c)

    # fold BN (eval mode) into conv1 / conv3
    # TODO(synk): training-mode BatchNorm (batch statistics + running-stat updates) is not
    # representable in this fused eval-mode kernel.
    w1f, b1f = _fold_bn(w1, b1, g1_, bt1, m1, v1)
    w3f, b3f = _fold_bn(w3, b3, g3_, bt3, m3, v3)

    params = (w1f, b1f.reshape(1, -1), w2, b2.reshape(1, -1),
              w3f, b3f.reshape(1, -1), w4, b4.reshape(1, -1))
    return params


# ---------------- pure-JAX reference (same math, full f32) ----------------

def token_embed_ref(x_bgnc, params):
    w1, b1, w2, b2, w3, b3, w4, b4 = params
    f = jnp.maximum(x_bgnc @ w1 + b1, 0.0)
    f1 = f @ w2 + b2                                       # (BG, N, h2)
    g1 = jnp.max(f1, axis=1, keepdims=True)                # (BG, 1, h2)
    cat = jnp.concatenate([jnp.broadcast_to(g1, f1.shape), f1], axis=-1)
    f2 = jnp.maximum(cat @ w3 + b3, 0.0)
    f2 = f2 @ w4 + b4                                      # (BG, N, out_c)
    return jnp.max(f2, axis=1)                             # (BG, out_c)


if __name__ == "__main__":
    key = jax.random.PRNGKey(0)
    k_x, k_p, k_x2 = jax.random.split(key, 3)

    # Small shapes consistent with the module's forward: (bs, g, n, c) with c == in_c == 3
    bs, g, n, in_c = 2, 4, 32, 3
    out_c = 64

    point_groups = jax.random.normal(k_x, (bs, g, n, in_c), jnp.float32)
    params = make_token_embed_params(in_c, out_c, k_p)

    x_bgnc = point_groups.reshape(bs * g, n, in_c)
    out = token_embed_pallas(x_bgnc, params)
    out = out.reshape(bs, g, out_c)
    jax.block_until_ready(out)

    ref = token_embed_ref(x_bgnc, params).reshape(bs, g, out_c)
    assert out.shape == (bs, g, out_c)
    # bf16 matmul operands (f32 accumulation) vs the pure-f32 reference -> loosened tolerance
    assert jnp.allclose(out, ref, atol=2e-2, rtol=2e-2), "mismatch vs pure-JAX reference"

    # Second check: exercises multi-step grid + group-axis padding (BG=120)
    bs2, g2 = 3, 40
    pg2 = jax.random.normal(k_x2, (bs2, g2, n, in_c), jnp.float32)
    x2 = pg2.reshape(bs2 * g2, n, in_c)
    out2 = token_embed_pallas(x2, params)
    jax.block_until_ready(out2)
    ref2 = token_embed_ref(x2, params)
    assert out2.shape == (bs2 * g2, out_c)
    assert jnp.allclose(out2, ref2, atol=2e-2, rtol=2e-2), "mismatch on padded/multi-step case"

    print("KERNEL_OK")
</pallas_src>

<mosaic_0001>
module attributes {stable_mosaic.version = 11 : i64} {
  func.func @token_embed_kernel(%arg0: i32, %arg1: memref<8x32x128xbf16, #tpu.memory_space<vmem>>, %arg2: memref<128x256xbf16, #tpu.memory_space<vmem>>, %arg3: memref<1x256xf32, #tpu.memory_space<vmem>>, %arg4: memref<256x512xbf16, #tpu.memory_space<vmem>>, %arg5: memref<256x512xbf16, #tpu.memory_space<vmem>>, %arg6: memref<1x512xf32, #tpu.memory_space<vmem>>, %arg7: memref<512x64xbf16, #tpu.memory_space<vmem>>, %arg8: memref<1x64xf32, #tpu.memory_space<vmem>>, %arg9: memref<8x64xf32, #tpu.memory_space<vmem>>) attributes {dimension_semantics = [#tpu.dimension_semantics<parallel>], iteration_bounds = array<i64: 1>, scalar_prefetch = 0 : i64, scratch_operands = 0 : i64, tpu.core_type = #tpu.core_type<tc>, window_params = [{transform_indices = @transform_0, window_bounds = array<i64: 8, 32, 128>}, {pipeline_mode = #tpu.pipeline_mode<synchronous>, transform_indices = @transform_1, window_bounds = array<i64: 128, 256>}, {pipeline_mode = #tpu.pipeline_mode<synchronous>, transform_indices = @transform_2, window_bounds = array<i64: 1, 256>}, {pipeline_mode = #tpu.pipeline_mode<synchronous>, transform_indices = @transform_3, window_bounds = array<i64: 256, 512>}, {pipeline_mode = #tpu.pipeline_mode<synchronous>, transform_indices = @transform_4, window_bounds = array<i64: 256, 512>}, {pipeline_mode = #tpu.pipeline_mode<synchronous>, transform_indices = @transform_5, window_bounds = array<i64: 1, 512>}, {pipeline_mode = #tpu.pipeline_mode<synchronous>, transform_indices = @transform_6, window_bounds = array<i64: 512, 64>}, {pipeline_mode = #tpu.pipeline_mode<synchronous>, transform_indices = @transform_7, window_bounds = array<i64: 1, 64>}, {transform_indices = @transform_8, window_bounds = array<i64: 8, 64>}]} {
    %c0 = arith.constant 0 : index
    %c0_0 = arith.constant 0 : index
    %c0_1 = arith.constant 0 : index
    %0 = vector.load %arg1[%c0, %c0_0, %c0_1] : memref<8x32x128xbf16, #tpu.memory_space<vmem>>, vector<8x32x128xbf16>
    %1 = vector.shape_cast %0 : vector<8x32x128xbf16> to vector<256x128xbf16>
    %c0_2 = arith.constant 0 : index
    %c0_3 = arith.constant 0 : index
    %2 = vector.load %arg2[%c0_2, %c0_3] : memref<128x256xbf16, #tpu.memory_space<vmem>>, vector<128x256xbf16>
    %cst = arith.constant dense<0.000000e+00> : vector<256x256xf32>
    %3 = tpu.matmul %1, %2, %cst {dimension_numbers = #tpu.dot_dimension_numbers<[1], [0], [0], [1], [0, 0, 1, 1], [], []>} : vector<256x128xbf16>, vector<128x256xbf16>, vector<256x256xf32> -> vector<256x256xf32>
    %c0_4 = arith.constant 0 : index
    %c0_5 = arith.constant 0 : index
    %4 = vector.load %arg3[%c0_4, %c0_5] : memref<1x256xf32, #tpu.memory_space<vmem>>, vector<1x256xf32>
    %5 = vector.broadcast %4 : vector<1x256xf32> to vector<256x256xf32>
    %6 = arith.addf %3, %5 : vector<256x256xf32>
    %7 = arith.truncf %6 : vector<256x256xf32> to vector<256x256xbf16>
    %8 = vector.shape_cast %7 : vector<256x256xbf16> to vector<8x32x256xbf16>
    %cst_6 = arith.constant dense<0xFF80> : vector<8x256xbf16>
    %9 = vector.multi_reduction <maximumf>, %8, %cst_6 [1] : vector<8x32x256xbf16> to vector<8x256xbf16>
    %c0_7 = arith.constant 0 : index
    %c0_8 = arith.constant 0 : index
    %10 = vector.load %arg4[%c0_7, %c0_8] : memref<256x512xbf16, #tpu.memory_space<vmem>>, vector<256x512xbf16>
    %cst_9 = arith.constant dense<0.000000e+00> : vector<8x512xf32>
    %11 = tpu.matmul %9, %10, %cst_9 {dimension_numbers = #tpu.dot_dimension_numbers<[1], [0], [0], [1], [0, 0, 1, 1], [], []>} : vector<8x256xbf16>, vector<256x512xbf16>, vector<8x512xf32> -> vector<8x512xf32>
    %c0_10 = arith.constant 0 : index
    %c0_11 = arith.constant 0 : index
    %12 = vector.load %arg6[%c0_10, %c0_11] : memref<1x512xf32, #tpu.memory_space<vmem>>, vector<1x512xf32>
    %13 = vector.broadcast %12 : vector<1x512xf32> to vector<8x512xf32>
    %14 = arith.addf %11, %13 : vector<8x512xf32>
    %c0_12 = arith.constant 0 : index
    %c0_13 = arith.constant 0 : index
    %15 = vector.load %arg5[%c0_12, %c0_13] : memref<256x512xbf16, #tpu.memory_space<vmem>>, vector<256x512xbf16>
    %cst_14 = arith.constant dense<0.000000e+00> : vector<256x512xf32>
    %16 = tpu.matmul %7, %15, %cst_14 {dimension_numbers = #tpu.dot_dimension_numbers<[1], [0], [0], [1], [0, 0, 1, 1], [], []>} : vector<256x256xbf16>, vector<256x512xbf16>, vector<256x512xf32> -> vector<256x512xf32>
    %17 = vector.shape_cast %16 : vector<256x512xf32> to vector<8x32x512xf32>
    %18 = vector.shape_cast %14 : vector<8x512xf32> to vector<8x1x512xf32>
    %19 = vector.broadcast %18 : vector<8x1x512xf32> to vector<8x32x512xf32>
    %20 = arith.addf %17, %19 : vector<8x32x512xf32>
    %cst_15 = arith.constant 0.000000e+00 : f32
    %21 = vector.broadcast %cst_15 : f32 to vector<8x32x512xf32>
    %22 = arith.maximumf %20, %21 : vector<8x32x512xf32>
    %23 = vector.shape_cast %22 : vector<8x32x512xf32> to vector<256x512xf32>
    %24 = arith.truncf %23 : vector<256x512xf32> to vector<256x512xbf16>
    %c0_16 = arith.constant 0 : index
    %c0_17 = arith.constant 0 : index
    %25 = vector.load %arg7[%c0_16, %c0_17] : memref<512x64xbf16, #tpu.memory_space<vmem>>, vector<512x64xbf16>
    %cst_18 = arith.constant dense<0.000000e+00> : vector<256x64xf32>
    %26 = tpu.matmul %24, %25, %cst_18 {dimension_numbers = #tpu.dot_dimension_numbers<[1], [0], [0], [1], [0, 0, 1, 1], [], []>} : vector<256x512xbf16>, vector<512x64xbf16>, vector<256x64xf32> -> vector<256x64xf32>
    %c0_19 = arith.constant 0 : index
    %c0_20 = arith.constant 0 : index
    %27 = vector.load %arg8[%c0_19, %c0_20] : memref<1x64xf32, #tpu.memory_space<vmem>>, vector<1x64xf32>
    %28 = vector.broadcast %27 : vector<1x64xf32> to vector<256x64xf32>
    %29 = arith.addf %26, %28 : vector<256x64xf32>
    %30 = vector.shape_cast %29 : vector<256x64xf32> to vector<8x32x64xf32>
    %cst_21 = arith.constant dense<0xFF800000> : vector<8x64xf32>
    %31 = vector.multi_reduction <maximumf>, %30, %cst_21 [1] : vector<8x32x64xf32> to vector<8x64xf32>
    %c0_22 = arith.constant 0 : index
    %c0_23 = arith.constant 0 : index
    %32 = vector.load %arg9[%c0_22, %c0_23] : memref<8x64xf32, #tpu.memory_space<vmem>>, vector<8x64xf32>
    tpu.vector_store %arg9[%c0_22, %c0_23], %31 {strides = array<i32>} : memref<8x64xf32, #tpu.memory_space<vmem>>, vector<8x64xf32>,
    return
  }
  func.func @transform_0(%arg0: i32) -> (i32, i32, i32) {
    %c0_i32 = arith.constant 0 : i32
    %c0_i32_0 = arith.constant 0 : i32
    %c0_i32_1 = arith.constant 0 : i32
    return %arg0, %c0_i32, %c0_i32_0 : i32, i32, i32
  }
  func.func @transform_1(%arg0: i32) -> (i32, i32) {
    %c0_i32 = arith.constant 0 : i32
    %c0_i32_0 = arith.constant 0 : i32
    %c0_i32_1 = arith.constant 0 : i32
    return %c0_i32, %c0_i32_0 : i32, i32
  }
  func.func @transform_2(%arg0: i32) -> (i32, i32) {
    %c0_i32 = arith.constant 0 : i32
    %c0_i32_0 = arith.constant 0 : i32
    %c0_i32_1 = arith.constant 0 : i32
    return %c0_i32, %c0_i32_0 : i32, i32
  }
  func.func @transform_3(%arg0: i32) -> (i32, i32) {
    %c0_i32 = arith.constant 0 : i32
    %c0_i32_0 = arith.constant 0 : i32
    %c0_i32_1 = arith.constant 0 : i32
    return %c0_i32, %c0_i32_0 : i32, i32
  }
  func.func @transform_4(%arg0: i32) -> (i32, i32) {
    %c0_i32 = arith.constant 0 : i32
    %c0_i32_0 = arith.constant 0 : i32
    %c0_i32_1 = arith.constant 0 : i32
    return %c0_i32, %c0_i32_0 : i32, i32
  }
  func.func @transform_5(%arg0: i32) -> (i32, i32) {
    %c0_i32 = arith.constant 0 : i32
    %c0_i32_0 = arith.constant 0 : i32
    %c0_i32_1 = arith.constant 0 : i32
    return %c0_i32, %c0_i32_0 : i32, i32
  }
  func.func @transform_6(%arg0: i32) -> (i32, i32) {
    %c0_i32 = arith.constant 0 : i32
    %c0_i32_0 = arith.constant 0 : i32
    %c0_i32_1 = arith.constant 0 : i32
    return %c0_i32, %c0_i32_0 : i32, i32
  }
  func.func @transform_7(%arg0: i32) -> (i32, i32) {
    %c0_i32 = arith.constant 0 : i32
    %c0_i32_0 = arith.constant 0 : i32
    %c0_i32_1 = arith.constant 0 : i32
    return %c0_i32, %c0_i32_0 : i32, i32
  }
  func.func @transform_8(%arg0: i32) -> (i32, i32) {
    %c0_i32 = arith.constant 0 : i32
    %c0_i32_0 = arith.constant 0 : i32
    return %arg0, %c0_i32 : i32, i32
  }
}

</mosaic_0001>

<bundles_post_ra>
// kernel: tpu_custom_call.1
= control target key start
LH: loop header
LB: loop body
LE: loop exit
PB: predicated region body
PF: predicated region fallthrough
CT: control target
= control target key end

     0   :  { %13 = vsyncpa [#allocation3], 0  ;;  %s5427_s0 = inlined_call_operand.hbm [shape: bf16[8,32,128], index: 0, kind: input, shape index: {}]   ;;  %s5428_s1 = inlined_call_operand.hbm [shape: bf16[128,256], index: 1, kind: input, shape index: {}]   ;;  %s5429_s2 = inlined_call_operand.hbm [shape: f32[1,256], index: 2, kind: input, shape index: {}]   ;;  %s5430_s3 = inlined_call_operand.hbm [shape: bf16[256,512], index: 3, kind: input, shape index: {}]   ;;  %s5431_s4 = inlined_call_operand.hbm [shape: bf16[256,512], index: 4, kind: input, shape index: {}]   ;;  %s5432_s5 = inlined_call_operand.hbm [shape: f32[1,512], index: 5, kind: input, shape index: {}]   ;;  %s5433_s6 = inlined_call_operand.hbm [shape: bf16[512,64], index: 6, kind: input, shape index: {}]   ;;  %s5434_s7 = inlined_call_operand.hbm [shape: f32[1,64], index: 7, kind: input, shape index: {}]   ;;  %s5435_s8 = inlined_call_operand.hbm [shape: f32[8,64], index: 8, kind: output, shape index: {}]  }
   0x1   :  { %14 = vsyncpa [#allocation6], 0 }
   0x2   :  { %15 = vsyncpa [#allocation9], 0 }
   0x3   :  { %16 = vsyncpa [#allocation12], 0 }
   0x4   :  { %17 = vsyncpa [#allocation15], 0 }
   0x5   :  { %18 = vsyncpa [#allocation4], 0  ;;  %s4288_s27 = smov [#allocation5]   ;;  %s4078_s9 = scalar_lea.hbm %s5428_s1, 2048 }
   0x6   :  { %s36_s28 = sshll.u32 %s4288_s27, 4  ;;  %p4079_p0 = scmp.ne.s32.totalorder %s5428_s1, %s4078_s9  ;;  %s37_s28 = int_to_ptr.vmem [resolvable:$true] %s36_s28 }
   0x7   :  { %p4082_p1 = scmp.lt.u32.totalorder %s4078_s9, %s5428_s1 }
   0x9   :  { %p4084_p2 = pnand %p4082_p1, %p4079_p0 }
   0xb   :  { %4087 = shalt.err (!%p4084_p2)
}
   0xc   :  { %s4088_s14 = scalar_lea.vmem %s37_s28, 2048  ;;  %p4093_p4 = scmp.lt.s32.totalorder %s37_s28, %s37_s28 }
   0xd   :  { %p4089_p3 = scmp.ne.s32.totalorder %s37_s28, %s4088_s14  ;;  %p4094_p5 = scmp.lt.s32.totalorder %s4088_s14, %s4088_s14 }
   0xf   :  { %p4095_p6 = por %p4094_p5, %p4093_p4 }
  0x11   :  { %p4096_p7 = pnand %p4095_p6, %p4089_p3 }
  0x13   :  { %4099 = shalt.err (!%p4096_p7)
}
  0x14   :  { %s4289_s15 = smov 128   ;;  %s4290_s16 = smov 8  }
  0x15   :  { %42 = dma.hbm_to_vmem [thread:$0]  %s5428_s1, 2048, %s37_s28, [#allocation6], %s4289_s15, %s4289_s15, %s4290_s16  }
  0x16   :  { %s4291_s19 = smov [#allocation8]   ;;  %s4100_s23 = scalar_lea.hbm %s5430_s3, 8192 }
  0x17   :  { %s58_s20 = sshll.u32 %s4291_s19, 4  ;;  %p4101_p8 = scmp.ne.s32.totalorder %s5430_s3, %s4100_s23  ;;  %s59_s20 = int_to_ptr.vmem [resolvable:$true] %s58_s20 }
  0x18   :  { %p4104_p9 = scmp.lt.u32.totalorder %s4100_s23, %s5430_s3 }
  0x1a   :  { %p4106_p10 = pnand %p4104_p9, %p4101_p8 }
  0x1c   :  { %4109 = shalt.err (!%p4106_p10)
}
  0x1d   :  { %s4110_s29 = scalar_lea.vmem %s59_s20, 8192  ;;  %p4115_p12 = scmp.lt.s32.totalorder %s59_s20, %s59_s20 }
  0x1e   :  { %p4111_p11 = scmp.ne.s32.totalorder %s59_s20, %s4110_s29  ;;  %p4116_p13 = scmp.lt.s32.totalorder %s4110_s29, %s4110_s29 }
  0x20   :  { %p4117_p0 = por %p4116_p13, %p4115_p12 }
  0x22   :  { %p4118_p1 = pnand %p4117_p0, %p4111_p11 }
  0x24   :  { %4121 = shalt.err (!%p4118_p1)
}
  0x25   :  { %s4292_s1 = smov 256   ;;  %s4293_s28 = smov 16  }
  0x26   :  { %64 = dma.hbm_to_vmem [thread:$0]  %s5430_s3, 8192, %s59_s20, [#allocation9], %s4292_s1, %s4292_s1, %s4293_s28  }
  0x27   :  { %s4294_s10 = smov [#allocation11]   ;;  %s4295_s12 = smov [#allocation2]  }
  0x28   :  { %s83_s11 = sshll.u32 %s4294_s10, 4  ;;  %s24_s13 = sshll.u32 %s4295_s12, 4  ;;  %s84_s11 = int_to_ptr.vmem [resolvable:$true] %s83_s11  ;;  %s4377_s13 = int_to_ptr.vmem [resolvable:$true] %s24_s13 }
  0x29   :  { %s4122_s16 = scalar_lea.hbm %s5432_s5, 64 }
  0x2a   :  { %p4123_p2 = scmp.ne.s32.totalorder %s5432_s5, %s4122_s16  ;;  %p4126_p3 = scmp.lt.u32.totalorder %s4122_s16, %s5432_s5 }
  0x2c   :  { %p4128_p4 = pnand %p4126_p3, %p4123_p2 }
  0x2e   :  { %4131 = shalt.err (!%p4128_p4)
}
  0x2f   :  { %s4132_s3 = scalar_lea.vmem %s84_s11, 64  ;;  %p4137_p6 = scmp.lt.s32.totalorder %s84_s11, %s84_s11 }
  0x30   :  { %p4133_p5 = scmp.ne.s32.totalorder %s84_s11, %s4132_s3  ;;  %p4138_p7 = scmp.lt.s32.totalorder %s4132_s3, %s4132_s3 }
  0x32   :  { %p4139_p8 = por %p4138_p7, %p4137_p6 }
  0x34   :  { %p4140_p9 = pnand %p4139_p8, %p4133_p5 }
  0x36   :  { %4143 = shalt.err (!%p4140_p9)
}
  0x37   :  { %86 = dma.hbm_to_vmem [thread:$0]  %s5432_s5, 64, %s84_s11, [#allocation12]  }
  0x38   :  { %s4144_s25 = scalar_lea.hbm %s5427_s0, 2048 }
  0x39   :  { %p4145_p10 = scmp.ne.s32.totalorder %s5427_s0, %s4144_s25  ;;  %p4148_p11 = scmp.lt.u32.totalorder %s4144_s25, %s5427_s0 }
  0x3b   :  { %p4150_p12 = pnand %p4148_p11, %p4145_p10 }
  0x3d   :  { %4153 = shalt.err (!%p4150_p12)
}
  0x3e   :  { %s4154_s9 = scalar_lea.vmem %s4377_s13, 2048  ;;  %p4159_p0 = scmp.lt.s32.totalorder %s4377_s13, %s4377_s13 }
  0x3f   :  { %p4155_p13 = scmp.ne.s32.totalorder %s4377_s13, %s4154_s9  ;;  %p4160_p1 = scmp.lt.s32.totalorder %s4154_s9, %s4154_s9 }
  0x41   :  { %p4161_p2 = por %p4160_p1, %p4159_p0 }
  0x43   :  { %p4162_p3 = pnand %p4161_p2, %p4155_p13 }
  0x45   :  { %4165 = shalt.err (!%p4162_p3)
}
  0x46   :  { %s4296_s5 = smov 64   ;;  %s4297_s10 = smov 4  }
  0x47   :  { %30 = dma.hbm_to_vmem [thread:$0]  %s5427_s0, 2048, %s4377_s13, [#allocation3], %s4296_s5, %s4296_s5, %s4297_s10  }
  0x48   :  { %s4298_s14 = smov [#allocation7]   ;;  %s4299_s16 = smov [#allocation10]  }
  0x49   :  { %s49_s15 = sshll.u32 %s4298_s14, 4  ;;  %s70_s17 = sshll.u32 %s4299_s16, 4  ;;  %s50_s15 = int_to_ptr.vmem [resolvable:$true] %s49_s15  ;;  %s4411_s17 = int_to_ptr.vmem [resolvable:$true] %s70_s17 }
  0x4a   :  { %s4166_s21 = scalar_lea.hbm %s5429_s2, 32 }
  0x4b   :  { %p4167_p4 = scmp.ne.s32.totalorder %s5429_s2, %s4166_s21  ;;  %p4170_p5 = scmp.lt.u32.totalorder %s4166_s21, %s5429_s2 }
  0x4d   :  { %p4172_p6 = pnand %p4170_p5, %p4167_p4 }
  0x4f   :  { %4175 = shalt.err (!%p4172_p6)
}
  0x50   :  { %s4176_s0 = scalar_lea.vmem %s50_s15, 32  ;;  %p4181_p8 = scmp.lt.s32.totalorder %s50_s15, %s50_s15 }
  0x51   :  { %p4177_p7 = scmp.ne.s32.totalorder %s50_s15, %s4176_s0  ;;  %p4182_p9 = scmp.lt.s32.totalorder %s4176_s0, %s4176_s0 }
  0x53   :  { %p4183_p10 = por %p4182_p9, %p4181_p8 }
  0x55   :  { %p4184_p11 = pnand %p4183_p10, %p4177_p7 }
  0x57   :  { %4187 = shalt.err (!%p4184_p11)
}
  0x58   :  { %52 = dma.hbm_to_vmem [thread:$0]  %s5429_s2, 32, %s50_s15, [#allocation6]  }
  0x59   :  { %s4188_s27 = scalar_lea.hbm %s5431_s4, 8192 }
  0x5a   :  { %p4189_p12 = scmp.ne.s32.totalorder %s5431_s4, %s4188_s27  ;;  %p4192_p13 = scmp.lt.u32.totalorder %s4188_s27, %s5431_s4 }
  0x5c   :  { %p4194_p0 = pnand %p4192_p13, %p4189_p12 }
  0x5e   :  { %4197 = shalt.err (!%p4194_p0)
}
  0x5f   :  { %s4198_s12 = scalar_lea.vmem %s4411_s17, 8192  ;;  %p4203_p2 = scmp.lt.s32.totalorder %s4411_s17, %s4411_s17 }
  0x60   :  { %p4199_p1 = scmp.ne.s32.totalorder %s4411_s17, %s4198_s12  ;;  %p4204_p3 = scmp.lt.s32.totalorder %s4198_s12, %s4198_s12 }
  0x62   :  { %p4205_p4 = por %p4204_p3, %p4203_p2 }
  0x64   :  { %p4206_p5 = pnand %p4205_p4, %p4199_p1 }
  0x66   :  { %4209 = shalt.err (!%p4206_p5)
}
  0x67   :  { %76 = dma.hbm_to_vmem [thread:$0]  %s5431_s4, 8192, %s4411_s17, [#allocation9], %s4292_s1, %s4292_s1, %s4293_s28  }
  0x68   :  { %s4300_s15 = smov [#allocation13]   ;;  %s4301_s18 = smov [#allocation14]  }
  0x69   :  { %s92_s16 = sshll.u32 %s4300_s15, 4  ;;  %s105_s19 = sshll.u32 %s4301_s18, 4  ;;  %s93_s16 = int_to_ptr.vmem [resolvable:$true] %s92_s16  ;;  %s106_s19 = int_to_ptr.vmem [resolvable:$true] %s105_s19 }
  0x6a   :  { %s4210_s20 = scalar_lea.hbm %s5433_s6, 4096 }
  0x6b   :  { %p4211_p6 = scmp.ne.s32.totalorder %s5433_s6, %s4210_s20  ;;  %p4214_p7 = scmp.lt.u32.totalorder %s4210_s20, %s5433_s6 }
  0x6d   :  { %p4216_p8 = pnand %p4214_p7, %p4211_p6 }
  0x6f   :  { %4219 = shalt.err (!%p4216_p8)
}
  0x70   :  { %s4220_s4 = scalar_lea.vmem %s93_s16, 4096  ;;  %p4225_p10 = scmp.lt.s32.totalorder %s93_s16, %s93_s16 }
  0x71   :  { %p4221_p9 = scmp.ne.s32.totalorder %s93_s16, %s4220_s4  ;;  %p4226_p11 = scmp.lt.s32.totalorder %s4220_s4, %s4220_s4 }
  0x73   :  { %p4227_p12 = por %p4226_p11, %p4225_p10 }
  0x75   :  { %p4228_p13 = pnand %p4227_p12, %p4221_p9 }
  0x77   :  { %4231 = shalt.err (!%p4228_p13)
}
  0x78   :  { %98 = dma.hbm_to_vmem [thread:$0]  %s5433_s6, 4096, %s93_s16, [#allocation12], %s4296_s5, %s4296_s5, %s4297_s10  }
  0x79   :  { %s4232_s25 = scalar_lea.hbm %s5434_s7, 16 }
  0x7a   :  { %p4233_p0 = scmp.ne.s32.totalorder %s5434_s7, %s4232_s25  ;;  %p4236_p1 = scmp.lt.u32.totalorder %s4232_s25, %s5434_s7 }
  0x7c   :  { %p4238_p2 = pnand %p4236_p1, %p4233_p0 }
  0x7e   :  { %4241 = shalt.err (!%p4238_p2)
}
  0x7f   :  { %s4242_s9 = scalar_lea.vmem %s106_s19, 16  ;;  %s4246_s11 = scalar_lea.vmem %s106_s19, 32 }
  0x80   :  { %p4243_p3 = scmp.ne.s32.totalorder %s106_s19, %s4242_s9  ;;  %p4247_p4 = scmp.lt.s32.totalorder %s106_s19, %s106_s19 }
  0x81   :  { %p4248_p5 = scmp.lt.s32.totalorder %s4246_s11, %s4242_s9 }
  0x83   :  { %p4249_p6 = por %p4248_p5, %p4247_p4 }
  0x85   :  { %p4250_p7 = pnand %p4249_p6, %p4243_p3 }
  0x87   :  { %4253 = shalt.err (!%p4250_p7)
}
  0x88   :  { %108 = dma.hbm_to_vmem [thread:$0]  %s5434_s7, 16, %s106_s19, [#allocation15]  }
  0x89   :  { %4276 = dma.done.wait [#allocation3], 2048  }
  0x8a   :  { %4277 = vsyncadd [#allocation3], 4294965248 }
  0x8b   :  { %4278 = dma.done.wait [#allocation6], 2080  }
  0x8c   :  { %4279 = vsyncadd [#allocation6], 4294965216 }
  0x8d   :  { %4280 = dma.done.wait [#allocation9], 16384  }
  0x8e   :  { %4281 = vsyncadd [#allocation9], 4294950912 }
  0x8f   :  { %4282 = dma.done.wait [#allocation12], 4160  }
  0x90   :  { %4283 = vsyncadd [#allocation12], 4294963136 }
  0x91   :  { %4284 = dma.done.wait [#allocation15], 16  }
  0x92   :  { %4285 = vsyncadd [#allocation15], 4294967280  ;;  %v4302_v0 = vmov 0   ;;  %v3814_v1 = vld [vmem:[#allocation5 + $0x4] ss:$8 sps:$4 sm:$0xff]   ;;  %v3840_v28 = vld [vmem:[#allocation2 + $0x10] sm:$0xff]  }
  0x93   :  { %402 = vmatprep.mubr.bf16.mxu0 %v4302_v0  ;;  %v3816_v2 = vld [vmem:[#allocation5] ss:$8 sps:$4 sm:$0xff]   ;;  %370 = vmatprep.subr.bf16.mxu0 %v3814_v1  ;;  %v3817_v3 = vld [vmem:[#allocation5 + $0x14] ss:$8 sps:$4 sm:$0xff]   ;;  %v3819_v4 = vld [vmem:[#allocation5 + $0x10] ss:$8 sps:$4 sm:$0xff]  }
  0x94   :  { %371 = vmatpush1.bf16.msra.mxu0 %v3816_v2  ;;  %v3820_v5 = vld [vmem:[#allocation5 + $0x24] ss:$8 sps:$4 sm:$0xff]   ;;  %v3822_v6 = vld [vmem:[#allocation5 + $0x20] ss:$8 sps:$4 sm:$0xff]   ;;  %v3823_v7 = vld [vmem:[#allocation5 + $0x34] ss:$8 sps:$4 sm:$0xff]  }
  0x95   :  { %372 = vmatprep.subr.bf16.mxu0 %v3817_v3  ;;  %v3825_v8 = vld [vmem:[#allocation5 + $0x30] ss:$8 sps:$4 sm:$0xff]   ;;  %v3826_v9 = vld [vmem:[#allocation5 + $0x44] ss:$8 sps:$4 sm:$0xff]   ;;  %v3828_v10 = vld [vmem:[#allocation5 + $0x40] ss:$8 sps:$4 sm:$0xff]  }
  0x96   :  { %v3829_v11 = vld [vmem:[#allocation5 + $0x54] ss:$8 sps:$4 sm:$0xff]   ;;  %v3831_v12 = vld [vmem:[#allocation5 + $0x50] ss:$8 sps:$4 sm:$0xff]   ;;  %v3832_v13 = vld [vmem:[#allocation5 + $0x64] ss:$8 sps:$4 sm:$0xff]  }
  0x97   :  { %v3834_v14 = vld [vmem:[#allocation5 + $0x60] ss:$8 sps:$4 sm:$0xff]   ;;  %v3835_v15 = vld [vmem:[#allocation5 + $0x74] ss:$8 sps:$4 sm:$0xff]   ;;  %v3837_v16 = vld [vmem:[#allocation5 + $0x70] ss:$8 sps:$4 sm:$0xff]  }
  0x98   :  { %373 = vmatpush1.bf16.msra.mxu0 %v3819_v4  ;;  %v3856_v17 = vld [vmem:[#allocation10 + $0x4] ss:$16 sps:$4 sm:$0xff]   ;;  %v3854_v19 = vld [vmem:[#allocation10] ss:$16 sps:$4 sm:$0xff]   ;;  %vm889_vm0 = vcmask 1041409   ;;  %vm891_vm1 = vcmask 1042434  }
  0x99   :  { %374 = vmatprep.subr.bf16.mxu0 %v3820_v5  ;;  %v3838_v18 = vld [vmem:[#allocation2] sm:$0xff]   ;;  %v3839_v23 = vld [vmem:[#allocation2 + $0x8] sm:$0xff]   ;;  %v3841_v33 = vld [vmem:[#allocation2 + $0x18] sm:$0xff]   ;;  %vm893_vm2 = vcmask 1043459   ;;  %vm895_vm3 = vcmask 1044484   ;;  %vm897_vm4 = vcmask 1045509  }
  0x9a   :  { %v3859_v20 = vld [vmem:[#allocation10 + $0x24] ss:$16 sps:$4 sm:$0xff]   ;;  %v3857_v21 = vld [vmem:[#allocation10 + $0x20] ss:$16 sps:$4 sm:$0xff]   ;;  %vm899_vm5 = vcmask 1046534   ;;  %vm901_vm6 = vcmask 1047559  }
  0x9b   :  { %v3862_v22 = vld [vmem:[#allocation10 + $0x44] ss:$16 sps:$4 sm:$0xff]   ;;  %v3860_v24 = vld [vmem:[#allocation10 + $0x40] ss:$16 sps:$4 sm:$0xff]   ;;  %vm3223_vm7 = vcmask 523264   ;;  %s4304_s7 = smov [#allocation16]  }
  0x9c   :  { %375 = vmatpush1.bf16.msra.mxu0 %v3822_v6  ;;  %v3865_v25 = vld [vmem:[#allocation10 + $0x64] ss:$16 sps:$4 sm:$0xff]   ;;  %v3863_v26 = vld [vmem:[#allocation10 + $0x60] ss:$16 sps:$4 sm:$0xff]   ;;  %s3351_s10 = sshll.u32 %s4304_s7, 4  ;;  %s3352_s10 = int_to_ptr.vmem [resolvable:$true] %s3351_s10 }
  0x9d   :  { %376 = vmatprep.subr.bf16.mxu0 %v3823_v7  ;;  %v3868_v27 = vld [vmem:[#allocation10 + $0x84] ss:$16 sps:$4 sm:$0xff]   ;;  %v3866_v29 = vld [vmem:[#allocation10 + $0x80] ss:$16 sps:$4 sm:$0xff]   ;;  %s4254_s12 = scalar_lea.vmem %s3352_s10, 128  ;;  %p4259_p9 = scmp.lt.s32.totalorder %s3352_s10, %s3352_s10 }
  0x9e   :  { %v3871_v30 = vld [vmem:[#allocation10 + $0xa4] ss:$16 sps:$4 sm:$0xff]   ;;  %v3869_v31 = vld [vmem:[#allocation10 + $0xa0] ss:$16 sps:$4 sm:$0xff]   ;;  %p4255_p8 = scmp.ne.s32.totalorder %s3352_s10, %s4254_s12  ;;  %p4260_p10 = scmp.lt.s32.totalorder %s4254_s12, %s4254_s12 }
  0x9f   :  { %v3874_v32 = vld [vmem:[#allocation10 + $0xc4] ss:$16 sps:$4 sm:$0xff]   ;;  %v3872_v34 = vld [vmem:[#allocation10 + $0xc0] ss:$16 sps:$4 sm:$0xff]  }
  0xa0   :  { %377 = vmatpush1.bf16.msra.mxu0 %v3825_v8  ;;  %v3877_v35 = vld [vmem:[#allocation10 + $0xe4] ss:$16 sps:$4 sm:$0xff]   ;;  %v3875_v36 = vld [vmem:[#allocation10 + $0xe0] ss:$16 sps:$4 sm:$0xff]   ;;  %p4261_p11 = por %p4260_p10, %p4259_p9 }
  0xa1   :  { %378 = vmatprep.subr.bf16.mxu0 %v3826_v9  ;;  %v3880_v37 = vld [vmem:[#allocation10 + $0x104] ss:$16 sps:$4 sm:$0xff]   ;;  %v3878_v39 = vld [vmem:[#allocation10 + $0x100] ss:$16 sps:$4 sm:$0xff]  }
  0xa2   :  { %v3842_v38 = vld [vmem:[#allocation2 + $0x20] sm:$0xff]   ;;  %v3843_v43 = vld [vmem:[#allocation2 + $0x28] sm:$0xff]   ;;  %v3844_v48 = vld [vmem:[#allocation2 + $0x30] sm:$0xff]   ;;  %p4262_p12 = pnand %p4261_p11, %p4255_p8 }
  0xa3   :  { %v3883_v40 = vld [vmem:[#allocation10 + $0x124] ss:$16 sps:$4 sm:$0xff]   ;;  %v3881_v41 = vld [vmem:[#allocation10 + $0x120] ss:$16 sps:$4 sm:$0xff]  }
  0xa4   :  { %379 = vmatpush1.bf16.msra.mxu0 %v3828_v10  ;;  %v3886_v42 = vld [vmem:[#allocation10 + $0x144] ss:$16 sps:$4 sm:$0xff]   ;;  %v3884_v44 = vld [vmem:[#allocation10 + $0x140] ss:$16 sps:$4 sm:$0xff]  }
  0xa5   :  { %380 = vmatprep.subr.bf16.mxu0 %v3829_v11  ;;  %v3889_v45 = vld [vmem:[#allocation10 + $0x164] ss:$16 sps:$4 sm:$0xff]   ;;  %v3887_v46 = vld [vmem:[#allocation10 + $0x160] ss:$16 sps:$4 sm:$0xff]  }
  0xa6   :  { %v3892_v47 = vld [vmem:[#allocation10 + $0x184] ss:$16 sps:$4 sm:$0xff]   ;;  %v3890_v49 = vld [vmem:[#allocation10 + $0x180] ss:$16 sps:$4 sm:$0xff]  }
  0xa7   :  { %v3895_v50 = vld [vmem:[#allocation10 + $0x1a4] ss:$16 sps:$4 sm:$0xff]   ;;  %v3893_v51 = vld [vmem:[#allocation10 + $0x1a0] ss:$16 sps:$4 sm:$0xff]  }
  0xa8   :  { %381 = vmatpush1.bf16.msra.mxu0 %v3831_v12  ;;  %v3845_v52 = vld [vmem:[#allocation2 + $0x38] sm:$0xff]   ;;  %v3846_v53 = vld [vmem:[#allocation2 + $0x40] sm:$0xff]   ;;  %v3847_v54 = vld [vmem:[#allocation2 + $0x48] sm:$0xff]  }
  0xa9   :  { %382 = vmatprep.subr.bf16.mxu0 %v3832_v13  ;;  %v3848_v55 = vld [vmem:[#allocation2 + $0x50] sm:$0xff]   ;;  %v3849_v58 = vld [vmem:[#allocation2 + $0x58] sm:$0xff]   ;;  %v3850_v61 = vld [vmem:[#allocation2 + $0x60] sm:$0xff]  }
  0xaa   :  { %v3898_v56 = vld [vmem:[#allocation10 + $0x1c4] ss:$16 sps:$4 sm:$0xff]   ;;  %v3896_v57 = vld [vmem:[#allocation10 + $0x1c0] ss:$16 sps:$4 sm:$0xff]  }
  0xab   :  { %v3901_v59 = vld [vmem:[#allocation10 + $0x1e4] ss:$16 sps:$4 sm:$0xff]   ;;  %v3899_v60 = vld [vmem:[#allocation10 + $0x1e0] ss:$16 sps:$4 sm:$0xff]  }
  0xac   :  { %383 = vmatpush1.bf16.msra.mxu0 %v3834_v14  ;;  %v3851_v62 = vld [vmem:[#allocation2 + $0x68] sm:$0xff]   ;;  %v3852_v63 = vld [vmem:[#allocation2 + $0x70] sm:$0xff]   ;;  %v3853_v1 = vld [vmem:[#allocation2 + $0x78] sm:$0xff]  }
  0xad   :  { %384 = vmatprep.subr.bf16.mxu0 %v3835_v15  ;;  %v3902_v2 = vld [vmem:[#allocation8 + $0x4] ss:$16 sps:$4 sm:$0xff]   ;;  %v3904_v3 = vld [vmem:[#allocation8] ss:$16 sps:$4 sm:$0xff]   ;;  %v184_v15 = vlaneseq }
  0xae   :  { %1234 = vmatprep.subr.bf16.mxu1 %v3902_v2  ;;  %v3905_v4 = vld [vmem:[#allocation8 + $0x24] ss:$16 sps:$4 sm:$0xff]   ;;  %v3907_v5 = vld [vmem:[#allocation8 + $0x20] ss:$16 sps:$4 sm:$0xff]  }
  0xaf   :  { %1235 = vmatpush1.bf16.msra.mxu1 %v3904_v3  ;;  %v3908_v6 = vld [vmem:[#allocation8 + $0x44] ss:$16 sps:$4 sm:$0xff]   ;;  %v3910_v7 = vld [vmem:[#allocation8 + $0x40] ss:$16 sps:$4 sm:$0xff]  }
  0xb0   :  { %385 = vmatpush1.bf16.msra.mxu0 %v3837_v16  ;;  %1236 = vmatprep.subr.bf16.mxu1 %v3905_v4  ;;  %v3911_v8 = vld [vmem:[#allocation8 + $0x64] ss:$16 sps:$4 sm:$0xff]   ;;  %v3913_v9 = vld [vmem:[#allocation8 + $0x60] ss:$16 sps:$4 sm:$0xff]  }
  0xb1   :  { %1700 = vmatprep.subr.bf16.mxu0 %v3856_v17  ;;  %v3914_v10 = vld [vmem:[#allocation8 + $0x84] ss:$16 sps:$4 sm:$0xff]   ;;  %v3919_v12 = vld [vmem:[#allocation8 + $0xa0] ss:$16 sps:$4 sm:$0xff]  }
  0xb2   :  { %v3917_v11 = vld [vmem:[#allocation8 + $0xa4] ss:$16 sps:$4 sm:$0xff]   ;;  %v3922_v14 = vld [vmem:[#allocation8 + $0xc0] ss:$16 sps:$4 sm:$0xff]  }
  0xb3   :  { %403 = vmatmul.mubr.bf16.vlgmr.msra.gmra.mrb[0].mxu0 %v3838_v18  ;;  %1237 = vmatpush1.bf16.msra.mxu1 %v3907_v5  ;;  %v3920_v13 = vld [vmem:[#allocation8 + $0xc4] ss:$16 sps:$4 sm:$0xff]   ;;  %v3925_v17 = vld [vmem:[#allocation8 + $0xe0] ss:$16 sps:$4 sm:$0xff]   ;;  %v4488_v18 = vshrl.u32 %v184_v15, 7 }
  0xb4   :  { %412 = vmatprep.mubr.bf16.mxu0 %v4302_v0  ;;  %1701 = vmatpush1.bf16.msra.mxu0 %v3854_v19  ;;  %v3923_v16 = vld [vmem:[#allocation8 + $0xe4] ss:$16 sps:$4 sm:$0xff]  }
  0xb5   :  { %1702 = vmatprep.subr.bf16.mxu0 %v3859_v20  ;;  %1238 = vmatprep.subr.bf16.mxu1 %v3908_v6  ;;  %5474 = vst [vmem:[#allocation23_spill] sm:$0xff] %v4488_v18  ;;  %v3926_v19 = vld [vmem:[#allocation8 + $0x104] ss:$16 sps:$4 sm:$0xff]   ;;  %v3928_v20 = vld [vmem:[#allocation8 + $0x100] ss:$16 sps:$4 sm:$0xff]  }
  0xb7   :  { %1239 = vmatpush1.bf16.msra.mxu1 %v3910_v7  ;;  %v3952_v7 = vld [vmem:[#allocation8 + $0xc] ss:$16 sps:$4 sm:$0xff]  }
  0xb8   :  { %1703 = vmatpush1.bf16.msra.mxu0 %v3857_v21  ;;  %1240 = vmatprep.subr.bf16.mxu1 %v3911_v8  ;;  %v4491_v21 = vsub.s32 0, %v4488_v18 }
  0xb9   :  { %1704 = vmatprep.subr.bf16.mxu0 %v3862_v22  ;;  %v3929_v22 = vld [vmem:[#allocation8 + $0x124] ss:$16 sps:$4 sm:$0xff]  }
  0xba   :  { %5475 = vst [vmem:[#allocation24_spill] sm:$0xff] %v4491_v21 }
  0xbb   :  { %413 = vmatmul.mubr.bf16.gmra.mrb[4].mxu0 %v3839_v23  ;;  %1241 = vmatpush1.bf16.msra.mxu1 %v3913_v9  ;;  %v182_v23 = vld [vmem:[#allocation7] sm:$0x3] }
  0xbc   :  { %422 = vmatprep.mubr.bf16.mxu0 %v4302_v0  ;;  %1705 = vmatpush1.bf16.msra.mxu0 %v3860_v24  ;;  %v4494_v24 = vsub.s32 1, %v4488_v18 }
  0xbd   :  { %1706 = vmatprep.subr.bf16.mxu0 %v3865_v25  ;;  %1242 = vmatprep.subr.bf16.mxu1 %v3914_v10  ;;  %v3931_v25 = vld [vmem:[#allocation8 + $0x120] ss:$16 sps:$4 sm:$0xff]  }
  0xbe   :  { %5476 = vst [vmem:[#allocation25_spill] sm:$0xff] %v4494_v24 }
  0xc0   :  { %1707 = vmatpush1.bf16.msra.mxu0 %v3863_v26  ;;  %v4497_v26 = vrot.slane %v182_v23, %v4491_v21 }
  0xc1   :  { %1708 = vmatprep.subr.bf16.mxu0 %v3868_v27  ;;  %v3932_v27 = vld [vmem:[#allocation8 + $0x144] ss:$16 sps:$4 sm:$0xff]  }
  0xc3   :  { %423 = vmatmul.mubr.bf16.gmra.mrb[8].mxu0 %v3840_v28 }
  0xc4   :  { %432 = vmatprep.mubr.bf16.mxu0 %v4302_v0  ;;  %1709 = vmatpush1.bf16.msra.mxu0 %v3866_v29  ;;  %v4500_v29 = vrot.slane %v182_v23, %v4494_v24 }
  0xc5   :  { %1710 = vmatprep.subr.bf16.mxu0 %v3871_v30  ;;  %v3934_v30 = vld [vmem:[#allocation8 + $0x140] ss:$16 sps:$4 sm:$0xff]  }
  0xc8   :  { %1711 = vmatpush1.bf16.msra.mxu0 %v3869_v31 }
  0xc9   :  { %1712 = vmatprep.subr.bf16.mxu0 %v3874_v32 }
  0xcb   :  { %433 = vmatmul.mubr.bf16.gmra.mrb[12].mxu0 %v3841_v33 }
  0xcc   :  { %442 = vmatprep.mubr.bf16.mxu0 %v4302_v0  ;;  %1713 = vmatpush1.bf16.msra.mxu0 %v3872_v34 }
  0xcd   :  { %1714 = vmatprep.subr.bf16.mxu0 %v3877_v35 }
  0xd0   :  { %1715 = vmatpush1.bf16.msra.mxu0 %v3875_v36  ;;  %v3935_v36 = vld [vmem:[#allocation8 + $0x164] ss:$16 sps:$4 sm:$0xff]  }
  0xd1   :  { %1716 = vmatprep.subr.bf16.mxu0 %v3880_v37 }
  0xd3   :  { %443 = vmatmul.mubr.bf16.gmra.mrb[16].mxu0 %v3842_v38 }
  0xd4   :  { %452 = vmatprep.mubr.bf16.mxu0 %v4302_v0  ;;  %1717 = vmatpush1.bf16.msra.mxu0 %v3878_v39  ;;  %v3937_v39 = vld [vmem:[#allocation8 + $0x160] ss:$16 sps:$4 sm:$0xff]  }
  0xd5   :  { %1718 = vmatprep.subr.bf16.mxu0 %v3883_v40 }
  0xd8   :  { %1719 = vmatpush1.bf16.msra.mxu0 %v3881_v41 }
  0xd9   :  { %1720 = vmatprep.subr.bf16.mxu0 %v3886_v42  ;;  %v3938_v42 = vld [vmem:[#allocation8 + $0x184] ss:$16 sps:$4 sm:$0xff]  }
  0xdb   :  { %453 = vmatmul.mubr.bf16.gmra.mrb[20].mxu0 %v3843_v43  ;;  %v3940_v43 = vld [vmem:[#allocation8 + $0x180] ss:$16 sps:$4 sm:$0xff]  }
  0xdc   :  { %462 = vmatprep.mubr.bf16.mxu0 %v4302_v0  ;;  %1721 = vmatpush1.bf16.msra.mxu0 %v3884_v44  ;;  %v3941_v44 = vld [vmem:[#allocation8 + $0x1a4] ss:$16 sps:$4 sm:$0xff]  }
  0xdd   :  { %1722 = vmatprep.subr.bf16.mxu0 %v3889_v45 }
  0xe0   :  { %1723 = vmatpush1.bf16.msra.mxu0 %v3887_v46 }
  0xe1   :  { %1724 = vmatprep.subr.bf16.mxu0 %v3892_v47 }
  0xe3   :  { %463 = vmatmul.mubr.bf16.gmra.mrb[24].mxu0 %v3844_v48  ;;  %v3943_v48 = vld [vmem:[#allocation8 + $0x1a0] ss:$16 sps:$4 sm:$0xff]  }
  0xe4   :  { %472 = vmatprep.mubr.bf16.mxu0 %v4302_v0  ;;  %1725 = vmatpush1.bf16.msra.mxu0 %v3890_v49 }
  0xe5   :  { %1726 = vmatprep.subr.bf16.mxu0 %v3895_v50 }
  0xe8   :  { %1727 = vmatpush1.bf16.msra.mxu0 %v3893_v51 }
  0xe9   :  { %1728 = vmatprep.subr.bf16.mxu0 %v3898_v56 }
  0xeb   :  { %473 = vmatmul.mubr.bf16.gmra.mrb[28].mxu0 %v3845_v52  ;;  %v3944_v52 = vld [vmem:[#allocation8 + $0x1c4] ss:$16 sps:$4 sm:$0xff]  }
  0xec   :  { %482 = vmatprep.mubr.bf16.mxu0 %v4302_v0  ;;  %1729 = vmatpush1.bf16.msra.mxu0 %v3896_v57  ;;  %v3946_v57 = vld [vmem:[#allocation8 + $0x1c0] ss:$16 sps:$4 sm:$0xff]  }
  0xed   :  { %1730 = vmatprep.subr.bf16.mxu0 %v3901_v59 }
  0xf0   :  { %1731 = vmatpush1.bf16.msra.mxu0 %v3899_v60 }
  0xf3   :  { %483 = vmatmul.mubr.bf16.gmra.mrb[32].mxu0 %v3846_v53 }
  0xf4   :  { %492 = vmatprep.mubr.bf16.mxu0 %v4302_v0 }
  0xfb   :  { %493 = vmatmul.mubr.bf16.gmra.mrb[36].mxu0 %v3847_v54 }
  0xfc   :  { %502 = vmatprep.mubr.bf16.mxu0 %v4302_v0 }
 0x103   :  { %503 = vmatmul.mubr.bf16.gmra.mrb[40].mxu0 %v3848_v55 }
 0x104   :  { %512 = vmatprep.mubr.bf16.mxu0 %v4302_v0 }
 0x10b   :  { %513 = vmatmul.mubr.bf16.gmra.mrb[44].mxu0 %v3849_v58  ;;  %v3947_v58 = vld [vmem:[#allocation8 + $0x1e4] ss:$16 sps:$4 sm:$0xff]  }
 0x10c   :  { %522 = vmatprep.mubr.bf16.mxu0 %v4302_v0 }
 0x113   :  { %523 = vmatmul.mubr.bf16.gmra.mrb[48].mxu0 %v3850_v61 }
 0x114   :  { %532 = vmatprep.mubr.bf16.mxu0 %v4302_v0 }
 0x11b   :  { %533 = vmatmul.mubr.bf16.gmra.mrb[52].mxu0 %v3851_v62  ;;  %v3949_v62 = vld [vmem:[#allocation8 + $0x1e0] ss:$16 sps:$4 sm:$0xff]  }
 0x11c   :  { %542 = vmatprep.mubr.bf16.mxu0 %v4302_v0 }
 0x123   :  { %543 = vmatmul.mubr.bf16.gmra.mrb[56].mxu0 %v3852_v63 }
 0x124   :  { %552 = vmatprep.mubr.bf16.mxu0 %v4302_v0  ;;  %v3916_v0 = vld [vmem:[#allocation8 + $0x80] ss:$16 sps:$4 sm:$0xff]  }
 0x125   :  { %1243 = vmatpush1.bf16.msra.mxu1 %v3916_v0 }
 0x126   :  { %1244 = vmatprep.subr.bf16.mxu1 %v3917_v11 }
 0x129   :  { %1245 = vmatpush1.bf16.msra.mxu1 %v3919_v12 }
 0x12a   :  { %1246 = vmatprep.subr.bf16.mxu1 %v3920_v13 }
 0x12b   :  { %553 = vmatmul.mubr.bf16.gmra.mrb[60].mxu0 %v3853_v1 }
 0x12d   :  { %1247 = vmatpush1.bf16.msra.mxu1 %v3922_v14 }
 0x12e   :  { %1248 = vmatprep.subr.bf16.mxu1 %v3923_v16 }
 0x131   :  { %1249 = vmatpush1.bf16.msra.mxu1 %v3925_v17 }
 0x132   :  { %1250 = vmatprep.subr.bf16.mxu1 %v3926_v19 }
 0x135   :  { %1251 = vmatpush1.bf16.msra.mxu1 %v3928_v20 }
 0x136   :  { %1252 = vmatprep.subr.bf16.mxu1 %v3929_v22 }
 0x139   :  { %1253 = vmatpush1.bf16.msra.mxu1 %v3931_v25 }
 0x13a   :  { %1254 = vmatprep.subr.bf16.mxu1 %v3932_v27 }
 0x13d   :  { %1255 = vmatpush1.bf16.msra.mxu1 %v3934_v30 }
 0x13e   :  { %1256 = vmatprep.subr.bf16.mxu1 %v3935_v36 }
 0x141   :  { %1257 = vmatpush1.bf16.msra.mxu1 %v3937_v39 }
 0x142   :  { %1258 = vmatprep.subr.bf16.mxu1 %v3938_v42 }
 0x145   :  { %1259 = vmatpush1.bf16.msra.mxu1 %v3940_v43 }
 0x146   :  { %1260 = vmatprep.subr.bf16.mxu1 %v3941_v44 }
 0x149   :  { %1261 = vmatpush1.bf16.msra.mxu1 %v3943_v48 }
 0x14a   :  { %1262 = vmatprep.subr.bf16.mxu1 %v3944_v52 }
 0x14d   :  { %1263 = vmatpush1.bf16.msra.mxu1 %v3946_v57 }
 0x14e   :  { %1264 = vmatprep.subr.bf16.mxu1 %v3947_v58 }
 0x151   :  { %1265 = vmatpush1.bf16.msra.mxu1 %v3949_v62 }
 0x152   :  { %1275 = vmatprep.subr.bf16.mxu1 %v3952_v7 }
 0x186   :  { %v404_v28 = vpop.f32.mrb[0].mxu0 }
 0x187   :  { %v406_v31 = vpop.f32.mrb[1].mxu0  ;;  %v405_v33 = vadd.f32 %v404_v28, %v4497_v26 }
 0x188   :  { %v408_v32 = vpop.f32.mrb[2].mxu0  ;;  %v407_v37 = vadd.f32 %v406_v31, %v4500_v29 }
 0x189   :  { %v409_v34 = vadd.f32 %v408_v32, %v4497_v26  ;;  %v410_v35 = vpop.f32.mrb[3].mxu0 }
 0x18a   :  { %v411_v38 = vadd.f32 %v410_v35, %v4500_v29 }
 0x18b   :  { %v4506_v40 = vpack.c.bf16 %v409_v34, %v405_v33 }
 0x18c   :  { %v4508_v41 = vpack.c.bf16 %v411_v38, %v407_v37 }
 0x18e   :  { %v414_v45 = vpop.f32.mrb[4].mxu0  ;;  %1732 = vmatprep.mubr.bf16.mxu0 %v4508_v41 }
 0x18f   :  { %v416_v46 = vpop.f32.mrb[5].mxu0  ;;  %1733 = vmatmul.mubr.bf16.vlgmr.msra.gmra.mrb[64].mxu0 %v4506_v40  ;;  %v415_v49 = vadd.f32 %v414_v45, %v4497_v26 }
 0x190   :  { %v418_v47 = vpop.f32.mrb[6].mxu0  ;;  %v417_v53 = vadd.f32 %v416_v46, %v4500_v29 }
 0x191   :  { %v419_v50 = vadd.f32 %v418_v47, %v4497_v26  ;;  %v420_v51 = vpop.f32.mrb[7].mxu0 }
 0x192   :  { %v421_v54 = vadd.f32 %v420_v51, %v4500_v29 }
 0x193   :  { %v4516_v55 = vpack.c.bf16 %v419_v50, %v415_v49 }
 0x194   :  { %v4518_v56 = vpack.c.bf16 %v421_v54, %v417_v53 }
 0x196   :  { %v424_v59 = vpop.f32.mrb[8].mxu0  ;;  %1742 = vmatprep.mubr.bf16.mxu0 %v4518_v56 }
 0x197   :  { %v426_v60 = vpop.f32.mrb[9].mxu0  ;;  %1743 = vmatmul.mubr.bf16.gmra.mrb[68].mxu0 %v4516_v55  ;;  %v425_v63 = vadd.f32 %v424_v59, %v4497_v26 }
 0x198   :  { %v428_v61 = vpop.f32.mrb[10].mxu0  ;;  %v427_v3 = vadd.f32 %v426_v60, %v4500_v29 }
 0x199   :  { %v429_v1 = vadd.f32 %v428_v61, %v4497_v26  ;;  %v430_v2 = vpop.f32.mrb[11].mxu0 }
 0x19a   :  { %v431_v4 = vadd.f32 %v430_v2, %v4500_v29 }
 0x19b   :  { %v4526_v5 = vpack.c.bf16 %v429_v1, %v425_v63 }
 0x19c   :  { %v4528_v6 = vpack.c.bf16 %v431_v4, %v427_v3 }
 0x19e   :  { %v434_v8 = vpop.f32.mrb[12].mxu0  ;;  %1752 = vmatprep.mubr.bf16.mxu0 %v4528_v6 }
 0x19f   :  { %v436_v9 = vpop.f32.mrb[13].mxu0  ;;  %1753 = vmatmul.mubr.bf16.gmra.mrb[72].mxu0 %v4526_v5  ;;  %v435_v0 = vadd.f32 %v434_v8, %v4497_v26 }
 0x1a0   :  { %v438_v10 = vpop.f32.mrb[14].mxu0  ;;  %v437_v13 = vadd.f32 %v436_v9, %v4500_v29 }
 0x1a1   :  { %v439_v11 = vadd.f32 %v438_v10, %v4497_v26  ;;  %v440_v12 = vpop.f32.mrb[15].mxu0 }
 0x1a2   :  { %v441_v14 = vadd.f32 %v440_v12, %v4500_v29 }
 0x1a3   :  { %v4536_v15 = vpack.c.bf16 %v439_v11, %v435_v0 }
 0x1a4   :  { %v4538_v16 = vpack.c.bf16 %v441_v14, %v437_v13  ;;  %v595_v13 = vmax.bf16 %v4516_v55, %v4506_v40  ;;  %v606_v14 = vmax.bf16 %v4518_v56, %v4508_v41 }
 0x1a6   :  { %v444_v17 = vpop.f32.mrb[16].mxu0  ;;  %1762 = vmatprep.mubr.bf16.mxu0 %v4538_v16 }
 0x1a7   :  { %v446_v19 = vpop.f32.mrb[17].mxu0  ;;  %1763 = vmatmul.mubr.bf16.gmra.mrb[76].mxu0 %v4536_v15  ;;  %v445_v22 = vadd.f32 %v444_v17, %v4497_v26 }
 0x1a8   :  { %v448_v20 = vpop.f32.mrb[18].mxu0  ;;  %v447_v27 = vadd.f32 %v446_v19, %v4500_v29 }
 0x1a9   :  { %v449_v23 = vadd.f32 %v448_v20, %v4497_v26  ;;  %v450_v25 = vpop.f32.mrb[19].mxu0 }
 0x1aa   :  { %v451_v28 = vadd.f32 %v450_v25, %v4500_v29  ;;  %v607_v25 = vunpack.i.l.bf16 %v606_v14 }
 0x1ab   :  { %v4546_v30 = vpack.c.bf16 %v449_v23, %v445_v22  ;;  %v596_v22 = vunpack.i.l.bf16 %v595_v13  ;;  %v597_v23 = vunpack.i.h.bf16 %v595_v13 }
 0x1ac   :  { %v4548_v31 = vpack.c.bf16 %v451_v28, %v447_v27  ;;  %v608_v27 = vunpack.i.h.bf16 %v606_v14 }
 0x1ae   :  { %v454_v32 = vpop.f32.mrb[20].mxu0  ;;  %1772 = vmatprep.mubr.bf16.mxu0 %v4548_v31 }
 0x1af   :  { %v456_v33 = vpop.f32.mrb[21].mxu0  ;;  %1773 = vmatmul.mubr.bf16.gmra.mrb[80].mxu0 %v4546_v30  ;;  %v455_v35 = vadd.f32 %v454_v32, %v4497_v26 }
 0x1b0   :  { %v458_v34 = vpop.f32.mrb[22].mxu0  ;;  %v457_v38 = vadd.f32 %v456_v33, %v4500_v29 }
 0x1b1   :  { %v459_v36 = vadd.f32 %v458_v34, %v4497_v26  ;;  %v460_v37 = vpop.f32.mrb[23].mxu0 }
 0x1b2   :  { %v461_v39 = vadd.f32 %v460_v37, %v4500_v29 }
 0x1b3   :  { %v4556_v42 = vpack.c.bf16 %v459_v36, %v455_v35 }
 0x1b4   :  { %v4558_v43 = vpack.c.bf16 %v461_v39, %v457_v38  ;;  %v598_v38 = vmax.f32 %v596_v22, %v597_v23  ;;  %v609_v39 = vmax.f32 %v607_v25, %v608_v27 }
 0x1b6   :  { %v464_v44 = vpop.f32.mrb[24].mxu0  ;;  %1782 = vmatprep.mubr.bf16.mxu0 %v4558_v43  ;;  %v650_v22 = vmax.bf16 %v4558_v43, %v4548_v31 }
 0x1b7   :  { %v466_v45 = vpop.f32.mrb[25].mxu0  ;;  %1783 = vmatmul.mubr.bf16.gmra.mrb[84].mxu0 %v4556_v42  ;;  %v465_v47 = vadd.f32 %v464_v44, %v4497_v26 }
 0x1b8   :  { %v468_v46 = vpop.f32.mrb[26].mxu0  ;;  %v467_v50 = vadd.f32 %v466_v45, %v4500_v29 }
 0x1b9   :  { %v469_v48 = vadd.f32 %v468_v46, %v4497_v26  ;;  %v470_v49 = vpop.f32.mrb[27].mxu0 }
 0x1ba   :  { %v471_v51 = vadd.f32 %v470_v49, %v4500_v29 }
 0x1bb   :  { %v4566_v52 = vpack.c.bf16 %v469_v48, %v465_v47  ;;  %v599_v47 = vrot.slane %v598_v38, 4  ;;  %v610_v48 = vrot.slane %v609_v39, 4 }
 0x1bc   :  { %v4568_v53 = vpack.c.bf16 %v471_v51, %v467_v50  ;;  %v617_v50 = vmax.bf16 %v4536_v15, %v4526_v5 }
 0x1be   :  { %v474_v54 = vpop.f32.mrb[28].mxu0  ;;  %1792 = vmatprep.mubr.bf16.mxu0 %v4568_v53 }
 0x1bf   :  { %v476_v57 = vpop.f32.mrb[29].mxu0  ;;  %1793 = vmatmul.mubr.bf16.gmra.mrb[88].mxu0 %v4566_v52  ;;  %v475_v59 = vadd.f32 %v474_v54, %v4497_v26 }
 0x1c0   :  { %v478_v58 = vpop.f32.mrb[30].mxu0  ;;  %v477_v62 = vadd.f32 %v476_v57, %v4500_v29 }
 0x1c1   :  { %v479_v60 = vadd.f32 %v478_v58, %v4497_v26  ;;  %v480_v61 = vpop.f32.mrb[31].mxu0 }
 0x1c2   :  { %v481_v63 = vadd.f32 %v480_v61, %v4500_v29  ;;  %v600_v61 = vmax.f32 %v598_v38, %v599_v47 }
 0x1c3   :  { %v4576_v1 = vpack.c.bf16 %v479_v60, %v475_v59 }
 0x1c4   :  { %v4578_v2 = vpack.c.bf16 %v481_v63, %v477_v62  ;;  %v611_v62 = vmax.f32 %v609_v39, %v610_v48  ;;  %v628_v63 = vmax.bf16 %v4538_v16, %v4528_v6  ;;  %v651_v48 = vunpack.i.l.bf16 %v650_v22 }
 0x1c6   :  { %v484_v3 = vpop.f32.mrb[32].mxu0  ;;  %1802 = vmatprep.mubr.bf16.mxu0 %v4578_v2  ;;  %v629_v13 = vunpack.i.l.bf16 %v628_v63  ;;  %v630_v14 = vunpack.i.h.bf16 %v628_v63 }
 0x1c7   :  { %v486_v4 = vpop.f32.mrb[33].mxu0  ;;  %1803 = vmatmul.mubr.bf16.gmra.mrb[92].mxu0 %v4576_v1  ;;  %v485_v8 = vadd.f32 %v484_v3, %v4497_v26 }
 0x1c8   :  { %v488_v7 = vpop.f32.mrb[34].mxu0  ;;  %v487_v0 = vadd.f32 %v486_v4, %v4500_v29  ;;  %v618_v4 = vunpack.i.l.bf16 %v617_v50 }
 0x1c9   :  { %v489_v9 = vadd.f32 %v488_v7, %v4497_v26  ;;  %v490_v10 = vpop.f32.mrb[35].mxu0  ;;  %v619_v7 = vunpack.i.h.bf16 %v617_v50 }
 0x1ca   :  { %v491_v11 = vadd.f32 %v490_v10, %v4500_v29 }
 0x1cb   :  { %v4586_v12 = vpack.c.bf16 %v489_v9, %v485_v8  ;;  %v639_v8 = vmax.bf16 %v4556_v42, %v4546_v30 }
 0x1cc   :  { %v4592_v17 = vpack.c.bf16 %v491_v11, %v487_v0  ;;  %v601_v0 = vrot.slane %v600_v61, 2  ;;  %v612_v11 = vrot.slane %v611_v62, 2 }
 0x1ce   :  { %v494_v19 = vpop.f32.mrb[36].mxu0  ;;  %1812 = vmatprep.mubr.bf16.mxu0 %v4592_v17  ;;  %v613_v38 = vmax.f32 %v611_v62, %v612_v11  ;;  %v672_v11 = vmax.bf16 %v4578_v2, %v4568_v53 }
 0x1cf   :  { %v496_v20 = vpop.f32.mrb[37].mxu0  ;;  %1813 = vmatmul.mubr.bf16.gmra.mrb[96].mxu0 %v4586_v12  ;;  %v495_v32 = vadd.f32 %v494_v19, %v4497_v26 }
 0x1d0   :  { %v498_v28 = vpop.f32.mrb[38].mxu0  ;;  %v497_v35 = vadd.f32 %v496_v20, %v4500_v29  ;;  %v620_v20 = vmax.f32 %v618_v4, %v619_v7 }
 0x1d1   :  { %v499_v33 = vadd.f32 %v498_v28, %v4497_v26  ;;  %v500_v34 = vpop.f32.mrb[39].mxu0  ;;  %v640_v28 = vunpack.i.l.bf16 %v639_v8 }
 0x1d2   :  { %v501_v36 = vadd.f32 %v500_v34, %v4500_v29 }
 0x1d3   :  { %v4600_v37 = vpack.c.bf16 %v499_v33, %v495_v32  ;;  %v641_v32 = vunpack.i.h.bf16 %v639_v8 }
 0x1d4   :  { %v4602_v44 = vpack.c.bf16 %v501_v36, %v497_v35  ;;  %v602_v36 = vmax.f32 %v600_v61, %v601_v0  ;;  %v661_v0 = vmax.bf16 %v4576_v1, %v4566_v52 }
 0x1d5   :  { %v642_v47 = vmax.f32 %v640_v28, %v641_v32 }
 0x1d6   :  { %v504_v45 = vpop.f32.mrb[40].mxu0  ;;  %1822 = vmatprep.mubr.bf16.mxu0 %v4602_v44 }
 0x1d7   :  { %v506_v46 = vpop.f32.mrb[41].mxu0  ;;  %1823 = vmatmul.mubr.bf16.gmra.mrb[100].mxu0 %v4600_v37  ;;  %v505_v51 = vadd.f32 %v504_v45, %v4497_v26  ;;  %v621_v45 = vrot.slane %v620_v20, 4  ;;  %v643_v7 = vrot.slane %v642_v47, 4 }
 0x1d8   :  { %v508_v49 = vpop.f32.mrb[42].mxu0  ;;  %v507_v58 = vadd.f32 %v506_v46, %v4500_v29  ;;  %v631_v46 = vmax.f32 %v629_v13, %v630_v14  ;;  %v683_v14 = vmax.bf16 %v4600_v37, %v4586_v12 }
 0x1d9   :  { %v509_v54 = vadd.f32 %v508_v49, %v4497_v26  ;;  %v510_v57 = vpop.f32.mrb[43].mxu0  ;;  %v652_v49 = vunpack.i.h.bf16 %v650_v22  ;;  %v4658_v32 = vmax.f32 %v642_v47, %v643_v7 }
 0x1da   :  { %v511_v59 = vadd.f32 %v510_v57, %v4500_v29  ;;  %v614_v57 = vrot.slane %v613_v38, 1  ;;  %v632_v63 = vrot.slane %v631_v46, 4 }
 0x1db   :  { %v4612_v60 = vpack.c.bf16 %v509_v54, %v505_v51  ;;  %v603_v54 = vrot.slane %v602_v36, 1  ;;  %v653_v8 = vmax.f32 %v651_v48, %v652_v49  ;;  %v662_v48 = vunpack.i.l.bf16 %v661_v0 }
 0x1dc   :  { %v4616_v3 = vpack.c.bf16 %v511_v59, %v507_v58  ;;  %v622_v59 = vmax.f32 %v620_v20, %v621_v45  ;;  %v673_v49 = vunpack.i.l.bf16 %v672_v11 }
 0x1dd   :  { %5477 = vst [vmem:[#allocation26_spill] sm:$0xff] %v4612_v60  ;;  %v4650_v22 = vmax.f32 %v602_v36, %v603_v54  ;;  %v663_v36 = vunpack.i.h.bf16 %v661_v0 }
 0x1de   :  { %5478 = vst [vmem:[#allocation27_spill] sm:$0xff] %v4616_v3  ;;  %v514_v9 = vpop.f32.mrb[44].mxu0  ;;  %1832 = vmatprep.mubr.bf16.mxu0 %v4616_v3  ;;  %v623_v28 = vrot.slane %v622_v59, 2 }
 0x1df   :  { %v516_v10 = vpop.f32.mrb[45].mxu0  ;;  %1833 = vmatmul.mubr.bf16.gmra.mrb[104].mxu0 %v4612_v60  ;;  %v515_v23 = vadd.f32 %v514_v9, %v4497_v26 }
 0x1e0   :  { %v518_v19 = vpop.f32.mrb[46].mxu0  ;;  %v517_v33 = vadd.f32 %v516_v10, %v4500_v29  ;;  %v4676_v24 = vmax.f32 %v622_v59, %v623_v28 }
 0x1e1   :  { %v519_v25 = vadd.f32 %v518_v19, %v4497_v26  ;;  %v520_v27 = vpop.f32.mrb[47].mxu0  ;;  %v694_v19 = vmax.bf16 %v4602_v44, %v4592_v17 }
 0x1e2   :  { %v521_v34 = vadd.f32 %v520_v27, %v4500_v29 }
 0x1e3   :  { %v4628_v35 = vpack.c.bf16 %v519_v25, %v515_v23  ;;  %v4652_v23 = vmax.f32 %v613_v38, %v614_v57  ;;  %v4654_v25 = vmax.f32 %v631_v46, %v632_v63  ;;  %v674_v38 = vunpack.i.h.bf16 %v672_v11 }
 0x1e4   :  { %v4630_v39 = vpack.c.bf16 %v521_v34, %v517_v33  ;;  %v654_v33 = vrot.slane %v653_v8, 4  ;;  %v684_v46 = vunpack.i.l.bf16 %v683_v14  ;;  %v695_v54 = vunpack.i.l.bf16 %v694_v19 }
 0x1e5   :  { %5479 = vst [vmem:[#allocation28_spill] sm:$0xff] %v4628_v35  ;;  %v705_v27 = vmax.bf16 %v4628_v35, %v4612_v60  ;;  %v696_v57 = vunpack.i.h.bf16 %v694_v19  ;;  %v605_v11 = vpack.i.bf16 %v4650_v22, %v4650_v22  ;;  %v675_v18 = vmax.f32 %v673_v49, %v674_v38 }
 0x1e6   :  { %5480 = vst [vmem:[#allocation29_spill] sm:$0xff] %v4630_v39  ;;  %v524_v50 = vpop.f32.mrb[48].mxu0  ;;  %1842 = vmatprep.mubr.bf16.mxu0 %v4630_v39  ;;  %v716_v34 = vmax.bf16 %v4630_v39, %v4616_v3  ;;  %v645_v22 = vrot.slane %v4658_v32, 2 }
 0x1e7   :  { %v526_v51 = vpop.f32.mrb[49].mxu0  ;;  %1843 = vmatmul.mubr.bf16.gmra.mrb[108].mxu0 %v4628_v35  ;;  %v525_v61 = vadd.f32 %v524_v50, %v4497_v26  ;;  %v707_v63 = vunpack.i.h.bf16 %v705_v27  ;;  %v697_v35 = vmax.f32 %v695_v54, %v696_v57 }
 0x1e8   :  { %v528_v58 = vpop.f32.mrb[50].mxu0  ;;  %v527_v9 = vadd.f32 %v526_v51, %v4500_v29  ;;  %v685_v51 = vunpack.i.h.bf16 %v683_v14  ;;  %v717_v7 = vunpack.i.l.bf16 %v716_v34  ;;  %v664_v14 = vmax.f32 %v662_v48, %v663_v36 }
 0x1e9   :  { %v529_v62 = vadd.f32 %v528_v58, %v4497_v26  ;;  %v530_v4 = vpop.f32.mrb[51].mxu0  ;;  %v706_v58 = vunpack.i.l.bf16 %v705_v27  ;;  %v616_v27 = vpack.i.bf16 %v4652_v23, %v4652_v23  ;;  %v655_v48 = vmax.f32 %v653_v8, %v654_v33 }
 0x1ea   :  { %v531_v10 = vadd.f32 %v530_v4, %v4500_v29  ;;  %v665_v38 = vrot.slane %v664_v14, 4  ;;  %v698_v57 = vrot.slane %v697_v35, 4 }
 0x1eb   :  { %v4642_v13 = vpack.c.bf16 %v529_v62, %v525_v61  ;;  %v4696_v3 = vunpack.c.l.b16 %v616_v27 }
 0x1ec   :  { %v4648_v20 = vpack.c.bf16 %v531_v10, %v527_v9  ;;  %v718_v9 = vunpack.i.h.bf16 %v716_v34  ;;  %v634_v34 = vrot.slane %v4654_v25, 2 }
 0x1ed   :  { %5481 = vst [vmem:[#allocation30_spill] sm:$0xff] %v4642_v13 }
 0x1ee   :  { %5482 = vst [vmem:[#allocation31_spill] sm:$0xff] %v4648_v20  ;;  %v534_v45 = vpop.f32.mrb[52].mxu0  ;;  %1852 = vmatprep.mubr.bf16.mxu0 %v4648_v20  ;;  %v719_v36 = vmax.f32 %v717_v7, %v718_v9 }
 0x1ef   :  { %v536_v50 = vpop.f32.mrb[53].mxu0  ;;  %1853 = vmatmul.mubr.bf16.gmra.mrb[112].mxu0 %v4642_v13  ;;  %v535_v61 = vadd.f32 %v534_v45, %v4497_v26  ;;  %v686_v45 = vmax.f32 %v684_v46, %v685_v51  ;;  %v676_v46 = vrot.slane %v675_v18, 4 }
 0x1f0   :  { %v538_v47 = vpop.f32.mrb[54].mxu0  ;;  %v537_v10 = vadd.f32 %v536_v50, %v4500_v29  ;;  %v708_v50 = vmax.f32 %v706_v58, %v707_v63 }
 0x1f1   :  { %v539_v62 = vadd.f32 %v538_v47, %v4497_v26  ;;  %v540_v4 = vpop.f32.mrb[55].mxu0  ;;  %v687_v54 = vrot.slane %v686_v45, 4 }
 0x1f2   :  { %v541_v0 = vadd.f32 %v540_v4, %v4500_v29  ;;  %v709_v8 = vrot.slane %v708_v50, 4 }
 0x1f3   :  { %v4670_v19 = vpack.c.bf16 %v539_v62, %v535_v61  ;;  %v688_v21 = vmax.f32 %v686_v45, %v687_v54 }
 0x1f4   :  { %v4674_v47 = vpack.c.bf16 %v541_v0, %v537_v10  ;;  %v720_v10 = vrot.slane %v719_v36, 4 }
 0x1f5   :  { %5483 = vst [vmem:[#allocation32_spill] sm:$0xff] %v4670_v19  ;;  %v727_v4 = vmax.bf16 %v4670_v19, %v4642_v13  ;;  %v656_v13 = vrot.slane %v655_v48, 2  ;;  %v689_v27 = vrot.slane %v688_v21, 2 }
 0x1f6   :  { %5484 = vst [vmem:[#allocation33_spill] sm:$0xff] %v4674_v47  ;;  %v738_v49 = vmax.bf16 %v4674_v47, %v4648_v20  ;;  %v544_v23 = vpop.f32.mrb[56].mxu0  ;;  %1862 = vmatprep.mubr.bf16.mxu0 %v4674_v47 }
 0x1f7   :  { %v728_v59 = vunpack.i.l.bf16 %v727_v4  ;;  %v729_v28 = vunpack.i.h.bf16 %v727_v4  ;;  %v546_v51 = vpop.f32.mrb[57].mxu0  ;;  %1863 = vmatmul.mubr.bf16.gmra.mrb[116].mxu0 %v4670_v19  ;;  %v545_v62 = vadd.f32 %v544_v23, %v4497_v26  ;;  %v666_v19 = vmax.f32 %v664_v14, %v665_v38 }
 0x1f8   :  { %v739_v58 = vunpack.i.l.bf16 %v738_v49  ;;  %v740_v63 = vunpack.i.h.bf16 %v738_v49  ;;  %v548_v61 = vpop.f32.mrb[58].mxu0  ;;  %v547_v47 = vadd.f32 %v546_v51, %v4500_v29  ;;  %v677_v49 = vmax.f32 %v675_v18, %v676_v46 }
 0x1f9   :  { %v730_v33 = vmax.f32 %v728_v59, %v729_v28  ;;  %v549_v7 = vadd.f32 %v548_v61, %v4497_v26  ;;  %v550_v9 = vpop.f32.mrb[59].mxu0  ;;  %v699_v23 = vmax.f32 %v697_v35, %v698_v57  ;;  %v710_v28 = vmax.f32 %v708_v50, %v709_v8 }
 0x1fa   :  { %v741_v0 = vmax.f32 %v739_v58, %v740_v63  ;;  %v551_v4 = vadd.f32 %v550_v9, %v4500_v29  ;;  %v4694_v61 = vunpack.c.l.b16 %v605_v11  ;;  %v721_v58 = vmax.f32 %v719_v36, %v720_v10 }
 0x1fb   :  { %v731_v20 = vrot.slane %v730_v33, 4  ;;  %v4690_v39 = vpack.c.bf16 %v549_v7, %v545_v62  ;;  %v625_v14 = vrot.slane %v4676_v24, 1  ;;  %v635_v38 = vmax.f32 %v4654_v25, %v634_v34 }
 0x1fc   :  { %v742_v60 = vrot.slane %v741_v0, 4  ;;  %v4692_v59 = vpack.c.bf16 %v551_v4, %v547_v47  ;;  %v667_v18 = vrot.slane %v666_v19, 2  ;;  %v646_v35 = vmax.f32 %v4658_v32, %v645_v22 }
 0x1fd   :  { %v732_v51 = vmax.f32 %v730_v33, %v731_v20  ;;  %v657_v11 = vmax.f32 %v655_v48, %v656_v13  ;;  %v678_v47 = vrot.slane %v677_v49, 2  ;;  %v700_v36 = vrot.slane %v699_v23, 2 }
 0x1fe   :  { %v554_v63 = vpop.f32.mrb[60].mxu0  ;;  %1872 = vmatprep.mubr.bf16.mxu0 %v4692_v59  ;;  %v743_v45 = vmax.f32 %v741_v0, %v742_v60  ;;  %v711_v20 = vrot.slane %v710_v28, 2  ;;  %v722_v33 = vrot.slane %v721_v58, 2  ;;  %v636_v62 = vrot.slane %v635_v38, 1 }
 0x1ff   :  { %v556_v46 = vpop.f32.mrb[61].mxu0  ;;  %1873 = vmatmul.mubr.bf16.gmra.mrb[120].mxu0 %v4690_v39  ;;  %v555_v54 = vadd.f32 %v554_v63, %v4497_v26  ;;  %v733_v25 = vrot.slane %v732_v51, 2  ;;  %v668_v7 = vmax.f32 %v666_v19, %v667_v18  ;;  %v626_v22 = vmax.f32 %v4676_v24, %v625_v14 }
 0x200   :  { %v558_v50 = vpop.f32.mrb[62].mxu0  ;;  %v557_v60 = vadd.f32 %v556_v46, %v4500_v29  ;;  %v744_v13 = vrot.slane %v743_v45, 2  ;;  %v679_v48 = vmax.f32 %v677_v49, %v678_v47  ;;  %v690_v9 = vmax.f32 %v688_v21, %v689_v27 }
 0x201   :  { %v559_v57 = vadd.f32 %v558_v50, %v4497_v26  ;;  %v560_v8 = vpop.f32.mrb[63].mxu0  ;;  %v647_v0 = vrot.slane %v646_v35, 1  ;;  %v701_v26 = vmax.f32 %v699_v23, %v700_v36  ;;  %v712_v4 = vmax.f32 %v710_v28, %v711_v20 }
 0x202   :  { %v561_v34 = vadd.f32 %v560_v8, %v4500_v29  ;;  %v658_v46 = vrot.slane %v657_v11, 1  ;;  %v723_v19 = vmax.f32 %v721_v58, %v722_v33  ;;  %v734_v18 = vmax.f32 %v732_v51, %v733_v25 }
 0x203   :  { %v4707_v32 = vpack.c.bf16 %v559_v57, %v555_v54  ;;  %v669_v50 = vrot.slane %v668_v7, 1  ;;  %v745_v21 = vmax.f32 %v743_v45, %v744_v13  ;;  %v680_v14 = vrot.slane %v679_v48, 1 }
 0x204   :  { %v4710_v10 = vpack.c.bf16 %v561_v34, %v557_v60  ;;  %v691_v23 = vrot.slane %v690_v9, 1  ;;  %v637_v27 = vmax.f32 %v635_v38, %v636_v62  ;;  %v702_v20 = vrot.slane %v701_v26, 1 }
 0x205   :  { %5485 = vst [vmem:[#allocation34_spill] sm:$0xff] %v4707_v32  ;;  %v749_v63 = vmax.bf16 %v4707_v32, %v4690_v39  ;;  %v713_v54 = vrot.slane %v712_v4, 1  ;;  %v648_v57 = vmax.f32 %v646_v35, %v647_v0  ;;  %v724_v60 = vrot.slane %v723_v19, 1 }
 0x206   :  { %v760_v29 = vmax.bf16 %v4710_v10, %v4692_v59  ;;  %1882 = vmatprep.mubr.bf16.mxu0 %v4710_v10  ;;  %v735_v58 = vrot.slane %v734_v18, 1  ;;  %v659_v51 = vmax.f32 %v657_v11, %v658_v46  ;;  %v670_v33 = vmax.f32 %v668_v7, %v669_v50 }
 0x207   :  { %v750_v24 = vunpack.i.l.bf16 %v749_v63  ;;  %v751_v49 = vunpack.i.h.bf16 %v749_v63  ;;  %1883 = vmatmul.mubr.bf16.gmra.mrb[124].mxu0 %v4707_v32  ;;  %v746_v34 = vrot.slane %v745_v21, 1  ;;  %v627_v63 = vpack.i.bf16 %v626_v22, %v626_v22 }
 0x208   :  { %v761_v28 = vunpack.i.l.bf16 %v760_v29  ;;  %v762_v47 = vunpack.i.h.bf16 %v760_v29  ;;  %v681_v13 = vmax.f32 %v679_v48, %v680_v14  ;;  %v692_v32 = vmax.f32 %v690_v9, %v691_v23 }
 0x209   :  { %v752_v36 = vmax.f32 %v750_v24, %v751_v49  ;;  %v638_v29 = vpack.i.bf16 %v637_v27, %v637_v27  ;;  %v703_v62 = vmax.f32 %v701_v26, %v702_v20  ;;  %v714_v24 = vmax.f32 %v712_v4, %v713_v54 }
 0x20a   :  { %v763_v8 = vmax.f32 %v761_v28, %v762_v47  ;;  %v649_v49 = vpack.i.bf16 %v648_v57, %v648_v57  ;;  %v725_v35 = vmax.f32 %v723_v19, %v724_v60  ;;  %v736_v28 = vmax.f32 %v734_v18, %v735_v58 }
 0x20b   :  { %v753_v25 = vrot.slane %v752_v36, 4  ;;  %v660_v11 = vpack.i.bf16 %v659_v51, %v659_v51  ;;  %v671_v7 = vpack.i.bf16 %v670_v33, %v670_v33  ;;  %v747_v46 = vmax.f32 %v745_v21, %v746_v34 }
 0x20c   :  { %v764_v45 = vrot.slane %v763_v8, 4  ;;  %v875_v22 = vunpack.c.l.b16 %v627_v63  ;;  %v682_v47 = vpack.i.bf16 %v681_v13, %v681_v13  ;;  %v693_v14 = vpack.i.bf16 %v692_v32, %v692_v32 }
 0x20d   :  { %v754_v38 = vmax.f32 %v752_v36, %v753_v25  ;;  %v876_v9 = vunpack.c.l.b16 %v638_v29  ;;  %v704_v23 = vpack.i.bf16 %v703_v62, %v703_v62  ;;  %v715_v27 = vpack.i.bf16 %v714_v24, %v714_v24 }
 0x20e   :  { %v765_v0 = vmax.f32 %v763_v8, %v764_v45  ;;  %v877_v36 = vunpack.c.l.b16 %v649_v49  ;;  %v726_v4 = vpack.i.bf16 %v725_v35, %v725_v35  ;;  %v737_v19 = vpack.i.bf16 %v736_v28, %v736_v28 }
 0x20f   :  { %v755_v50 = vrot.slane %v754_v38, 2  ;;  %v748_v54 = vpack.i.bf16 %v747_v46, %v747_v46  ;;  %v878_v57 = vunpack.c.l.b16 %v660_v11  ;;  %v879_v8 = vunpack.c.l.b16 %v671_v7 }
 0x210   :  { %v766_v48 = vrot.slane %v765_v0, 2  ;;  %v880_v21 = vunpack.c.l.b16 %v682_v47  ;;  %v881_v58 = vunpack.c.l.b16 %v693_v14  ;;  %v890_v51 = vsel %vm889_vm0, %v875_v22, %v4694_v61 }
 0x211   :  { %v756_v26 = vmax.f32 %v754_v38, %v755_v50  ;;  %v882_v33 = vunpack.c.l.b16 %v704_v23  ;;  %v903_v32 = vsel %vm889_vm0, %v876_v9, %v4696_v3  ;;  %v883_v34 = vunpack.c.l.b16 %v715_v27  ;;  %v3950_v9 = vld [vmem:[#allocation8 + $0x8] ss:$16 sps:$4 sm:$0xff]   ;;  %v3955_v27 = vld [vmem:[#allocation8 + $0x2c] ss:$16 sps:$4 sm:$0xff]  }
 0x212   :  { %v767_v20 = vmax.f32 %v765_v0, %v766_v48  ;;  %v884_v45 = vunpack.c.l.b16 %v726_v4  ;;  %v885_v13 = vunpack.c.l.b16 %v737_v19  ;;  %v892_v29 = vsel %vm891_vm1, %v877_v36, %v890_v51  ;;  %v3958_v36 = vld [vmem:[#allocation8 + $0x4c] ss:$16 sps:$4 sm:$0xff]   ;;  %v3956_v4 = vld [vmem:[#allocation8 + $0x48] ss:$16 sps:$4 sm:$0xff]  }
 0x213   :  { %v757_v18 = vrot.slane %v756_v26, 1  ;;  %v886_v38 = vunpack.c.l.b16 %v748_v54  ;;  %v904_v62 = vsel %vm891_vm1, %v878_v57, %v903_v32  ;;  %v894_v49 = vsel %vm893_vm2, %v879_v8, %v892_v29  ;;  %v3959_v19 = vld [vmem:[#allocation8 + $0x68] ss:$16 sps:$4 sm:$0xff]   ;;  %v3964_v54 = vld [vmem:[#allocation8 + $0x8c] ss:$16 sps:$4 sm:$0xff]  }
 0x214   :  { %v768_v60 = vrot.slane %v767_v20, 1  ;;  %v905_v61 = vsel %vm893_vm2, %v880_v21, %v904_v62  ;;  %v896_v0 = vsel %vm895_vm3, %v881_v58, %v894_v49  ;;  %v3962_v57 = vld [vmem:[#allocation8 + $0x88] ss:$16 sps:$4 sm:$0xff]   ;;  %v3973_v58 = vld [vmem:[#allocation8 + $0xec] ss:$16 sps:$4 sm:$0xff]  }
 0x215   :  { %v758_v25 = vmax.f32 %v756_v26, %v757_v18  ;;  %v906_v3 = vsel %vm895_vm3, %v882_v33, %v905_v61  ;;  %v898_v11 = vsel %vm897_vm4, %v883_v34, %v896_v0  ;;  %v3953_v26 = vld [vmem:[#allocation8 + $0x28] ss:$16 sps:$4 sm:$0xff]   ;;  %v3967_v18 = vld [vmem:[#allocation8 + $0xac] ss:$16 sps:$4 sm:$0xff]  }
 0x216   :  { %v769_v63 = vmax.f32 %v767_v20, %v768_v60  ;;  %v907_v46 = vsel %vm897_vm4, %v884_v45, %v906_v3  ;;  %v900_v50 = vsel %vm899_vm5, %v885_v13, %v898_v11  ;;  %v3961_v20 = vld [vmem:[#allocation8 + $0x6c] ss:$16 sps:$4 sm:$0xff]   ;;  %v3965_v8 = vld [vmem:[#allocation8 + $0xa8] ss:$16 sps:$4 sm:$0xff]  }
 0x217   :  { %v759_v24 = vpack.i.bf16 %v758_v25, %v758_v25  ;;  %v908_v22 = vsel %vm899_vm5, %v886_v38, %v907_v46  ;;  %v3970_v60 = vld [vmem:[#allocation8 + $0xcc] ss:$16 sps:$4 sm:$0xff]   ;;  %v3968_v21 = vld [vmem:[#allocation8 + $0xc8] ss:$16 sps:$4 sm:$0xff]  }
 0x218   :  { %v770_v35 = vpack.i.bf16 %v769_v63, %v769_v63  ;;  %v3971_v51 = vld [vmem:[#allocation8 + $0xe8] ss:$16 sps:$4 sm:$0xff]   ;;  %v3976_v33 = vld [vmem:[#allocation8 + $0x10c] ss:$16 sps:$4 sm:$0xff]  }
 0x219   :  { %v887_v28 = vunpack.c.l.b16 %v759_v24  ;;  %v3974_v32 = vld [vmem:[#allocation8 + $0x108] ss:$16 sps:$4 sm:$0xff]   ;;  %v3979_v25 = vld [vmem:[#allocation8 + $0x12c] ss:$16 sps:$4 sm:$0xff]  }
 0x21a   :  { %v888_v7 = vunpack.c.l.b16 %v770_v35  ;;  %v3977_v34 = vld [vmem:[#allocation8 + $0x128] ss:$16 sps:$4 sm:$0xff]   ;;  %v3982_v63 = vld [vmem:[#allocation8 + $0x14c] ss:$16 sps:$4 sm:$0xff]  }
 0x21b   :  { %v902_v47 = vsel %vm901_vm6, %v887_v28, %v900_v50  ;;  %v3980_v45 = vld [vmem:[#allocation8 + $0x148] ss:$16 sps:$4 sm:$0xff]   ;;  %v3985_v13 = vld [vmem:[#allocation8 + $0x16c] ss:$16 sps:$4 sm:$0xff]  }
 0x21c   :  { %v909_v48 = vsel %vm901_vm6, %v888_v7, %v908_v22  ;;  %v4734_v23 = vpack.c.b16 %v902_v47, %v902_v47  ;;  %v3983_v29 = vld [vmem:[#allocation8 + $0x168] ss:$16 sps:$4 sm:$0xff]   ;;  %v3988_v38 = vld [vmem:[#allocation8 + $0x18c] ss:$16 sps:$4 sm:$0xff]  }
 0x21d   :  { %v911_v14 = vpack.c.b16 %v909_v48, %v909_v48  ;;  %v3986_v62 = vld [vmem:[#allocation8 + $0x188] ss:$16 sps:$4 sm:$0xff]   ;;  %v3991_v24 = vld [vmem:[#allocation8 + $0x1ac] ss:$16 sps:$4 sm:$0xff]  }
 0x21e   :  { %v3989_v49 = vld [vmem:[#allocation8 + $0x1a8] ss:$16 sps:$4 sm:$0xff]   ;;  %v3994_v35 = vld [vmem:[#allocation8 + $0x1cc] ss:$16 sps:$4 sm:$0xff]  }
 0x21f   :  { %1266 = vmatprep.mubr.bf16.mxu1 %v911_v14  ;;  %v3992_v61 = vld [vmem:[#allocation8 + $0x1c8] ss:$16 sps:$4 sm:$0xff]   ;;  %v3997_v0 = vld [vmem:[#allocation8 + $0x1ec] ss:$16 sps:$4 sm:$0xff]  }
 0x220   :  { %1267 = vmatmul.mubr.bf16.vlgmr.msra.gmra.mrb[0].mxu1 %v4734_v23  ;;  %v3995_v3 = vld [vmem:[#allocation8 + $0x1e8] ss:$16 sps:$4 sm:$0xff]   ;;  %v4000_v28 = vld [vmem:[#allocation10 + $0xc] ss:$16 sps:$4 sm:$0xff]  }
 0x221   :  { %1276 = vmatpush1.bf16.msra.mxu1 %v3950_v9  ;;  %1307 = vmatprep.mubr.bf16.mxu1 %v911_v14  ;;  %v3998_v11 = vld [vmem:[#allocation10 + $0x8] ss:$16 sps:$4 sm:$0xff]   ;;  %v4003_v7 = vld [vmem:[#allocation10 + $0x2c] ss:$16 sps:$4 sm:$0xff]  }
 0x222   :  { %1277 = vmatprep.subr.bf16.mxu1 %v3955_v27  ;;  %v4001_v46 = vld [vmem:[#allocation10 + $0x28] ss:$16 sps:$4 sm:$0xff]   ;;  %v4006_v47 = vld [vmem:[#allocation10 + $0x4c] ss:$16 sps:$4 sm:$0xff]  }
 0x223   :  { %v4046_v50 = vld [vmem:[#allocation13 + $0x40] sm:$0xff]  }
 0x224   :  { %3557 = vmatprep.subr.bf16.mxu0 %v4046_v50  ;;  %v4004_v27 = vld [vmem:[#allocation10 + $0x48] ss:$16 sps:$4 sm:$0xff]  }
 0x225   :  { %1278 = vmatpush1.bf16.msra.mxu1 %v3953_v26  ;;  %v4047_v26 = vld [vmem:[#allocation13] sm:$0xff]  }
 0x226   :  { %1279 = vmatprep.subr.bf16.mxu1 %v3958_v36  ;;  %3558 = vmatpush3.bf16.msra.mxu0 %v4047_v26  ;;  %v4028_v50 = vld [vmem:[#allocation10 + $0x148] ss:$16 sps:$4 sm:$0xff]  }
 0x229   :  { %1280 = vmatpush1.bf16.msra.mxu1 %v3956_v4  ;;  %v4012_v4 = vld [vmem:[#allocation10 + $0x8c] ss:$16 sps:$4 sm:$0xff]  }
 0x22a   :  { %1281 = vmatprep.subr.bf16.mxu1 %v3961_v20 }
 0x22d   :  { %1282 = vmatpush1.bf16.msra.mxu1 %v3959_v19 }
 0x22e   :  { %1283 = vmatprep.subr.bf16.mxu1 %v3964_v54 }
 0x231   :  { %1284 = vmatpush1.bf16.msra.mxu1 %v3962_v57  ;;  %v4010_v57 = vld [vmem:[#allocation10 + $0x88] ss:$16 sps:$4 sm:$0xff]  }
 0x232   :  { %1285 = vmatprep.subr.bf16.mxu1 %v3967_v18  ;;  %v4015_v18 = vld [vmem:[#allocation10 + $0xac] ss:$16 sps:$4 sm:$0xff]  }
 0x235   :  { %1286 = vmatpush1.bf16.msra.mxu1 %v3965_v8  ;;  %v4013_v8 = vld [vmem:[#allocation10 + $0xa8] ss:$16 sps:$4 sm:$0xff]  }
 0x236   :  { %1287 = vmatprep.subr.bf16.mxu1 %v3970_v60 }
 0x239   :  { %1288 = vmatpush1.bf16.msra.mxu1 %v3968_v21  ;;  %v4018_v21 = vld [vmem:[#allocation10 + $0xcc] ss:$16 sps:$4 sm:$0xff]  }
 0x23a   :  { %1289 = vmatprep.subr.bf16.mxu1 %v3973_v58 }
 0x23d   :  { %1290 = vmatpush1.bf16.msra.mxu1 %v3971_v51 }
 0x23e   :  { %1291 = vmatprep.subr.bf16.mxu1 %v3976_v33 }
 0x241   :  { %1292 = vmatpush1.bf16.msra.mxu1 %v3974_v32  ;;  %v4016_v32 = vld [vmem:[#allocation10 + $0xc8] ss:$16 sps:$4 sm:$0xff]  }
 0x242   :  { %1293 = vmatprep.subr.bf16.mxu1 %v3979_v25  ;;  %v4021_v25 = vld [vmem:[#allocation10 + $0xec] ss:$16 sps:$4 sm:$0xff]  }
 0x245   :  { %1294 = vmatpush1.bf16.msra.mxu1 %v3977_v34  ;;  %v4019_v34 = vld [vmem:[#allocation10 + $0xe8] ss:$16 sps:$4 sm:$0xff]  }
 0x246   :  { %1295 = vmatprep.subr.bf16.mxu1 %v3982_v63  ;;  %v4048_v63 = vld [vmem:[#allocation13 + $0x48] sm:$0xff]  }
 0x247   :  { %3559 = vmatprep.subr.bf16.mxu0 %v4048_v63  ;;  %v4042_v63 = vld [vmem:[#allocation10 + $0x1cc] ss:$16 sps:$4 sm:$0xff]  }
 0x249   :  { %1296 = vmatpush1.bf16.msra.mxu1 %v3980_v45  ;;  %v4049_v45 = vld [vmem:[#allocation13 + $0x8] sm:$0xff]  }
 0x24a   :  { %1297 = vmatprep.subr.bf16.mxu1 %v3985_v13  ;;  %3560 = vmatpush3.bf16.msra.mxu0 %v4049_v45 }
 0x24d   :  { %1298 = vmatpush1.bf16.msra.mxu1 %v3983_v29  ;;  %v4024_v29 = vld [vmem:[#allocation10 + $0x10c] ss:$16 sps:$4 sm:$0xff]  }
 0x24e   :  { %1299 = vmatprep.subr.bf16.mxu1 %v3988_v38 }
 0x251   :  { %1300 = vmatpush1.bf16.msra.mxu1 %v3986_v62 }
 0x252   :  { %1301 = vmatprep.subr.bf16.mxu1 %v3991_v24 }
 0x255   :  { %1302 = vmatpush1.bf16.msra.mxu1 %v3989_v49  ;;  %v4022_v49 = vld [vmem:[#allocation10 + $0x108] ss:$16 sps:$4 sm:$0xff]  }
 0x256   :  { %1303 = vmatprep.subr.bf16.mxu1 %v3994_v35  ;;  %v4027_v35 = vld [vmem:[#allocation10 + $0x12c] ss:$16 sps:$4 sm:$0xff]  }
 0x259   :  { %1304 = vmatpush1.bf16.msra.mxu1 %v3992_v61  ;;  %v4025_v61 = vld [vmem:[#allocation10 + $0x128] ss:$16 sps:$4 sm:$0xff]  }
 0x25a   :  { %1305 = vmatprep.subr.bf16.mxu1 %v3997_v0  ;;  %v4050_v0 = vld [vmem:[#allocation13 + $0x50] sm:$0xff]  }
 0x25b   :  { %3561 = vmatprep.subr.bf16.mxu0 %v4050_v0  ;;  %v4055_v0 = vld [vmem:[#allocation13 + $0x18] sm:$0xff]  }
 0x25d   :  { %1306 = vmatpush1.bf16.msra.mxu1 %v3995_v3 }
 0x25e   :  { %1893 = vmatprep.subr.bf16.mxu1 %v4000_v28  ;;  %v4030_v28 = vld [vmem:[#allocation10 + $0x14c] ss:$16 sps:$4 sm:$0xff]  }
 0x260   :  { %1308 = vmatmul.mubr.bf16.vlgmr.msra.gmra.mrb[4].mxu1 %v4734_v23  ;;  %v4009_v23 = vld [vmem:[#allocation10 + $0x6c] ss:$16 sps:$4 sm:$0xff]  }
 0x261   :  { %1894 = vmatpush1.bf16.msra.mxu1 %v3998_v11  ;;  %1925 = vmatprep.mubr.bf16.mxu1 %v4508_v41  ;;  %v4007_v41 = vld [vmem:[#allocation10 + $0x68] ss:$16 sps:$4 sm:$0xff]  }
 0x262   :  { %v4739_v22 = vpop.f32.mrb[64].mxu0  ;;  %1895 = vmatprep.subr.bf16.mxu1 %v4003_v7 }
 0x263   :  { %v4741_v48 = vpop.f32.mrb[65].mxu0 }
 0x264   :  { %v4743_v14 = vpop.f32.mrb[66].mxu0 }
 0x265   :  { %1896 = vmatpush1.bf16.msra.mxu1 %v4001_v46  ;;  %v4745_v9 = vpop.f32.mrb[67].mxu0 }
 0x266   :  { %1897 = vmatprep.subr.bf16.mxu1 %v4006_v47  ;;  %v4033_v47 = vld [vmem:[#allocation10 + $0x16c] ss:$16 sps:$4 sm:$0xff]  }
 0x269   :  { %1898 = vmatpush1.bf16.msra.mxu1 %v4004_v27  ;;  %v4051_v27 = vld [vmem:[#allocation13 + $0x10] sm:$0xff]  }
 0x26a   :  { %v4747_v36 = vpop.f32.mrb[68].mxu0  ;;  %1899 = vmatprep.subr.bf16.mxu1 %v4009_v23  ;;  %v4031_v23 = vld [vmem:[#allocation10 + $0x168] ss:$16 sps:$4 sm:$0xff]   ;;  %3562 = vmatpush3.bf16.msra.mxu0 %v4051_v27 }
 0x26b   :  { %v4749_v20 = vpop.f32.mrb[69].mxu0  ;;  %v4797_v27 = vld [vmem:[#allocation13 + $0xc0] sm:$0xff]  }
 0x26c   :  { %v4751_v19 = vpop.f32.mrb[70].mxu0 }
 0x26d   :  { %1900 = vmatpush1.bf16.msra.mxu1 %v4007_v41  ;;  %v4753_v54 = vpop.f32.mrb[71].mxu0  ;;  %v4036_v41 = vld [vmem:[#allocation10 + $0x18c] ss:$16 sps:$4 sm:$0xff]  }
 0x26e   :  { %1901 = vmatprep.subr.bf16.mxu1 %v4012_v4 }
 0x271   :  { %1902 = vmatpush1.bf16.msra.mxu1 %v4010_v57 }
 0x272   :  { %v4755_v60 = vpop.f32.mrb[72].mxu0  ;;  %1903 = vmatprep.subr.bf16.mxu1 %v4015_v18 }
 0x273   :  { %v4757_v58 = vpop.f32.mrb[73].mxu0 }
 0x274   :  { %v4759_v51 = vpop.f32.mrb[74].mxu0 }
 0x275   :  { %1904 = vmatpush1.bf16.msra.mxu1 %v4013_v8  ;;  %v4761_v33 = vpop.f32.mrb[75].mxu0  ;;  %v4034_v8 = vld [vmem:[#allocation10 + $0x188] ss:$16 sps:$4 sm:$0xff]  }
 0x276   :  { %1905 = vmatprep.subr.bf16.mxu1 %v4018_v21  ;;  %v4039_v21 = vld [vmem:[#allocation10 + $0x1ac] ss:$16 sps:$4 sm:$0xff]  }
 0x279   :  { %1906 = vmatpush1.bf16.msra.mxu1 %v4016_v32  ;;  %v4037_v32 = vld [vmem:[#allocation10 + $0x1a8] ss:$16 sps:$4 sm:$0xff]  }
 0x27a   :  { %v4763_v13 = vpop.f32.mrb[76].mxu0  ;;  %1907 = vmatprep.subr.bf16.mxu1 %v4021_v25  ;;  %v4054_v25 = vld [vmem:[#allocation13 + $0x58] sm:$0xff]  }
 0x27b   :  { %v4765_v38 = vpop.f32.mrb[77].mxu0  ;;  %3563 = vmatprep.subr.bf16.mxu0 %v4054_v25  ;;  %v4808_v25 = vld [vmem:[#allocation13 + $0xc8] sm:$0xff]  }
 0x27c   :  { %v4767_v62 = vpop.f32.mrb[78].mxu0  ;;  %3564 = vmatpush3.bf16.msra.mxu0 %v4055_v0 }
 0x27d   :  { %1908 = vmatpush1.bf16.msra.mxu1 %v4019_v34  ;;  %v4769_v24 = vpop.f32.mrb[79].mxu0 }
 0x27e   :  { %1909 = vmatprep.subr.bf16.mxu1 %v4024_v29 }
 0x281   :  { %1910 = vmatpush1.bf16.msra.mxu1 %v4022_v49 }
 0x282   :  { %v4771_v3 = vpop.f32.mrb[80].mxu0  ;;  %1911 = vmatprep.subr.bf16.mxu1 %v4027_v35  ;;  %v4040_v35 = vld [vmem:[#allocation10 + $0x1c8] ss:$16 sps:$4 sm:$0xff]  }
 0x283   :  { %v4773_v11 = vpop.f32.mrb[81].mxu0 }
 0x284   :  { %v4775_v7 = vpop.f32.mrb[82].mxu0 }
 0x285   :  { %1912 = vmatpush1.bf16.msra.mxu1 %v4025_v61  ;;  %v4777_v46 = vpop.f32.mrb[83].mxu0  ;;  %v4045_v61 = vld [vmem:[#allocation10 + $0x1ec] ss:$16 sps:$4 sm:$0xff]  }
 0x286   :  { %1913 = vmatprep.subr.bf16.mxu1 %v4030_v28  ;;  %v4043_v28 = vld [vmem:[#allocation10 + $0x1e8] ss:$16 sps:$4 sm:$0xff]  }
 0x289   :  { %1914 = vmatpush1.bf16.msra.mxu1 %v4028_v50  ;;  %v4058_v50 = vld [vmem:[#allocation13 + $0x60] sm:$0xff]  }
 0x28a   :  { %v4779_v26 = vpop.f32.mrb[84].mxu0  ;;  %1915 = vmatprep.subr.bf16.mxu1 %v4033_v47  ;;  %3565 = vmatprep.subr.bf16.mxu0 %v4058_v50 }
 0x28b   :  { %v4781_v4 = vpop.f32.mrb[85].mxu0 }
 0x28c   :  { %v4783_v57 = vpop.f32.mrb[86].mxu0 }
 0x28d   :  { %1916 = vmatpush1.bf16.msra.mxu1 %v4031_v23  ;;  %v4785_v18 = vpop.f32.mrb[87].mxu0  ;;  %v4059_v23 = vld [vmem:[#allocation13 + $0x20] sm:$0xff]  }
 0x28e   :  { %1917 = vmatprep.subr.bf16.mxu1 %v4036_v41  ;;  %3566 = vmatpush3.bf16.msra.mxu0 %v4059_v23 }
 0x291   :  { %1918 = vmatpush1.bf16.msra.mxu1 %v4034_v8 }
 0x292   :  { %v4787_v34 = vpop.f32.mrb[88].mxu0  ;;  %1919 = vmatprep.subr.bf16.mxu1 %v4039_v21 }
 0x293   :  { %v4789_v45 = vpop.f32.mrb[89].mxu0 }
 0x294   :  { %v4791_v29 = vpop.f32.mrb[90].mxu0 }
 0x295   :  { %1920 = vmatpush1.bf16.msra.mxu1 %v4037_v32  ;;  %v4793_v49 = vpop.f32.mrb[91].mxu0  ;;  %v4805_v32 = vld [vmem:[#allocation13 + $0x80] sm:$0xff]  }
 0x296   :  { %1921 = vmatprep.subr.bf16.mxu1 %v4042_v63  ;;  %v4813_v63 = vld [vmem:[#allocation13 + $0x88] sm:$0xff]  }
 0x299   :  { %1922 = vmatpush1.bf16.msra.mxu1 %v4040_v35 }
 0x29a   :  { %v4795_v47 = vpop.f32.mrb[92].mxu0  ;;  %1923 = vmatprep.subr.bf16.mxu1 %v4045_v61  ;;  %v4818_v61 = vld [vmem:[#allocation13 + $0xd0] sm:$0xff]  }
 0x29b   :  { %v4799_v41 = vpop.f32.mrb[93].mxu0 }
 0x29c   :  { %v4801_v8 = vpop.f32.mrb[94].mxu0 }
 0x29d   :  { %1924 = vmatpush1.bf16.msra.mxu1 %v4043_v28  ;;  %v4803_v21 = vpop.f32.mrb[95].mxu0 }
 0x29e   :  { %3781 = vmatprep.subr.bf16.mxu1 %v4797_v27 }
 0x2a0   :  { %1926 = vmatmul.mubr.bf16.vlgmr.msra.gmra.mrb[8].mxu1 %v4506_v40  ;;  %v4827_v40 = vld [vmem:[#allocation13 + $0x90] sm:$0xff]  }
 0x2a1   :  { %1935 = vmatprep.mubr.bf16.mxu1 %v4518_v56  ;;  %3789 = vmatpush3.bf16.msra.mxu1 %v4805_v32 }
 0x2a2   :  { %v4815_v35 = vpop.f32.mrb[96].mxu0  ;;  %3782 = vmatprep.subr.bf16.mxu1 %v4808_v25 }
 0x2a3   :  { %5486 = vst [vmem:[#allocation35_spill] sm:$0xff] %v4815_v35  ;;  %v4820_v0 = vpop.f32.mrb[97].mxu0 }
 0x2a4   :  { %5487 = vst [vmem:[#allocation36_spill] sm:$0xff] %v4820_v0  ;;  %v4822_v28 = vpop.f32.mrb[98].mxu0 }
 0x2a5   :  { %5488 = vst [vmem:[#allocation37_spill] sm:$0xff] %v4822_v28  ;;  %v4824_v50 = vpop.f32.mrb[99].mxu0  ;;  %3790 = vmatpush3.bf16.msra.mxu1 %v4813_v63 }
 0x2a6   :  { %5489 = vst [vmem:[#allocation38_spill] sm:$0xff] %v4824_v50  ;;  %3783 = vmatprep.subr.bf16.mxu1 %v4818_v61 }
 0x2a8   :  { %1936 = vmatmul.mubr.bf16.gmra.mrb[12].mxu1 %v4516_v55 }
 0x2a9   :  { %1945 = vmatprep.mubr.bf16.mxu1 %v4528_v6  ;;  %3791 = vmatpush3.bf16.msra.mxu1 %v4827_v40 }
 0x2aa   :  { %v4833_v56 = vpop.f32.mrb[100].mxu0 }
 0x2ab   :  { %5490 = vst [vmem:[#allocation39_spill] sm:$0xff] %v4833_v56  ;;  %v4835_v23 = vpop.f32.mrb[101].mxu0 }
 0x2ac   :  { %5491 = vst [vmem:[#allocation40_spill] sm:$0xff] %v4835_v23  ;;  %v4837_v35 = vpop.f32.mrb[102].mxu0 }
 0x2ad   :  { %5492 = vst [vmem:[#allocation41_spill] sm:$0xff] %v4837_v35  ;;  %v4839_v28 = vpop.f32.mrb[103].mxu0 }
 0x2ae   :  { %5493 = vst [vmem:[#allocation42_spill] sm:$0xff] %v4839_v28  ;;  %v4062_v28 = vld [vmem:[#allocation13 + $0x68] sm:$0xff]  }
 0x2af   :  { %3567 = vmatprep.subr.bf16.mxu0 %v4062_v28 }
 0x2b0   :  { %1946 = vmatmul.mubr.bf16.gmra.mrb[16].mxu1 %v4526_v5 }
 0x2b1   :  { %1955 = vmatprep.mubr.bf16.mxu1 %v4538_v16  ;;  %v4063_v16 = vld [vmem:[#allocation13 + $0x28] sm:$0xff]  }
 0x2b2   :  { %v4843_v50 = vpop.f32.mrb[104].mxu0  ;;  %3568 = vmatpush3.bf16.msra.mxu0 %v4063_v16 }
 0x2b3   :  { %5494 = vst [vmem:[#allocation43_spill] sm:$0xff] %v4843_v50  ;;  %v4845_v0 = vpop.f32.mrb[105].mxu0  ;;  %v4066_v50 = vld [vmem:[#allocation13 + $0x70] sm:$0xff]  }
 0x2b4   :  { %5495 = vst [vmem:[#allocation44_spill] sm:$0xff] %v4845_v0  ;;  %v4847_v55 = vpop.f32.mrb[106].mxu0  ;;  %3569 = vmatprep.subr.bf16.mxu0 %v4066_v50  ;;  %v4882_v50 = vld [vmem:[#allocation13 + $0xe0] sm:$0xff]   ;;  %v4938_v0 = vld [vmem:[#allocation13 + $0xf8] sm:$0xff]  }
 0x2b5   :  { %5496 = vst [vmem:[#allocation45_spill] sm:$0xff] %v4847_v55  ;;  %v4849_v6 = vpop.f32.mrb[107].mxu0  ;;  %v4862_v55 = vld [vmem:[#allocation13 + $0xd8] sm:$0xff]   ;;  %5508 = vst [vmem:[#allocation57_spill] sm:$0xff] %v4882_v50 }
 0x2b6   :  { %5497 = vst [vmem:[#allocation46_spill] sm:$0xff] %v4849_v6  ;;  %3784 = vmatprep.subr.bf16.mxu1 %v4862_v55  ;;  %v5531_v6 = vld [vmem:[#allocation31_spill] sm:$0xff] }
 0x2b8   :  { %1956 = vmatmul.mubr.bf16.gmra.mrb[20].mxu1 %v4536_v15  ;;  %v4864_v15 = vld [vmem:[#allocation13 + $0x98] sm:$0xff]  }
 0x2b9   :  { %1965 = vmatprep.mubr.bf16.mxu1 %v4548_v31  ;;  %5502 = vst [vmem:[#allocation51_spill] sm:$0xff] %v4864_v15  ;;  %v4067_v31 = vld [vmem:[#allocation13 + $0x30] sm:$0xff]   ;;  %3792 = vmatpush3.bf16.msra.mxu1 %v4864_v15 }
 0x2ba   :  { %v4853_v56 = vpop.f32.mrb[108].mxu0  ;;  %3570 = vmatpush3.bf16.msra.mxu0 %v4067_v31  ;;  %v4884_v31 = vld [vmem:[#allocation13 + $0xa0] sm:$0xff]   ;;  %3785 = vmatprep.subr.bf16.mxu1 %v4882_v50 }
 0x2bb   :  { %5498 = vst [vmem:[#allocation47_spill] sm:$0xff] %v4853_v56  ;;  %v4855_v35 = vpop.f32.mrb[109].mxu0  ;;  %v4068_v56 = vld [vmem:[#allocation13 + $0x78] sm:$0xff]   ;;  %5509 = vst [vmem:[#allocation58_spill] sm:$0xff] %v4884_v31 }
 0x2bc   :  { %5499 = vst [vmem:[#allocation48_spill] sm:$0xff] %v4855_v35  ;;  %v4857_v5 = vpop.f32.mrb[110].mxu0  ;;  %3571 = vmatprep.subr.bf16.mxu0 %v4068_v56 }
 0x2bd   :  { %5500 = vst [vmem:[#allocation49_spill] sm:$0xff] %v4857_v5  ;;  %v4859_v23 = vpop.f32.mrb[111].mxu0  ;;  %v4069_v5 = vld [vmem:[#allocation13 + $0x38] sm:$0xff]   ;;  %3793 = vmatpush3.bf16.msra.mxu1 %v4884_v31 }
 0x2be   :  { %5501 = vst [vmem:[#allocation50_spill] sm:$0xff] %v4859_v23  ;;  %3572 = vmatpush3.bf16.msra.mxu0 %v4069_v5 }
 0x2bf   :  { %3669 = vmatprep.subr.bf16.mxu0 %v4797_v27 }
 0x2c0   :  { %1966 = vmatmul.mubr.bf16.gmra.mrb[24].mxu1 %v4546_v30 }
 0x2c1   :  { %1975 = vmatprep.mubr.bf16.mxu1 %v4558_v43 }
 0x2c2   :  { %v4867_v35 = vpop.f32.mrb[112].mxu0 }
 0x2c3   :  { %5503 = vst [vmem:[#allocation52_spill] sm:$0xff] %v4867_v35  ;;  %v4870_v28 = vpop.f32.mrb[113].mxu0 }
 0x2c4   :  { %5504 = vst [vmem:[#allocation53_spill] sm:$0xff] %v4870_v28  ;;  %v4873_v30 = vpop.f32.mrb[114].mxu0 }
 0x2c5   :  { %5505 = vst [vmem:[#allocation54_spill] sm:$0xff] %v4873_v30  ;;  %v4875_v16 = vpop.f32.mrb[115].mxu0 }
 0x2c6   :  { %5506 = vst [vmem:[#allocation55_spill] sm:$0xff] %v4875_v16 }
 0x2c8   :  { %1976 = vmatmul.mubr.bf16.gmra.mrb[28].mxu1 %v4556_v42 }
 0x2c9   :  { %1985 = vmatprep.mubr.bf16.mxu1 %v4568_v53 }
 0x2ca   :  { %v4880_v43 = vpop.f32.mrb[116].mxu0 }
 0x2cb   :  { %5507 = vst [vmem:[#allocation56_spill] sm:$0xff] %v4880_v43  ;;  %v4886_v35 = vpop.f32.mrb[117].mxu0  ;;  %v4908_v43 = vld [vmem:[#allocation13 + $0xe8] sm:$0xff]  }
 0x2cc   :  { %5510 = vst [vmem:[#allocation59_spill] sm:$0xff] %v4886_v35  ;;  %v4888_v56 = vpop.f32.mrb[118].mxu0  ;;  %5518 = vst [vmem:[#allocation67_spill] sm:$0xff] %v4908_v43  ;;  %3786 = vmatprep.subr.bf16.mxu1 %v4908_v43 }
 0x2cd   :  { %5511 = vst [vmem:[#allocation60_spill] sm:$0xff] %v4888_v56  ;;  %v4891_v30 = vpop.f32.mrb[119].mxu0 }
 0x2ce   :  { %5512 = vst [vmem:[#allocation61_spill] sm:$0xff] %v4891_v30  ;;  %v4910_v30 = vld [vmem:[#allocation13 + $0xa8] sm:$0xff]  }
 0x2cf   :  { %5519 = vst [vmem:[#allocation68_spill] sm:$0xff] %v4910_v30  ;;  %3794 = vmatpush3.bf16.msra.mxu1 %v4910_v30 }
 0x2d0   :  { %1986 = vmatmul.mubr.bf16.gmra.mrb[32].mxu1 %v4566_v52 }
 0x2d1   :  { %1995 = vmatprep.mubr.bf16.mxu1 %v4578_v2 }
 0x2d2   :  { %v4896_v42 = vpop.f32.mrb[120].mxu0 }
 0x2d3   :  { %5513 = vst [vmem:[#allocation62_spill] sm:$0xff] %v4896_v42  ;;  %v4898_v53 = vpop.f32.mrb[121].mxu0 }
 0x2d4   :  { %5514 = vst [vmem:[#allocation63_spill] sm:$0xff] %v4898_v53  ;;  %v4900_v27 = vpop.f32.mrb[122].mxu0 }
 0x2d5   :  { %5515 = vst [vmem:[#allocation64_spill] sm:$0xff] %v4900_v27  ;;  %v4902_v5 = vpop.f32.mrb[123].mxu0  ;;  %v5526_v27 = vld [vmem:[#allocation26_spill] sm:$0xff] }
 0x2d6   :  { %5516 = vst [vmem:[#allocation65_spill] sm:$0xff] %v4902_v5  ;;  %5534 = vst [vmem:[#allocation26_spill] sm:$0xff] %v4938_v0 }
 0x2d8   :  { %1996 = vmatmul.mubr.bf16.gmra.mrb[36].mxu1 %v4576_v1  ;;  %v5523_v1 = vld [vmem:[#allocation27_spill] sm:$0xff] }
 0x2d9   :  { %2005 = vmatprep.mubr.bf16.mxu1 %v4592_v17  ;;  %v4924_v17 = vld [vmem:[#allocation13 + $0xf0] sm:$0xff]  }
 0x2da   :  { %v4906_v56 = vpop.f32.mrb[124].mxu0  ;;  %5524 = vst [vmem:[#allocation27_spill] sm:$0xff] %v4924_v17  ;;  %3787 = vmatprep.subr.bf16.mxu1 %v4924_v17  ;;  %v5530_v17 = vld [vmem:[#allocation28_spill] sm:$0xff] }
 0x2db   :  { %5517 = vst [vmem:[#allocation66_spill] sm:$0xff] %v4906_v56  ;;  %v4912_v52 = vpop.f32.mrb[125].mxu0  ;;  %v4926_v56 = vld [vmem:[#allocation13 + $0xb0] sm:$0xff]  }
 0x2dc   :  { %5520 = vst [vmem:[#allocation69_spill] sm:$0xff] %v4912_v52  ;;  %v4914_v2 = vpop.f32.mrb[126].mxu0  ;;  %5525 = vst [vmem:[#allocation72_spill] sm:$0xff] %v4926_v56  ;;  %3795 = vmatpush3.bf16.msra.mxu1 %v4926_v56  ;;  %v5532_v56 = vld [vmem:[#allocation30_spill] sm:$0xff] }
 0x2dd   :  { %5521 = vst [vmem:[#allocation70_spill] sm:$0xff] %v4914_v2  ;;  %v4917_v42 = vpop.f32.mrb[127].mxu0  ;;  %v835_v2 = vld [vmem:[#allocation11] sm:$0xf]  ;;  %3788 = vmatprep.subr.bf16.mxu1 %v4938_v0 }
 0x2de   :  { %5522 = vst [vmem:[#allocation71_spill] sm:$0xff] %v4917_v42  ;;  %v5527_v42 = vld [vmem:[#allocation24_spill] sm:$0xff] }
 0x2df   :  { %v840_v52 = vrot.slane %v835_v2, %v5527_v42 }
 0x2e0   :  { %2006 = vmatmul.mubr.bf16.gmra.mrb[40].mxu1 %v4586_v12  ;;  %v5528_v12 = vld [vmem:[#allocation29_spill] sm:$0xff] }
 0x2e1   :  { %2015 = vmatprep.mubr.bf16.mxu1 %v4602_v44  ;;  %v5529_v44 = vld [vmem:[#allocation25_spill] sm:$0xff] }
 0x2e2   :  { %v844_v5 = vrot.slane %v835_v2, %v5529_v44 }
 0x2e8   :  { %2016 = vmatmul.mubr.bf16.gmra.mrb[44].mxu1 %v4600_v37 }
 0x2e9   :  { %2025 = vmatprep.mubr.bf16.mxu1 %v5523_v1 }
 0x2f0   :  { %2026 = vmatmul.mubr.bf16.gmra.mrb[48].mxu1 %v5526_v27  ;;  %v5533_v27 = vld [vmem:[#allocation33_spill] sm:$0xff] }
 0x2f1   :  { %2035 = vmatprep.mubr.bf16.mxu1 %v5528_v12  ;;  %v4940_v12 = vld [vmem:[#allocation13 + $0xb8] sm:$0xff]  }
 0x2f2   :  { %5535 = vst [vmem:[#allocation24_spill] sm:$0xff] %v4940_v12  ;;  %3796 = vmatpush3.bf16.msra.mxu1 %v4940_v12 }
 0x2f3   :  { %v1268_v37 = vpop.f32.mrb[0].mxu1 }
 0x2f4   :  { %v1269_v53 = vadd.f32 %v1268_v37, %v840_v52  ;;  %v1270_v1 = vpop.f32.mrb[1].mxu1 }
 0x2f5   :  { %v1271_v35 = vadd.f32 %v1270_v1, %v844_v5  ;;  %v1272_v16 = vpop.f32.mrb[2].mxu1 }
 0x2f6   :  { %v1273_v28 = vpop.f32.mrb[3].mxu1  ;;  %v5536_v16 = vld [vmem:[#allocation32_spill] sm:$0xff] }
 0x2f7   :  { %v2090_v30 = vcombine.low %v1269_v53, %v1271_v35  ;;  %v2091_v23 = vcombine.high %v1269_v53, %v1271_v35  ;;  %v5537_v35 = vld [vmem:[#allocation34_spill] sm:$0xff] }
 0x2f8   :  { %2036 = vmatmul.mubr.bf16.gmra.mrb[52].mxu1 %v5530_v17 }
 0x2f9   :  { %2045 = vmatprep.mubr.bf16.mxu1 %v5531_v6  ;;  %v5538_v6 = vld [vmem:[#allocation23_spill] sm:$0xff] }
 0x2fa   :  { %v4950_v28 = vsub.s32 2, %v5538_v6  ;;  %v4953_v5 = vsub.s32 3, %v5538_v6 }
 0x2fc   :  { %5539 = vst [vmem:[#allocation29_spill] sm:$0xff] %v4950_v28  ;;  %5540 = vst [vmem:[#allocation25_spill] sm:$0xff] %v4953_v5  ;;  %v848_v52 = vrot.slane %v835_v2, %v4950_v28  ;;  %v852_v37 = vrot.slane %v835_v2, %v4953_v5 }
 0x300   :  { %2046 = vmatmul.mubr.bf16.gmra.mrb[56].mxu1 %v5532_v56  ;;  %v4303_v56 = vmov 1966171168  }
 0x301   :  { %2055 = vmatprep.mubr.bf16.mxu1 %v5533_v27  ;;  %v2095_v53 = vunpack.c.l.s4 %v4303_v56 }
 0x303   :  { %v2096_v17 = vunpack.c.0.s8 %v2095_v53 }
 0x308   :  { %2056 = vmatmul.mubr.bf16.gmra.mrb[60].mxu1 %v5536_v16 }
 0x309   :  { %2065 = vmatprep.mubr.bf16.mxu1 %v4692_v59 }
 0x310   :  { %2066 = vmatmul.mubr.bf16.gmra.mrb[64].mxu1 %v4690_v39 }
 0x311   :  { %2075 = vmatprep.mubr.bf16.mxu1 %v4710_v10  ;;  %v4958_v10 = vsub.s32 %v2096_v17, %v5538_v6 }
 0x313   :  { %5541 = vst [vmem:[#allocation28_spill] sm:$0xff] %v4958_v10  ;;  %v2100_v56 = vrot.slane %v2090_v30, %v4958_v10  ;;  %v4962_v43 = vrot.slane %v2091_v23, %v4958_v10 }
 0x315   :  { %5542 = vst [vmem:[#allocation31_spill] sm:$0xff] %v4962_v43 }
 0x318   :  { %2076 = vmatmul.mubr.bf16.gmra.mrb[68].mxu1 %v5537_v35 }
 0x333   :  { %v1309_v59 = vpop.f32.mrb[4].mxu1 }
 0x334   :  { %v1310_v1 = vadd.f32 %v1309_v59, %v848_v52  ;;  %v1311_v39 = vpop.f32.mrb[5].mxu1 }
 0x335   :  { %v1312_v27 = vadd.f32 %v1311_v39, %v852_v37  ;;  %v1313_v16 = vpop.f32.mrb[6].mxu1 }
 0x336   :  { %v1314_v35 = vpop.f32.mrb[7].mxu1 }
 0x337   :  { %v2092_v12 = vcombine.low %v1310_v1, %v1312_v27  ;;  %v2093_v0 = vcombine.high %v1310_v1, %v1312_v27 }
 0x339   :  { %v2114_v53 = vrot.slane %v2092_v12, %v4958_v10  ;;  %v4966_v2 = vrot.slane %v2093_v0, %v4958_v10 }
 0x33b   :  { %5543 = vst [vmem:[#allocation30_spill] sm:$0xff] %v4966_v2  ;;  %v2122_v52 = vcombine.low %v2100_v56, %v2114_v53  ;;  %v2123_v59 = vcombine.high %v2100_v56, %v2114_v53  ;;  %v2124_v6 = vcombine.low %v4962_v43, %v4966_v2 }
 0x33d   :  { %v4973_v37 = vrot.slane %v2122_v52, %v4958_v10  ;;  %v4976_v30 = vrot.slane %v2123_v59, %v4958_v10  ;;  %v4987_v12 = vrot.slane %v2124_v6, %v4958_v10 }
 0x33f   :  { %5544 = vst [vmem:[#allocation33_spill] sm:$0xff] %v4973_v37  ;;  %5545 = vst [vmem:[#allocation32_spill] sm:$0xff] %v4976_v30  ;;  %v4980_v23 = vcombine.high %v4973_v37, %v4973_v37  ;;  %v4984_v0 = vcombine.high %v4976_v30, %v4976_v30  ;;  %v2161_v1 = vrot.slane %v4973_v37, %v5527_v42 }
 0x340   :  { %5547 = vst [vmem:[#allocation23_spill] sm:$0xff] %v4987_v12  ;;  %v2165_v39 = vrot.slane %v4973_v37, %v5529_v44  ;;  %v2181_v27 = vrot.slane %v4976_v30, %v5529_v44  ;;  %v2177_v16 = vrot.slane %v4976_v30, %v5527_v42 }
 0x341   :  { %5546 = vst [vmem:[#allocation34_spill] sm:$0xff] %v4980_v23  ;;  %v2197_v35 = vrot.slane %v4980_v23, %v5529_v44  ;;  %v2193_v56 = vrot.slane %v4980_v23, %v5527_v42  ;;  %v5003_v53 = vrot.slane %v4984_v0, %v5529_v44  ;;  %v2318_v6 = vadd.f32 %v2161_v1, %v4739_v22 }
 0x342   :  { %v2319_v52 = vadd.f32 %v2165_v39, %v4741_v48  ;;  %v2323_v59 = vadd.f32 %v2165_v39, %v4745_v9  ;;  %v2322_v17 = vadd.f32 %v2161_v1, %v4743_v14  ;;  %v2327_v30 = vadd.f32 %v2165_v39, %v4749_v20 }
 0x343   :  { %v2331_v5 = vadd.f32 %v2165_v39, %v4753_v54  ;;  %v2326_v37 = vadd.f32 %v2161_v1, %v4747_v36  ;;  %v2330_v23 = vadd.f32 %v2161_v1, %v4751_v19  ;;  %v2446_v50 = vmax.f32 %v2318_v6, 0.0 }
 0x344   :  { %v2447_v28 = vmax.f32 %v2319_v52, 0.0  ;;  %v2451_v31 = vmax.f32 %v2323_v59, 0.0  ;;  %v2450_v15 = vmax.f32 %v2322_v17, 0.0  ;;  %v2455_v2 = vmax.f32 %v2327_v30, 0.0 }
 0x345   :  { %v2459_v48 = vmax.f32 %v2331_v5, 0.0  ;;  %v2454_v43 = vmax.f32 %v2326_v37, 0.0  ;;  %v2458_v9 = vmax.f32 %v2330_v23, 0.0  ;;  %v2335_v14 = vadd.f32 %v2181_v27, %v4757_v58 }
 0x346   :  { %v2575_v10 = vpack.c.bf16 %v2451_v31, %v2447_v28  ;;  %v2574_v22 = vpack.c.bf16 %v2450_v15, %v2446_v50  ;;  %v2339_v20 = vadd.f32 %v2181_v27, %v4761_v33  ;;  %v2334_v36 = vadd.f32 %v2177_v16, %v4755_v60 }
 0x347   :  { %v2579_v12 = vpack.c.bf16 %v2459_v48, %v2455_v2  ;;  %v2578_v54 = vpack.c.bf16 %v2458_v9, %v2454_v43  ;;  %v2338_v19 = vadd.f32 %v2177_v16, %v4759_v51  ;;  %v2463_v1 = vmax.f32 %v2335_v14, 0.0 }
 0x348   :  { %2933 = vmatprep.mubr.bf16.mxu0 %v2575_v10  ;;  %v2467_v39 = vmax.f32 %v2339_v20, 0.0  ;;  %v2343_v17 = vadd.f32 %v2181_v27, %v4765_v38  ;;  %v2347_v5 = vadd.f32 %v2181_v27, %v4769_v24  ;;  %v2462_v31 = vmax.f32 %v2334_v36, 0.0 }
 0x349   :  { %2934 = vmatmul.mubr.bf16.vlgmr.msra.gmra.mrb[128].mxu0 %v2574_v22  ;;  %v2466_v15 = vmax.f32 %v2338_v19, 0.0  ;;  %v2342_v58 = vadd.f32 %v2177_v16, %v4763_v13  ;;  %v2346_v33 = vadd.f32 %v2177_v16, %v4767_v62  ;;  %v2351_v51 = vadd.f32 %v2197_v35, %v4773_v11 }
 0x34a   :  { %2941 = vmatprep.mubr.bf16.mxu0 %v2579_v12  ;;  %v2583_v43 = vpack.c.bf16 %v2467_v39, %v2463_v1  ;;  %v2471_v50 = vmax.f32 %v2343_v17, 0.0  ;;  %v2475_v60 = vmax.f32 %v2347_v5, 0.0  ;;  %3670 = vmatpush3.bf16.msra.mxu0 %v4805_v32  ;;  %v2355_v24 = vadd.f32 %v2197_v35, %v4777_v46  ;;  %v5550_v1 = vld [vmem:[#allocation31_spill] sm:$0xff]  ;;  %v5554_v5 = vld [vmem:[#allocation38_spill] sm:$0xff] }
 0x34b   :  { %v5023_v28 = vpack.c.bf16 %v2466_v15, %v2462_v31  ;;  %v2470_v38 = vmax.f32 %v2342_v58, 0.0  ;;  %v2474_v10 = vmax.f32 %v2346_v33, 0.0  ;;  %3671 = vmatprep.subr.bf16.mxu0 %v4808_v25  ;;  %v2479_v13 = vmax.f32 %v2351_v51, 0.0  ;;  %v5555_v15 = vld [vmem:[#allocation51_spill] sm:$0xff] }
 0x34c   :  { %v5027_v2 = vpack.c.bf16 %v2475_v60, %v2471_v50  ;;  %v2350_v62 = vadd.f32 %v2193_v56, %v4771_v3  ;;  %v2354_v37 = vadd.f32 %v2193_v56, %v4775_v7  ;;  %v2483_v11 = vmax.f32 %v2355_v24, 0.0  ;;  %v5556_v50 = vld [vmem:[#allocation57_spill] sm:$0xff]  ;;  %v5558_v24 = vld [vmem:[#allocation42_spill] sm:$0xff] }
 0x34d   :  { %v5031_v30 = vpack.c.bf16 %v2474_v10, %v2470_v38  ;;  %v2359_v32 = vadd.f32 %v2197_v35, %v4781_v4  ;;  %v2363_v23 = vadd.f32 %v2197_v35, %v4785_v18  ;;  %v2358_v46 = vadd.f32 %v2193_v56, %v4779_v26  ;;  %v5557_v38 = vld [vmem:[#allocation40_spill] sm:$0xff] }
 0x34e   :  { %v2478_v12 = vmax.f32 %v2350_v62, 0.0  ;;  %v2482_v27 = vmax.f32 %v2354_v37, 0.0  ;;  %v2362_v25 = vadd.f32 %v2193_v56, %v4783_v57  ;;  %3672 = vmatpush3.bf16.msra.mxu0 %v4813_v63  ;;  %v5038_v16 = vpack.c.bf16 %v2483_v11, %v2479_v13  ;;  %v5559_v62 = vld [vmem:[#allocation35_spill] sm:$0xff]  ;;  %v5560_v11 = vld [vmem:[#allocation37_spill] sm:$0xff] }
 0x34f   :  { %v2487_v3 = vmax.f32 %v2359_v32, 0.0  ;;  %v2491_v52 = vmax.f32 %v2363_v23, 0.0  ;;  %v2367_v7 = vadd.f32 %v5003_v53, %v4789_v45  ;;  %3673 = vmatprep.subr.bf16.mxu0 %v4818_v61  ;;  %v2486_v18 = vmax.f32 %v2358_v46, 0.0  ;;  %v5561_v23 = vld [vmem:[#allocation39_spill] sm:$0xff] }
 0x350   :  { %v5043_v4 = vpack.c.bf16 %v2482_v27, %v2478_v12  ;;  %v2490_v35 = vmax.f32 %v2362_v25, 0.0  ;;  %v2371_v26 = vadd.f32 %v5003_v53, %v4793_v49  ;;  %v2209_v56 = vrot.slane %v4984_v0, %v5527_v42  ;;  %v5562_v27 = vld [vmem:[#allocation41_spill] sm:$0xff] }
 0x351   :  { %2942 = vmatmul.mubr.bf16.gmra.mrb[132].mxu0 %v2578_v54  ;;  %v5047_v57 = vpack.c.bf16 %v2491_v52, %v2487_v3  ;;  %v2495_v63 = vmax.f32 %v2367_v7, 0.0  ;;  %v2375_v61 = vadd.f32 %v5003_v53, %v4799_v41  ;;  %v2379_v6 = vadd.f32 %v5003_v53, %v4803_v21  ;;  %v5548_v41 = vld [vmem:[#allocation23_spill] sm:$0xff] }
 0x352   :  { %2949 = vmatprep.mubr.bf16.mxu0 %v2583_v43  ;;  %v5051_v59 = vpack.c.bf16 %v2490_v35, %v2486_v18  ;;  %v2499_v45 = vmax.f32 %v2371_v26, 0.0  ;;  %3674 = vmatpush3.bf16.msra.mxu0 %v4827_v40  ;;  %v2366_v49 = vadd.f32 %v2209_v56, %v4787_v34  ;;  %v2370_v48 = vadd.f32 %v2209_v56, %v4791_v29  ;;  %v5549_v34 = vld [vmem:[#allocation28_spill] sm:$0xff]  ;;  %v5551_v29 = vld [vmem:[#allocation30_spill] sm:$0xff] }
 0x353   :  { %v2374_v9 = vadd.f32 %v2209_v56, %v4795_v47  ;;  %v2378_v22 = vadd.f32 %v2209_v56, %v4801_v8  ;;  %3675 = vmatprep.subr.bf16.mxu0 %v4862_v55  ;;  %v2503_v20 = vmax.f32 %v2375_v61, 0.0  ;;  %v2507_v54 = vmax.f32 %v2379_v6, 0.0  ;;  %v5553_v55 = vld [vmem:[#allocation36_spill] sm:$0xff]  ;;  %v5563_v18 = vld [vmem:[#allocation58_spill] sm:$0xff]  ;;  %v5564_v56 = vld [vmem:[#allocation67_spill] sm:$0xff] }
 0x354   :  { %v5063_v14 = vpack.c.bf16 %v2499_v45, %v2495_v63  ;;  %v2229_v36 = vrot.slane %v5548_v41, %v5529_v44  ;;  %v2494_v21 = vmax.f32 %v2366_v49, 0.0  ;;  %v2498_v53 = vmax.f32 %v2370_v48, 0.0  ;;  %v5565_v61 = vld [vmem:[#allocation44_spill] sm:$0xff]  ;;  %v5566_v49 = vld [vmem:[#allocation46_spill] sm:$0xff] }
 0x355   :  { %v2502_v40 = vmax.f32 %v2374_v9, 0.0  ;;  %v2506_v19 = vmax.f32 %v2378_v22, 0.0  ;;  %v5552_v39 = vcombine.high %v5550_v1, %v5551_v29  ;;  %v5073_v8 = vpack.c.bf16 %v2507_v54, %v2503_v20  ;;  %v5570_v1 = vld [vmem:[#allocation43_spill] sm:$0xff] }
 0x356   :  { %v2383_v17 = vadd.f32 %v2229_v36, %v5553_v55  ;;  %v2387_v31 = vadd.f32 %v2229_v36, %v5554_v5  ;;  %3676 = vmatpush3.bf16.msra.mxu0 %v5555_v15  ;;  %v5078_v58 = vpack.c.bf16 %v2498_v53, %v2494_v21  ;;  %v2225_v43 = vrot.slane %v5548_v41, %v5527_v42  ;;  %v5567_v21 = vld [vmem:[#allocation48_spill] sm:$0xff] }
 0x357   :  { %v5071_v47 = vrot.slane %v5552_v39, %v5549_v34  ;;  %v5080_v33 = vpack.c.bf16 %v2506_v19, %v2502_v40  ;;  %3677 = vmatprep.subr.bf16.mxu0 %v5556_v50  ;;  %v2391_v10 = vadd.f32 %v2229_v36, %v5557_v38  ;;  %v2395_v13 = vadd.f32 %v2229_v36, %v5558_v24  ;;  %v5568_v40 = vld [vmem:[#allocation50_spill] sm:$0xff]  ;;  %v5569_v34 = vld [vmem:[#allocation68_spill] sm:$0xff]  ;;  %v5571_v39 = vld [vmem:[#allocation45_spill] sm:$0xff] }
 0x358   :  { %v2511_v60 = vmax.f32 %v2383_v17, 0.0  ;;  %v2515_v51 = vmax.f32 %v2387_v31, 0.0  ;;  %v2382_v37 = vadd.f32 %v2225_v43, %v5559_v62  ;;  %v2386_v32 = vadd.f32 %v2225_v43, %v5560_v11  ;;  %v5572_v17 = vld [vmem:[#allocation47_spill] sm:$0xff]  ;;  %v5573_v31 = vld [vmem:[#allocation49_spill] sm:$0xff] }
 0x359   :  { %2950 = vmatmul.mubr.bf16.gmra.mrb[136].mxu0 %v5023_v28  ;;  %v2390_v12 = vadd.f32 %v2225_v43, %v5561_v23  ;;  %v2394_v46 = vadd.f32 %v2225_v43, %v5562_v27  ;;  %v2519_v3 = vmax.f32 %v2391_v10, 0.0  ;;  %v2523_v52 = vmax.f32 %v2395_v13, 0.0  ;;  %v5574_v43 = vld [vmem:[#allocation27_spill] sm:$0xff] }
 0x35a   :  { %2957 = vmatprep.mubr.bf16.mxu0 %v5027_v2  ;;  %v5093_v25 = vpack.c.bf16 %v2515_v51, %v2511_v60  ;;  %v2245_v7 = vrot.slane %v5071_v47, %v5529_v44  ;;  %3678 = vmatpush3.bf16.msra.mxu0 %v5563_v18  ;;  %v2510_v28 = vmax.f32 %v2382_v37, 0.0  ;;  %v2514_v35 = vmax.f32 %v2386_v32, 0.0  ;;  %v5575_v32 = vld [vmem:[#allocation53_spill] sm:$0xff] }
 0x35b   :  { %v2518_v26 = vmax.f32 %v2390_v12, 0.0  ;;  %v2522_v63 = vmax.f32 %v2394_v46, 0.0  ;;  %3679 = vmatprep.subr.bf16.mxu0 %v5564_v56  ;;  %v5101_v45 = vcombine.high %v5548_v41, %v5548_v41  ;;  %v5103_v2 = vpack.c.bf16 %v2523_v52, %v2519_v3  ;;  %v5576_v12 = vld [vmem:[#allocation55_spill] sm:$0xff]  ;;  %v5577_v52 = vld [vmem:[#allocation72_spill] sm:$0xff] }
 0x35c   :  { %v2399_v6 = vadd.f32 %v2245_v7, %v5565_v61  ;;  %v2403_v48 = vadd.f32 %v2245_v7, %v5566_v49  ;;  %v5107_v9 = vpack.c.bf16 %v2514_v35, %v2510_v28  ;;  %v2241_v20 = vrot.slane %v5071_v47, %v5527_v42  ;;  %v5578_v28 = vld [vmem:[#allocation59_spill] sm:$0xff]  ;;  %v5581_v56 = vld [vmem:[#allocation52_spill] sm:$0xff] }
 0x35d   :  { %v5109_v22 = vpack.c.bf16 %v2522_v63, %v2518_v26  ;;  %v2407_v53 = vadd.f32 %v2245_v7, %v5567_v21  ;;  %v2411_v19 = vadd.f32 %v2245_v7, %v5568_v40  ;;  %v2261_v38 = vrot.slane %v5101_v45, %v5529_v44  ;;  %v5580_v63 = vld [vmem:[#allocation26_spill] sm:$0xff] }
 0x35e   :  { %v2527_v54 = vmax.f32 %v2399_v6, 0.0  ;;  %v2531_v36 = vmax.f32 %v2403_v48, 0.0  ;;  %3680 = vmatpush3.bf16.msra.mxu0 %v5569_v34  ;;  %v2398_v29 = vadd.f32 %v2241_v20, %v5570_v1  ;;  %v2402_v55 = vadd.f32 %v2241_v20, %v5571_v39  ;;  %v5582_v6 = vld [vmem:[#allocation54_spill] sm:$0xff]  ;;  %v5583_v48 = vld [vmem:[#allocation56_spill] sm:$0xff] }
 0x35f   :  { %v2406_v5 = vadd.f32 %v2241_v20, %v5572_v17  ;;  %v2410_v15 = vadd.f32 %v2241_v20, %v5573_v31  ;;  %3681 = vmatprep.subr.bf16.mxu0 %v5574_v43  ;;  %v2535_v60 = vmax.f32 %v2407_v53, 0.0  ;;  %v2539_v51 = vmax.f32 %v2411_v19, 0.0 }
 0x360   :  { %v5121_v50 = vpack.c.bf16 %v2531_v36, %v2527_v54  ;;  %v2526_v10 = vmax.f32 %v2398_v29, 0.0  ;;  %v2530_v24 = vmax.f32 %v2402_v55, 0.0  ;;  %v5128_v37 = vcombine.high %v5071_v47, %v5071_v47  ;;  %v5584_v54 = vld [vmem:[#allocation60_spill] sm:$0xff] }
 0x361   :  { %2958 = vmatmul.mubr.bf16.gmra.mrb[140].mxu0 %v5031_v30  ;;  %v2534_v13 = vmax.f32 %v2406_v5, 0.0  ;;  %v2538_v62 = vmax.f32 %v2410_v15, 0.0  ;;  %v5131_v11 = vpack.c.bf16 %v2539_v51, %v2535_v60  ;;  %v2415_v23 = vadd.f32 %v2261_v38, %v5575_v32  ;;  %v5585_v55 = vld [vmem:[#allocation24_spill] sm:$0xff]  ;;  %v5586_v5 = vld [vmem:[#allocation63_spill] sm:$0xff]  ;;  %v5587_v15 = vld [vmem:[#allocation65_spill] sm:$0xff] }
 0x362   :  { %2965 = vmatprep.mubr.bf16.mxu0 %v5038_v16  ;;  %v2419_v27 = vadd.f32 %v2261_v38, %v5576_v12  ;;  %v5135_v46 = vpack.c.bf16 %v2530_v24, %v2526_v10  ;;  %v2257_v30 = vrot.slane %v5101_v45, %v5527_v42  ;;  %3682 = vmatpush3.bf16.msra.mxu0 %v5577_v52  ;;  %v5579_v16 = vld [vmem:[#allocation61_spill] sm:$0xff] }
 0x363   :  { %v5137_v3 = vpack.c.bf16 %v2538_v62, %v2534_v13  ;;  %v2543_v7 = vmax.f32 %v2415_v23, 0.0  ;;  %v2423_v35 = vadd.f32 %v2261_v38, %v5578_v28  ;;  %v2427_v26 = vadd.f32 %v2261_v38, %v5579_v16  ;;  %3683 = vmatprep.subr.bf16.mxu0 %v5580_v63  ;;  %v5588_v24 = vld [vmem:[#allocation69_spill] sm:$0xff]  ;;  %v5589_v62 = vld [vmem:[#allocation71_spill] sm:$0xff]  ;;  %v5590_v23 = vld [vmem:[#allocation62_spill] sm:$0xff] }
 0x364   :  { %v2547_v18 = vmax.f32 %v2419_v27, 0.0  ;;  %v2414_v61 = vadd.f32 %v2257_v30, %v5581_v56  ;;  %v2418_v49 = vadd.f32 %v2257_v30, %v5582_v6  ;;  %v2422_v20 = vadd.f32 %v2257_v30, %v5583_v48  ;;  %v5591_v27 = vld [vmem:[#allocation64_spill] sm:$0xff]  ;;  %v5595_v48 = vld [vmem:[#allocation33_spill] sm:$0xff] }
 0x365   :  { %v2426_v36 = vadd.f32 %v2257_v30, %v5584_v54  ;;  %v2551_v53 = vmax.f32 %v2423_v35, 0.0  ;;  %v2555_v40 = vmax.f32 %v2427_v26, 0.0  ;;  %v2277_v19 = vrot.slane %v5128_v37, %v5529_v44 }
 0x366   :  { %v5149_v21 = vpack.c.bf16 %v2547_v18, %v2543_v7  ;;  %v2542_v34 = vmax.f32 %v2414_v61, 0.0  ;;  %v2546_v1 = vmax.f32 %v2418_v49, 0.0  ;;  %v2550_v29 = vmax.f32 %v2422_v20, 0.0  ;;  %3684 = vmatpush3.bf16.msra.mxu0 %v5585_v55  ;;  %v5593_v7 = vld [vmem:[#allocation70_spill] sm:$0xff]  ;;  %v5594_v49 = vld [vmem:[#allocation29_spill] sm:$0xff] }
 0x367   :  { %v2554_v39 = vmax.f32 %v2426_v36, 0.0  ;;  %v5154_v17 = vpack.c.bf16 %v2555_v40, %v2551_v53  ;;  %v2431_v31 = vadd.f32 %v2277_v19, %v5586_v5  ;;  %v2435_v43 = vadd.f32 %v2277_v19, %v5587_v15  ;;  %v5596_v36 = vld [vmem:[#allocation25_spill] sm:$0xff] }
 0x368   :  { %v5159_v60 = vpack.c.bf16 %v2546_v1, %v2542_v34  ;;  %v2273_v44 = vrot.slane %v5128_v37, %v5527_v42  ;;  %v2439_v13 = vadd.f32 %v2277_v19, %v5588_v24  ;;  %v2443_v32 = vadd.f32 %v2277_v19, %v5589_v62 }
 0x369   :  { %2966 = vmatmul.mubr.bf16.gmra.mrb[144].mxu0 %v5043_v4  ;;  %v5161_v51 = vpack.c.bf16 %v2554_v39, %v2550_v29  ;;  %v2559_v38 = vmax.f32 %v2431_v31, 0.0  ;;  %v2563_v10 = vmax.f32 %v2435_v43, 0.0  ;;  %v5592_v4 = vld [vmem:[#allocation66_spill] sm:$0xff]  ;;  %v2169_v20 = vrot.slane %v5595_v48, %v5594_v49 }
 0x36a   :  { %2973 = vmatprep.mubr.bf16.mxu0 %v5047_v57  ;;  %v2430_v12 = vadd.f32 %v2273_v44, %v5590_v23  ;;  %v2434_v30 = vadd.f32 %v2273_v44, %v5591_v27  ;;  %v2438_v52 = vadd.f32 %v2273_v44, %v5592_v4  ;;  %v2442_v18 = vadd.f32 %v2273_v44, %v5593_v7 }
 0x36b   :  { %v5172_v28 = vpack.c.bf16 %v2563_v10, %v2559_v38  ;;  %v2567_v35 = vmax.f32 %v2439_v13, 0.0  ;;  %v2571_v42 = vmax.f32 %v2443_v32, 0.0  ;;  %v2173_v53 = vrot.slane %v5595_v48, %v5596_v36 }
 0x36c   :  { %v2558_v16 = vmax.f32 %v2430_v12, 0.0  ;;  %v2562_v57 = vmax.f32 %v2434_v30, 0.0  ;;  %v2566_v26 = vmax.f32 %v2438_v52, 0.0  ;;  %v2570_v63 = vmax.f32 %v2442_v18, 0.0 }
 0x36d   :  { %v5174_v56 = vpack.c.bf16 %v2571_v42, %v2567_v35 }
 0x36e   :  { %v5176_v61 = vpack.c.bf16 %v2562_v57, %v2558_v16  ;;  %v5178_v6 = vpack.c.bf16 %v2570_v63, %v2566_v26 }
 0x371   :  { %2974 = vmatmul.mubr.bf16.gmra.mrb[148].mxu0 %v5051_v59 }
 0x372   :  { %2981 = vmatprep.mubr.bf16.mxu0 %v5063_v14 }
 0x373   :  { %v1927_v54 = vpop.f32.mrb[8].mxu1 }
 0x374   :  { %v2320_v40 = vadd.f32 %v2169_v20, %v1927_v54  ;;  %v1929_v19 = vpop.f32.mrb[9].mxu1 }
 0x375   :  { %v2321_v34 = vadd.f32 %v2173_v53, %v1929_v19  ;;  %v1931_v1 = vpop.f32.mrb[10].mxu1 }
 0x376   :  { %v2324_v29 = vadd.f32 %v2169_v20, %v1931_v1  ;;  %v1933_v39 = vpop.f32.mrb[11].mxu1  ;;  %v2448_v5 = vmax.f32 %v2320_v40, 0.0 }
 0x377   :  { %v2325_v55 = vadd.f32 %v2173_v53, %v1933_v39  ;;  %v2449_v15 = vmax.f32 %v2321_v34, 0.0 }
 0x378   :  { %v2452_v31 = vmax.f32 %v2324_v29, 0.0 }
 0x379   :  { %v2453_v59 = vmax.f32 %v2325_v55, 0.0  ;;  %2982 = vmatmul.mubr.bf16.gmra.mrb[152].mxu0 %v5078_v58 }
 0x37a   :  { %v5187_v14 = vpack.c.bf16 %v2452_v31, %v2448_v5  ;;  %2989 = vmatprep.mubr.bf16.mxu0 %v5073_v8  ;;  %v5597_v8 = vld [vmem:[#allocation32_spill] sm:$0xff] }
 0x37b   :  { %v5190_v43 = vpack.c.bf16 %v2453_v59, %v2449_v15  ;;  %v1937_v44 = vpop.f32.mrb[12].mxu1  ;;  %v2185_v52 = vrot.slane %v5597_v8, %v5594_v49  ;;  %v2189_v35 = vrot.slane %v5597_v8, %v5596_v36 }
 0x37c   :  { %v2328_v38 = vadd.f32 %v2169_v20, %v1937_v44  ;;  %v1939_v10 = vpop.f32.mrb[13].mxu1 }
 0x37d   :  { %v2329_v24 = vadd.f32 %v2173_v53, %v1939_v10  ;;  %v1941_v13 = vpop.f32.mrb[14].mxu1 }
 0x37e   :  { %v2332_v62 = vadd.f32 %v2169_v20, %v1941_v13  ;;  %v1943_v32 = vpop.f32.mrb[15].mxu1  ;;  %v2456_v12 = vmax.f32 %v2328_v38, 0.0 }
 0x37f   :  { %v2333_v23 = vadd.f32 %v2173_v53, %v1943_v32  ;;  %v2457_v30 = vmax.f32 %v2329_v24, 0.0 }
 0x380   :  { %v2460_v27 = vmax.f32 %v2332_v62, 0.0 }
 0x381   :  { %v2461_v4 = vmax.f32 %v2333_v23, 0.0  ;;  %2990 = vmatmul.mubr.bf16.gmra.mrb[156].mxu0 %v5080_v33 }
 0x382   :  { %v5193_v58 = vpack.c.bf16 %v2460_v27, %v2456_v12  ;;  %2997 = vmatprep.mubr.bf16.mxu0 %v5093_v25 }
 0x383   :  { %v5198_v7 = vpack.c.bf16 %v2461_v4, %v2457_v30  ;;  %v1947_v18 = vpop.f32.mrb[16].mxu1 }
 0x384   :  { %v2336_v42 = vadd.f32 %v2185_v52, %v1947_v18  ;;  %v1949_v16 = vpop.f32.mrb[17].mxu1 }
 0x385   :  { %v2337_v57 = vadd.f32 %v2189_v35, %v1949_v16  ;;  %v1951_v26 = vpop.f32.mrb[18].mxu1 }
 0x386   :  { %v2340_v63 = vadd.f32 %v2185_v52, %v1951_v26  ;;  %v1953_v48 = vpop.f32.mrb[19].mxu1  ;;  %v2464_v20 = vmax.f32 %v2336_v42, 0.0 }
 0x387   :  { %v2341_v33 = vadd.f32 %v2189_v35, %v1953_v48  ;;  %v2465_v53 = vmax.f32 %v2337_v57, 0.0 }
 0x388   :  { %v2468_v54 = vmax.f32 %v2340_v63, 0.0 }
 0x389   :  { %v2469_v25 = vmax.f32 %v2341_v33, 0.0  ;;  %2998 = vmatmul.mubr.bf16.gmra.mrb[160].mxu0 %v5107_v9 }
 0x38a   :  { %v2584_v40 = vpack.c.bf16 %v2468_v54, %v2464_v20  ;;  %3005 = vmatprep.mubr.bf16.mxu0 %v5103_v2  ;;  %v5598_v2 = vld [vmem:[#allocation34_spill] sm:$0xff] }
 0x38b   :  { %v2585_v19 = vpack.c.bf16 %v2469_v25, %v2465_v53  ;;  %v1957_v34 = vpop.f32.mrb[20].mxu1  ;;  %v2201_v24 = vrot.slane %v5598_v2, %v5594_v49  ;;  %v2205_v32 = vrot.slane %v5598_v2, %v5596_v36 }
 0x38c   :  { %v2344_v1 = vadd.f32 %v2185_v52, %v1957_v34  ;;  %v1959_v29 = vpop.f32.mrb[21].mxu1 }
 0x38d   :  { %v2345_v39 = vadd.f32 %v2189_v35, %v1959_v29  ;;  %v1961_v55 = vpop.f32.mrb[22].mxu1  ;;  %3110 = vmatprep.mubr.bf16.mxu1 %v2585_v19 }
 0x38e   :  { %v2348_v5 = vadd.f32 %v2185_v52, %v1961_v55  ;;  %v1963_v31 = vpop.f32.mrb[23].mxu1  ;;  %3111 = vmatmul.mubr.bf16.vlgmr.msra.gmra.mrb[72].mxu1 %v2584_v40  ;;  %v2472_v59 = vmax.f32 %v2344_v1, 0.0 }
 0x38f   :  { %v2349_v15 = vadd.f32 %v2189_v35, %v1963_v31  ;;  %v2473_v38 = vmax.f32 %v2345_v39, 0.0  ;;  %v2221_v39 = vrot.slane %v4984_v0, %v5596_v36 }
 0x390   :  { %v2476_v44 = vmax.f32 %v2348_v5, 0.0 }
 0x391   :  { %v2477_v10 = vmax.f32 %v2349_v15, 0.0  ;;  %3006 = vmatmul.mubr.bf16.gmra.mrb[164].mxu0 %v5109_v22 }
 0x392   :  { %v2588_v9 = vpack.c.bf16 %v2476_v44, %v2472_v59  ;;  %3013 = vmatprep.mubr.bf16.mxu0 %v5121_v50 }
 0x393   :  { %v2589_v13 = vpack.c.bf16 %v2477_v10, %v2473_v38  ;;  %v1967_v62 = vpop.f32.mrb[24].mxu1 }
 0x394   :  { %v2352_v23 = vadd.f32 %v2201_v24, %v1967_v62  ;;  %v1969_v12 = vpop.f32.mrb[25].mxu1 }
 0x395   :  { %v2353_v27 = vadd.f32 %v2205_v32, %v1969_v12  ;;  %v1971_v30 = vpop.f32.mrb[26].mxu1  ;;  %3118 = vmatprep.mubr.bf16.mxu1 %v2589_v13 }
 0x396   :  { %v2356_v4 = vadd.f32 %v2201_v24, %v1971_v30  ;;  %v1973_v8 = vpop.f32.mrb[27].mxu1  ;;  %3119 = vmatmul.mubr.bf16.gmra.mrb[76].mxu1 %v2588_v9  ;;  %v2480_v52 = vmax.f32 %v2352_v23, 0.0 }
 0x397   :  { %v2357_v22 = vadd.f32 %v2205_v32, %v1973_v8  ;;  %v2481_v50 = vmax.f32 %v2353_v27, 0.0 }
 0x398   :  { %v2484_v18 = vmax.f32 %v2356_v4, 0.0 }
 0x399   :  { %v2485_v35 = vmax.f32 %v2357_v22, 0.0  ;;  %3014 = vmatmul.mubr.bf16.gmra.mrb[168].mxu0 %v5135_v46 }
 0x39a   :  { %v2592_v42 = vpack.c.bf16 %v2484_v18, %v2480_v52  ;;  %3021 = vmatprep.mubr.bf16.mxu0 %v5131_v11  ;;  %v2217_v11 = vrot.slane %v4984_v0, %v5594_v49 }
 0x39b   :  { %v2593_v16 = vpack.c.bf16 %v2485_v35, %v2481_v50  ;;  %v1977_v57 = vpop.f32.mrb[28].mxu1  ;;  %v2237_v35 = vrot.slane %v5548_v41, %v5596_v36 }
 0x39c   :  { %v2360_v26 = vadd.f32 %v2201_v24, %v1977_v57  ;;  %v1979_v63 = vpop.f32.mrb[29].mxu1 }
 0x39d   :  { %v2361_v48 = vadd.f32 %v2205_v32, %v1979_v63  ;;  %v1981_v33 = vpop.f32.mrb[30].mxu1  ;;  %3126 = vmatprep.mubr.bf16.mxu1 %v2593_v16 }
 0x39e   :  { %v2364_v20 = vadd.f32 %v2201_v24, %v1981_v33  ;;  %v1983_v54 = vpop.f32.mrb[31].mxu1  ;;  %3127 = vmatmul.mubr.bf16.gmra.mrb[80].mxu1 %v2592_v42  ;;  %v2488_v25 = vmax.f32 %v2360_v26, 0.0 }
 0x39f   :  { %v2365_v53 = vadd.f32 %v2205_v32, %v1983_v54  ;;  %v2489_v19 = vmax.f32 %v2361_v48, 0.0 }
 0x3a0   :  { %v2492_v40 = vmax.f32 %v2364_v20, 0.0 }
 0x3a1   :  { %v2493_v34 = vmax.f32 %v2365_v53, 0.0  ;;  %3022 = vmatmul.mubr.bf16.gmra.mrb[172].mxu0 %v5137_v3 }
 0x3a2   :  { %v2596_v46 = vpack.c.bf16 %v2492_v40, %v2488_v25  ;;  %3029 = vmatprep.mubr.bf16.mxu0 %v5149_v21 }
 0x3a3   :  { %v2597_v1 = vpack.c.bf16 %v2493_v34, %v2489_v19  ;;  %v1987_v29 = vpop.f32.mrb[32].mxu1 }
 0x3a4   :  { %v2368_v55 = vadd.f32 %v2217_v11, %v1987_v29  ;;  %v1989_v5 = vpop.f32.mrb[33].mxu1 }
 0x3a5   :  { %v2369_v31 = vadd.f32 %v2221_v39, %v1989_v5  ;;  %v1991_v15 = vpop.f32.mrb[34].mxu1  ;;  %3134 = vmatprep.mubr.bf16.mxu1 %v2597_v1 }
 0x3a6   :  { %v2372_v59 = vadd.f32 %v2217_v11, %v1991_v15  ;;  %v1993_v44 = vpop.f32.mrb[35].mxu1  ;;  %3135 = vmatmul.mubr.bf16.gmra.mrb[84].mxu1 %v2596_v46  ;;  %v2496_v38 = vmax.f32 %v2368_v55, 0.0 }
 0x3a7   :  { %v2373_v3 = vadd.f32 %v2221_v39, %v1993_v44  ;;  %v2497_v21 = vmax.f32 %v2369_v31, 0.0  ;;  %v2253_v44 = vrot.slane %v5071_v47, %v5596_v36 }
 0x3a8   :  { %v2500_v10 = vmax.f32 %v2372_v59, 0.0 }
 0x3a9   :  { %v2501_v9 = vmax.f32 %v2373_v3, 0.0  ;;  %3030 = vmatmul.mubr.bf16.gmra.mrb[176].mxu0 %v5159_v60 }
 0x3aa   :  { %v2600_v2 = vpack.c.bf16 %v2500_v10, %v2496_v38  ;;  %3037 = vmatprep.mubr.bf16.mxu0 %v5154_v17  ;;  %v2233_v17 = vrot.slane %v5548_v41, %v5594_v49 }
 0x3ab   :  { %v2601_v24 = vpack.c.bf16 %v2501_v9, %v2497_v21  ;;  %v1997_v0 = vpop.f32.mrb[36].mxu1 }
 0x3ac   :  { %v2376_v13 = vadd.f32 %v2217_v11, %v1997_v0  ;;  %v1999_v62 = vpop.f32.mrb[37].mxu1 }
 0x3ad   :  { %v2377_v32 = vadd.f32 %v2221_v39, %v1999_v62  ;;  %v2001_v23 = vpop.f32.mrb[38].mxu1  ;;  %3142 = vmatprep.mubr.bf16.mxu1 %v2601_v24 }
 0x3ae   :  { %v2380_v12 = vadd.f32 %v2217_v11, %v2001_v23  ;;  %v2003_v27 = vpop.f32.mrb[39].mxu1  ;;  %3143 = vmatmul.mubr.bf16.gmra.mrb[88].mxu1 %v2600_v2  ;;  %v2504_v4 = vmax.f32 %v2376_v13, 0.0 }
 0x3af   :  { %v2381_v30 = vadd.f32 %v2221_v39, %v2003_v27  ;;  %v2505_v22 = vmax.f32 %v2377_v32, 0.0 }
 0x3b0   :  { %v2508_v8 = vmax.f32 %v2380_v12, 0.0 }
 0x3b1   :  { %v2509_v52 = vmax.f32 %v2381_v30, 0.0  ;;  %3038 = vmatmul.mubr.bf16.gmra.mrb[180].mxu0 %v5161_v51 }
 0x3b2   :  { %v2604_v60 = vpack.c.bf16 %v2508_v8, %v2504_v4  ;;  %3045 = vmatprep.mubr.bf16.mxu0 %v5172_v28 }
 0x3b3   :  { %v2605_v18 = vpack.c.bf16 %v2509_v52, %v2505_v22  ;;  %v2007_v50 = vpop.f32.mrb[40].mxu1 }
 0x3b4   :  { %v2384_v42 = vadd.f32 %v2233_v17, %v2007_v50  ;;  %v2009_v16 = vpop.f32.mrb[41].mxu1 }
 0x3b5   :  { %v2385_v57 = vadd.f32 %v2237_v35, %v2009_v16  ;;  %v2011_v26 = vpop.f32.mrb[42].mxu1  ;;  %3150 = vmatprep.mubr.bf16.mxu1 %v2605_v18 }
 0x3b6   :  { %v2388_v63 = vadd.f32 %v2233_v17, %v2011_v26  ;;  %v2013_v48 = vpop.f32.mrb[43].mxu1  ;;  %3151 = vmatmul.mubr.bf16.gmra.mrb[92].mxu1 %v2604_v60  ;;  %v2512_v33 = vmax.f32 %v2384_v42, 0.0  ;;  %v2269_v42 = vrot.slane %v5101_v45, %v5596_v36 }
 0x3b7   :  { %v2389_v51 = vadd.f32 %v2237_v35, %v2013_v48  ;;  %v2513_v28 = vmax.f32 %v2385_v57, 0.0 }
 0x3b8   :  { %v2516_v20 = vmax.f32 %v2388_v63, 0.0 }
 0x3b9   :  { %v2517_v54 = vmax.f32 %v2389_v51, 0.0  ;;  %3046 = vmatmul.mubr.bf16.gmra.mrb[184].mxu0 %v5176_v61 }
 0x3ba   :  { %v2608_v53 = vpack.c.bf16 %v2516_v20, %v2512_v33  ;;  %3053 = vmatprep.mubr.bf16.mxu0 %v5174_v56  ;;  %v2249_v56 = vrot.slane %v5071_v47, %v5594_v49 }
 0x3bb   :  { %v2609_v25 = vpack.c.bf16 %v2517_v54, %v2513_v28  ;;  %v2017_v41 = vpop.f32.mrb[44].mxu1 }
 0x3bc   :  { %v2392_v40 = vadd.f32 %v2233_v17, %v2017_v41  ;;  %v2019_v19 = vpop.f32.mrb[45].mxu1 }
 0x3bd   :  { %v2393_v34 = vadd.f32 %v2237_v35, %v2019_v19  ;;  %v2021_v46 = vpop.f32.mrb[46].mxu1  ;;  %3158 = vmatprep.mubr.bf16.mxu1 %v2609_v25 }
 0x3be   :  { %v2396_v11 = vadd.f32 %v2233_v17, %v2021_v46  ;;  %v2023_v1 = vpop.f32.mrb[47].mxu1  ;;  %3159 = vmatmul.mubr.bf16.gmra.mrb[96].mxu1 %v2608_v53  ;;  %v2520_v39 = vmax.f32 %v2392_v40, 0.0 }
 0x3bf   :  { %v2397_v29 = vadd.f32 %v2237_v35, %v2023_v1  ;;  %v2521_v5 = vmax.f32 %v2393_v34, 0.0 }
 0x3c0   :  { %v2524_v55 = vmax.f32 %v2396_v11, 0.0 }
 0x3c1   :  { %v2525_v31 = vmax.f32 %v2397_v29, 0.0  ;;  %3054 = vmatmul.mubr.bf16.gmra.mrb[188].mxu0 %v5178_v6 }
 0x3c2   :  { %v2612_v61 = vpack.c.bf16 %v2524_v55, %v2520_v39  ;;  %3094 = vmatprep.mubr.bf16.mxu0 %v5190_v43 }
 0x3c3   :  { %v2613_v15 = vpack.c.bf16 %v2525_v31, %v2521_v5  ;;  %v2027_v59 = vpop.f32.mrb[48].mxu1 }
 0x3c4   :  { %v2400_v3 = vadd.f32 %v2249_v56, %v2027_v59  ;;  %v2029_v38 = vpop.f32.mrb[49].mxu1  ;;  %v2285_v59 = vrot.slane %v5128_v37, %v5596_v36 }
 0x3c5   :  { %v2401_v10 = vadd.f32 %v2253_v44, %v2029_v38  ;;  %v2031_v21 = vpop.f32.mrb[50].mxu1  ;;  %3166 = vmatprep.mubr.bf16.mxu1 %v2613_v15 }
 0x3c6   :  { %v2404_v9 = vadd.f32 %v2249_v56, %v2031_v21  ;;  %v2033_v2 = vpop.f32.mrb[51].mxu1  ;;  %3167 = vmatmul.mubr.bf16.gmra.mrb[100].mxu1 %v2612_v61  ;;  %v2528_v24 = vmax.f32 %v2400_v3, 0.0  ;;  %v2281_v61 = vrot.slane %v5128_v37, %v5594_v49 }
 0x3c7   :  { %v2405_v6 = vadd.f32 %v2253_v44, %v2033_v2  ;;  %v2529_v43 = vmax.f32 %v2401_v10, 0.0 }
 0x3c8   :  { %v2532_v0 = vmax.f32 %v2404_v9, 0.0 }
 0x3c9   :  { %v2533_v13 = vmax.f32 %v2405_v6, 0.0  ;;  %3095 = vmatmul.mubr.bf16.vlgmr.msra.gmra.mrb[192].mxu0 %v5187_v14 }
 0x3ca   :  { %v2616_v62 = vpack.c.bf16 %v2532_v0, %v2528_v24  ;;  %3102 = vmatprep.mubr.bf16.mxu0 %v5198_v7  ;;  %v2265_v7 = vrot.slane %v5101_v45, %v5594_v49 }
 0x3cb   :  { %v2617_v32 = vpack.c.bf16 %v2533_v13, %v2529_v43  ;;  %v2037_v47 = vpop.f32.mrb[52].mxu1 }
 0x3cc   :  { %v2408_v23 = vadd.f32 %v2249_v56, %v2037_v47  ;;  %v2039_v12 = vpop.f32.mrb[53].mxu1 }
 0x3cd   :  { %v2409_v27 = vadd.f32 %v2253_v44, %v2039_v12  ;;  %v2041_v30 = vpop.f32.mrb[54].mxu1  ;;  %3174 = vmatprep.mubr.bf16.mxu1 %v2617_v32 }
 0x3ce   :  { %v2412_v4 = vadd.f32 %v2249_v56, %v2041_v30  ;;  %v2043_v8 = vpop.f32.mrb[55].mxu1  ;;  %3175 = vmatmul.mubr.bf16.gmra.mrb[104].mxu1 %v2616_v62  ;;  %v2536_v52 = vmax.f32 %v2408_v23, 0.0 }
 0x3cf   :  { %v2413_v22 = vadd.f32 %v2253_v44, %v2043_v8  ;;  %v2537_v17 = vmax.f32 %v2409_v27, 0.0 }
 0x3d0   :  { %v2540_v60 = vmax.f32 %v2412_v4, 0.0 }
 0x3d1   :  { %v2541_v18 = vmax.f32 %v2413_v22, 0.0  ;;  %3103 = vmatmul.mubr.bf16.gmra.mrb[196].mxu0 %v5193_v58 }
 0x3d2   :  { %v2620_v14 = vpack.c.bf16 %v2540_v60, %v2536_v52 }
 0x3d3   :  { %v2621_v50 = vpack.c.bf16 %v2541_v18, %v2537_v17  ;;  %v2047_v35 = vpop.f32.mrb[56].mxu1 }
 0x3d4   :  { %v2416_v16 = vadd.f32 %v2265_v7, %v2047_v35  ;;  %v2049_v57 = vpop.f32.mrb[57].mxu1 }
 0x3d5   :  { %v2417_v26 = vadd.f32 %v2269_v42, %v2049_v57  ;;  %v2051_v63 = vpop.f32.mrb[58].mxu1  ;;  %3182 = vmatprep.mubr.bf16.mxu1 %v2621_v50 }
 0x3d6   :  { %v2420_v48 = vadd.f32 %v2265_v7, %v2051_v63  ;;  %v2053_v51 = vpop.f32.mrb[59].mxu1  ;;  %3183 = vmatmul.mubr.bf16.gmra.mrb[108].mxu1 %v2620_v14  ;;  %v2544_v20 = vmax.f32 %v2416_v16, 0.0 }
 0x3d7   :  { %v2421_v33 = vadd.f32 %v2269_v42, %v2053_v51  ;;  %v2545_v28 = vmax.f32 %v2417_v26, 0.0 }
 0x3d8   :  { %v2548_v58 = vmax.f32 %v2420_v48, 0.0 }
 0x3d9   :  { %v2549_v54 = vmax.f32 %v2421_v33, 0.0 }
 0x3da   :  { %v2624_v53 = vpack.c.bf16 %v2548_v58, %v2544_v20 }
 0x3db   :  { %v2625_v25 = vpack.c.bf16 %v2549_v54, %v2545_v28  ;;  %v2057_v41 = vpop.f32.mrb[60].mxu1 }
 0x3dc   :  { %v2424_v40 = vadd.f32 %v2265_v7, %v2057_v41  ;;  %v2059_v19 = vpop.f32.mrb[61].mxu1 }
 0x3dd   :  { %v2425_v34 = vadd.f32 %v2269_v42, %v2059_v19  ;;  %v2061_v45 = vpop.f32.mrb[62].mxu1  ;;  %3190 = vmatprep.mubr.bf16.mxu1 %v2625_v25 }
 0x3de   :  { %v2428_v46 = vadd.f32 %v2265_v7, %v2061_v45  ;;  %v2063_v11 = vpop.f32.mrb[63].mxu1  ;;  %3191 = vmatmul.mubr.bf16.gmra.mrb[112].mxu1 %v2624_v53  ;;  %v2552_v29 = vmax.f32 %v2424_v40, 0.0 }
 0x3df   :  { %v2429_v1 = vadd.f32 %v2269_v42, %v2063_v11  ;;  %v2553_v55 = vmax.f32 %v2425_v34, 0.0 }
 0x3e0   :  { %v2556_v39 = vmax.f32 %v2428_v46, 0.0 }
 0x3e1   :  { %v2557_v5 = vmax.f32 %v2429_v1, 0.0 }
 0x3e2   :  { %v2628_v31 = vpack.c.bf16 %v2556_v39, %v2552_v29 }
 0x3e3   :  { %v2629_v56 = vpack.c.bf16 %v2557_v5, %v2553_v55  ;;  %v2067_v15 = vpop.f32.mrb[64].mxu1 }
 0x3e4   :  { %v2432_v44 = vadd.f32 %v2281_v61, %v2067_v15  ;;  %v2069_v3 = vpop.f32.mrb[65].mxu1 }
 0x3e5   :  { %v2433_v38 = vadd.f32 %v2285_v59, %v2069_v3  ;;  %v2071_v10 = vpop.f32.mrb[66].mxu1  ;;  %3198 = vmatprep.mubr.bf16.mxu1 %v2629_v56 }
 0x3e6   :  { %v2436_v21 = vadd.f32 %v2281_v61, %v2071_v10  ;;  %v2073_v9 = vpop.f32.mrb[67].mxu1  ;;  %3199 = vmatmul.mubr.bf16.gmra.mrb[116].mxu1 %v2628_v31  ;;  %v2560_v6 = vmax.f32 %v2432_v44, 0.0 }
 0x3e7   :  { %v2437_v2 = vadd.f32 %v2285_v59, %v2073_v9  ;;  %v2561_v0 = vmax.f32 %v2433_v38, 0.0 }
 0x3e8   :  { %v2564_v24 = vmax.f32 %v2436_v21, 0.0 }
 0x3e9   :  { %v2565_v43 = vmax.f32 %v2437_v2, 0.0 }
 0x3ea   :  { %v2632_v13 = vpack.c.bf16 %v2564_v24, %v2560_v6 }
 0x3eb   :  { %v2633_v49 = vpack.c.bf16 %v2565_v43, %v2561_v0  ;;  %v2077_v62 = vpop.f32.mrb[68].mxu1 }
 0x3ec   :  { %v2440_v32 = vadd.f32 %v2281_v61, %v2077_v62  ;;  %v2079_v47 = vpop.f32.mrb[69].mxu1 }
 0x3ed   :  { %v2441_v23 = vadd.f32 %v2285_v59, %v2079_v47  ;;  %v2081_v37 = vpop.f32.mrb[70].mxu1  ;;  %3206 = vmatprep.mubr.bf16.mxu1 %v2633_v49 }
 0x3ee   :  { %v2444_v36 = vadd.f32 %v2281_v61, %v2081_v37  ;;  %v2083_v12 = vpop.f32.mrb[71].mxu1  ;;  %3207 = vmatmul.mubr.bf16.gmra.mrb[120].mxu1 %v2632_v13  ;;  %v2568_v30 = vmax.f32 %v2440_v32, 0.0 }
 0x3ef   :  { %v2445_v27 = vadd.f32 %v2285_v59, %v2083_v12  ;;  %v2569_v8 = vmax.f32 %v2441_v23, 0.0 }
 0x3f0   :  { %v2572_v4 = vmax.f32 %v2444_v36, 0.0  ;;  %v5273_v36 = vld [vmem:[#allocation14] ss:$0 sm:$0xff] }
 0x3f1   :  { %v2573_v22 = vmax.f32 %v2445_v27, 0.0 }
 0x3f2   :  { %v2636_v52 = vpack.c.bf16 %v2572_v4, %v2568_v30 }
 0x3f3   :  { %v2637_v60 = vpack.c.bf16 %v2573_v22, %v2569_v8 }
 0x3f5   :  { %3214 = vmatprep.mubr.bf16.mxu1 %v2637_v60 }
 0x3f6   :  { %3215 = vmatmul.mubr.bf16.gmra.mrb[124].mxu1 %v2636_v52 }
 0x41c   :  { %v3573_v17 = vpop.f32.mrb[128].mxu0 }
 0x41d   :  { %v3574_v18 = vpop.f32.mrb[129].mxu0 }
 0x41e   :  { %v5245_v14 = vadd.f32 %v3574_v18, %v3573_v17  ;;  %v3576_v7 = vpop.f32.mrb[130].mxu0 }
 0x41f   :  { %v3577_v50 = vpop.f32.mrb[131].mxu0 }
 0x420   :  { %v5247_v35 = vadd.f32 %v3577_v50, %v3576_v7 }
 0x424   :  { %v3579_v42 = vpop.f32.mrb[132].mxu0 }
 0x425   :  { %v3580_v16 = vpop.f32.mrb[133].mxu0 }
 0x426   :  { %v5249_v57 = vadd.f32 %v3580_v16, %v3579_v42  ;;  %v3582_v26 = vpop.f32.mrb[134].mxu0 }
 0x427   :  { %v3583_v63 = vpop.f32.mrb[135].mxu0 }
 0x428   :  { %v5251_v48 = vadd.f32 %v3583_v63, %v3582_v26 }
 0x42c   :  { %v3585_v51 = vpop.f32.mrb[136].mxu0 }
 0x42d   :  { %v3586_v33 = vpop.f32.mrb[137].mxu0 }
 0x42e   :  { %v3587_v20 = vadd.f32 %v3586_v33, %v3585_v51  ;;  %v3588_v58 = vpop.f32.mrb[138].mxu0 }
 0x42f   :  { %v3589_v28 = vpop.f32.mrb[139].mxu0 }
 0x430   :  { %v3590_v54 = vadd.f32 %v3589_v28, %v3588_v58  ;;  %v2952_v27 = vadd.f32 %v3587_v20, %v5273_v36 }
 0x432   :  { %v2955_v52 = vadd.f32 %v3590_v54, %v5273_v36 }
 0x434   :  { %v3591_v53 = vpop.f32.mrb[140].mxu0 }
 0x435   :  { %v3592_v25 = vpop.f32.mrb[141].mxu0 }
 0x436   :  { %v3593_v41 = vadd.f32 %v3592_v25, %v3591_v53  ;;  %v3594_v40 = vpop.f32.mrb[142].mxu0 }
 0x437   :  { %v3595_v19 = vpop.f32.mrb[143].mxu0 }
 0x438   :  { %v3596_v34 = vadd.f32 %v3595_v19, %v3594_v40  ;;  %v2960_v28 = vadd.f32 %v3593_v41, %v5273_v36 }
 0x43a   :  { %v2963_v19 = vadd.f32 %v3596_v34, %v5273_v36 }
 0x43c   :  { %v3597_v45 = vpop.f32.mrb[144].mxu0 }
 0x43d   :  { %v3598_v46 = vpop.f32.mrb[145].mxu0 }
 0x43e   :  { %v5253_v11 = vadd.f32 %v3598_v46, %v3597_v45  ;;  %v3600_v1 = vpop.f32.mrb[146].mxu0 }
 0x43f   :  { %v3601_v29 = vpop.f32.mrb[147].mxu0 }
 0x440   :  { %v5255_v39 = vadd.f32 %v3601_v29, %v3600_v1  ;;  %v2968_v34 = vadd.f32 %v5253_v11, %v5273_v36 }
 0x444   :  { %v3603_v55 = vpop.f32.mrb[148].mxu0 }
 0x445   :  { %v3604_v5 = vpop.f32.mrb[149].mxu0 }
 0x446   :  { %v5257_v31 = vadd.f32 %v3604_v5, %v3603_v55  ;;  %v3606_v61 = vpop.f32.mrb[150].mxu0 }
 0x447   :  { %v3607_v56 = vpop.f32.mrb[151].mxu0 }
 0x448   :  { %v5259_v15 = vadd.f32 %v3607_v56, %v3606_v61 }
 0x44c   :  { %v3609_v59 = vpop.f32.mrb[152].mxu0 }
 0x44d   :  { %v3610_v44 = vpop.f32.mrb[153].mxu0 }
 0x44e   :  { %v5261_v3 = vadd.f32 %v3610_v44, %v3609_v59  ;;  %v3612_v38 = vpop.f32.mrb[154].mxu0 }
 0x44f   :  { %v3613_v10 = vpop.f32.mrb[155].mxu0 }
 0x450   :  { %v5263_v21 = vadd.f32 %v3613_v10, %v3612_v38 }
 0x454   :  { %v3615_v9 = vpop.f32.mrb[156].mxu0 }
 0x455   :  { %v3616_v2 = vpop.f32.mrb[157].mxu0 }
 0x456   :  { %v5265_v6 = vadd.f32 %v3616_v2, %v3615_v9  ;;  %v3618_v24 = vpop.f32.mrb[158].mxu0 }
 0x457   :  { %v3619_v0 = vpop.f32.mrb[159].mxu0 }
 0x458   :  { %v5267_v43 = vadd.f32 %v3619_v0, %v3618_v24 }
 0x45c   :  { %v3621_v13 = vpop.f32.mrb[160].mxu0 }
 0x45d   :  { %v3622_v49 = vpop.f32.mrb[161].mxu0 }
 0x45e   :  { %v5269_v62 = vadd.f32 %v3622_v49, %v3621_v13  ;;  %v3624_v32 = vpop.f32.mrb[162].mxu0  ;;  %v2971_v49 = vadd.f32 %v5255_v39, %v5273_v36  ;;  %v2976_v39 = vadd.f32 %v5257_v31, %v5273_v36 }
 0x45f   :  { %v3625_v47 = vpop.f32.mrb[163].mxu0 }
 0x460   :  { %v5271_v23 = vadd.f32 %v3625_v47, %v3624_v32 }
 0x461   :  { %v3697_v37 = vpop.f32.mrb[72].mxu1 }
 0x462   :  { %v3698_v12 = vpop.f32.mrb[73].mxu1 }
 0x463   :  { %v3699_v30 = vadd.f32 %v3698_v12, %v3697_v37  ;;  %v3700_v4 = vpop.f32.mrb[74].mxu1 }
 0x464   :  { %v3627_v8 = vpop.f32.mrb[164].mxu0  ;;  %v3701_v22 = vpop.f32.mrb[75].mxu1 }
 0x465   :  { %v3113_v60 = vadd.f32 %v3699_v30, %v2952_v27  ;;  %v3628_v17 = vpop.f32.mrb[165].mxu0  ;;  %v3702_v18 = vadd.f32 %v3701_v22, %v3700_v4 }
 0x466   :  { %v5277_v7 = vadd.f32 %v3628_v17, %v3627_v8  ;;  %v3630_v50 = vpop.f32.mrb[166].mxu0 }
 0x467   :  { %v3116_v42 = vadd.f32 %v3702_v18, %v2955_v52  ;;  %v3631_v16 = vpop.f32.mrb[167].mxu0  ;;  %v3237_v63 = vsel %vm3223_vm7, %v3113_v60, -inf }
 0x468   :  { %v5279_v26 = vadd.f32 %v3631_v16, %v3630_v50 }
 0x469   :  { %v3238_v51 = vsel %vm3223_vm7, %v3116_v42, -inf  ;;  %v3703_v33 = vpop.f32.mrb[76].mxu1 }
 0x46a   :  { %v3239_v20 = vmax.f32 %v3237_v63, %v3238_v51  ;;  %v3704_v58 = vpop.f32.mrb[77].mxu1  ;;  %v2979_v63 = vadd.f32 %v5259_v15, %v5273_v36  ;;  %v2984_v15 = vadd.f32 %v5261_v3, %v5273_v36 }
 0x46b   :  { %v3705_v54 = vadd.f32 %v3704_v58, %v3703_v33  ;;  %v3706_v53 = vpop.f32.mrb[78].mxu1 }
 0x46c   :  { %v3633_v25 = vpop.f32.mrb[168].mxu0  ;;  %v3707_v40 = vpop.f32.mrb[79].mxu1 }
 0x46d   :  { %v3121_v45 = vadd.f32 %v3705_v54, %v2960_v28  ;;  %v3634_v46 = vpop.f32.mrb[169].mxu0  ;;  %v3708_v1 = vadd.f32 %v3707_v40, %v3706_v53 }
 0x46e   :  { %v5285_v29 = vadd.f32 %v3634_v46, %v3633_v25  ;;  %v3636_v55 = vpop.f32.mrb[170].mxu0 }
 0x46f   :  { %v3240_v5 = vsel %vm3223_vm7, %v3121_v45, -inf  ;;  %v3124_v61 = vadd.f32 %v3708_v1, %v2963_v19  ;;  %v3637_v56 = vpop.f32.mrb[171].mxu0 }
 0x470   :  { %v3241_v59 = vmax.f32 %v3239_v20, %v3240_v5  ;;  %v5288_v44 = vadd.f32 %v3637_v56, %v3636_v55 }
 0x471   :  { %v3242_v41 = vsel %vm3223_vm7, %v3124_v61, -inf  ;;  %v3709_v38 = vpop.f32.mrb[80].mxu1 }
 0x472   :  { %v5291_v10 = vmax.f32 %v3241_v59, %v3242_v41  ;;  %v3710_v9 = vpop.f32.mrb[81].mxu1  ;;  %v2987_v59 = vadd.f32 %v5263_v21, %v5273_v36  ;;  %v2992_v21 = vadd.f32 %v5265_v6, %v5273_v36 }
 0x473   :  { %v3711_v2 = vadd.f32 %v3710_v9, %v3709_v38  ;;  %v3712_v24 = vpop.f32.mrb[82].mxu1 }
 0x474   :  { %v3639_v0 = vpop.f32.mrb[172].mxu0  ;;  %v3713_v13 = vpop.f32.mrb[83].mxu1 }
 0x475   :  { %v3129_v32 = vadd.f32 %v3711_v2, %v2968_v34  ;;  %v3640_v47 = vpop.f32.mrb[173].mxu0  ;;  %v3714_v37 = vadd.f32 %v3713_v13, %v3712_v24 }
 0x476   :  { %v5297_v12 = vadd.f32 %v3640_v47, %v3639_v0  ;;  %v3642_v27 = vpop.f32.mrb[174].mxu0 }
 0x477   :  { %v3132_v30 = vadd.f32 %v3714_v37, %v2971_v49  ;;  %v3643_v4 = vpop.f32.mrb[175].mxu0  ;;  %v3250_v22 = vsel %vm3223_vm7, %v3129_v32, -inf }
 0x478   :  { %v5299_v8 = vadd.f32 %v3643_v4, %v3642_v27 }
 0x479   :  { %v3251_v11 = vsel %vm3223_vm7, %v3132_v30, -inf  ;;  %v3715_v52 = vpop.f32.mrb[84].mxu1 }
 0x47a   :  { %v3252_v60 = vmax.f32 %v3250_v22, %v3251_v11  ;;  %v3716_v17 = vpop.f32.mrb[85].mxu1  ;;  %v2995_v11 = vadd.f32 %v5267_v43, %v5273_v36  ;;  %v3000_v43 = vadd.f32 %v5269_v62, %v5273_v36 }
 0x47b   :  { %v3717_v18 = vadd.f32 %v3716_v17, %v3715_v52  ;;  %v3718_v50 = vpop.f32.mrb[86].mxu1 }
 0x47c   :  { %v3645_v42 = vpop.f32.mrb[176].mxu0  ;;  %v3719_v16 = vpop.f32.mrb[87].mxu1 }
 0x47d   :  { %v3137_v51 = vadd.f32 %v3717_v18, %v2976_v39  ;;  %v3646_v33 = vpop.f32.mrb[177].mxu0  ;;  %v3720_v20 = vadd.f32 %v3719_v16, %v3718_v50 }
 0x47e   :  { %v5307_v58 = vadd.f32 %v3646_v33, %v3645_v42  ;;  %v3648_v28 = vpop.f32.mrb[178].mxu0 }
 0x47f   :  { %v3253_v54 = vsel %vm3223_vm7, %v3137_v51, -inf  ;;  %v3140_v53 = vadd.f32 %v3720_v20, %v2979_v63  ;;  %v3649_v25 = vpop.f32.mrb[179].mxu0 }
 0x480   :  { %v3254_v40 = vmax.f32 %v3252_v60, %v3253_v54  ;;  %v5310_v19 = vadd.f32 %v3649_v25, %v3648_v28 }
 0x481   :  { %v3255_v31 = vsel %vm3223_vm7, %v3140_v53, -inf  ;;  %v3721_v45 = vpop.f32.mrb[88].mxu1 }
 0x482   :  { %v5313_v46 = vmax.f32 %v3254_v40, %v3255_v31  ;;  %v3722_v1 = vpop.f32.mrb[89].mxu1  ;;  %v3003_v31 = vadd.f32 %v5271_v23, %v5273_v36  ;;  %v3008_v23 = vadd.f32 %v5277_v7, %v5273_v36  ;;  %v2939_v7 = vadd.f32 %v5247_v35, %v5273_v36 }
 0x483   :  { %v3723_v55 = vadd.f32 %v3722_v1, %v3721_v45  ;;  %v3724_v5 = vpop.f32.mrb[90].mxu1 }
 0x484   :  { %v3651_v61 = vpop.f32.mrb[180].mxu0  ;;  %v3725_v56 = vpop.f32.mrb[91].mxu1 }
 0x485   :  { %v3145_v41 = vadd.f32 %v3723_v55, %v2984_v15  ;;  %v3652_v38 = vpop.f32.mrb[181].mxu0  ;;  %v3726_v9 = vadd.f32 %v3725_v56, %v3724_v5 }
 0x486   :  { %v5319_v34 = vadd.f32 %v3652_v38, %v3651_v61  ;;  %v3654_v2 = vpop.f32.mrb[182].mxu0 }
 0x487   :  { %v3148_v24 = vadd.f32 %v3726_v9, %v2987_v59  ;;  %v3655_v0 = vpop.f32.mrb[183].mxu0  ;;  %v3263_v49 = vsel %vm3223_vm7, %v3145_v41, -inf }
 0x488   :  { %v5321_v13 = vadd.f32 %v3655_v0, %v3654_v2 }
 0x489   :  { %v3264_v3 = vsel %vm3223_vm7, %v3148_v24, -inf  ;;  %v3727_v32 = vpop.f32.mrb[92].mxu1 }
 0x48a   :  { %v3265_v47 = vmax.f32 %v3263_v49, %v3264_v3  ;;  %v3728_v37 = vpop.f32.mrb[93].mxu1 }
 0x48b   :  { %v3729_v27 = vadd.f32 %v3728_v37, %v3727_v32  ;;  %v3730_v30 = vpop.f32.mrb[94].mxu1  ;;  %v3011_v32 = vadd.f32 %v5279_v26, %v5273_v36 }
 0x48c   :  { %v3657_v4 = vpop.f32.mrb[184].mxu0  ;;  %v3731_v22 = vpop.f32.mrb[95].mxu1 }
 0x48d   :  { %v3153_v52 = vadd.f32 %v3729_v27, %v2992_v21  ;;  %v3658_v60 = vpop.f32.mrb[185].mxu0  ;;  %v3732_v17 = vadd.f32 %v3731_v22, %v3730_v30  ;;  %v2936_v27 = vadd.f32 %v5245_v14, %v5273_v36  ;;  %v3016_v14 = vadd.f32 %v5285_v29, %v5273_v36 }
 0x48e   :  { %v5329_v39 = vadd.f32 %v3658_v60, %v3657_v4  ;;  %v3660_v18 = vpop.f32.mrb[186].mxu0  ;;  %v2944_v29 = vadd.f32 %v5249_v57, %v5273_v36 }
 0x48f   :  { %v3266_v50 = vsel %vm3223_vm7, %v3153_v52, -inf  ;;  %v3156_v42 = vadd.f32 %v3732_v17, %v2995_v11  ;;  %v3661_v16 = vpop.f32.mrb[187].mxu0 }
 0x490   :  { %v3267_v63 = vmax.f32 %v3265_v47, %v3266_v50  ;;  %v5332_v51 = vadd.f32 %v3661_v16, %v3660_v18 }
 0x491   :  { %v3268_v6 = vsel %vm3223_vm7, %v3156_v42, -inf  ;;  %v3733_v33 = vpop.f32.mrb[96].mxu1 }
 0x492   :  { %v5335_v20 = vmax.f32 %v3267_v63, %v3268_v6  ;;  %v3734_v28 = vpop.f32.mrb[97].mxu1 }
 0x493   :  { %v3735_v54 = vadd.f32 %v3734_v28, %v3733_v33  ;;  %v3736_v53 = vpop.f32.mrb[98].mxu1  ;;  %v3244_v28 = vrot.slane %v5291_v10, 4 }
 0x494   :  { %v3663_v25 = vpop.f32.mrb[188].mxu0  ;;  %v3737_v40 = vpop.f32.mrb[99].mxu1 }
 0x495   :  { %v3161_v45 = vadd.f32 %v3735_v54, %v3000_v43  ;;  %v3664_v1 = vpop.f32.mrb[189].mxu0  ;;  %v3738_v15 = vadd.f32 %v3737_v40, %v3736_v53 }
 0x496   :  { %v5341_v55 = vadd.f32 %v3664_v1, %v3663_v25  ;;  %v3666_v5 = vpop.f32.mrb[190].mxu0  ;;  %v3019_v25 = vadd.f32 %v5288_v44, %v5273_v36  ;;  %v3245_v44 = vmax.f32 %v5291_v10, %v3244_v28 }
 0x497   :  { %v3164_v61 = vadd.f32 %v3738_v15, %v3003_v31  ;;  %v3667_v56 = vpop.f32.mrb[191].mxu0  ;;  %v3276_v41 = vsel %vm3223_vm7, %v3161_v45, -inf  ;;  %v3257_v15 = vrot.slane %v5313_v46, 4 }
 0x498   :  { %v5343_v59 = vadd.f32 %v3667_v56, %v3666_v5  ;;  %v2947_v56 = vadd.f32 %v5251_v48, %v5273_v36 }
 0x499   :  { %v3277_v62 = vsel %vm3223_vm7, %v3164_v61, -inf  ;;  %v3739_v38 = vpop.f32.mrb[100].mxu1 }
 0x49a   :  { %v3278_v9 = vmax.f32 %v3276_v41, %v3277_v62  ;;  %v3740_v2 = vpop.f32.mrb[101].mxu1  ;;  %v3270_v41 = vrot.slane %v5335_v20, 4 }
 0x49b   :  { %v3741_v24 = vadd.f32 %v3740_v2, %v3739_v38  ;;  %v3742_v0 = vpop.f32.mrb[102].mxu1 }
 0x49c   :  { %v3685_v49 = vpop.f32.mrb[192].mxu0  ;;  %v3743_v3 = vpop.f32.mrb[103].mxu1  ;;  %v3271_v10 = vmax.f32 %v5335_v20, %v3270_v41 }
 0x49d   :  { %v3169_v47 = vadd.f32 %v3741_v24, %v3008_v23  ;;  %v3686_v37 = vpop.f32.mrb[193].mxu0  ;;  %v3744_v21 = vadd.f32 %v3743_v3, %v3742_v0 }
 0x49e   :  { %v3687_v30 = vadd.f32 %v3686_v37, %v3685_v49  ;;  %v3688_v4 = vpop.f32.mrb[194].mxu0  ;;  %v3258_v49 = vmax.f32 %v5313_v46, %v3257_v15  ;;  %v3024_v37 = vadd.f32 %v5297_v12, %v5273_v36  ;;  %v3027_v46 = vadd.f32 %v5299_v8, %v5273_v36 }
 0x49f   :  { %v3279_v22 = vsel %vm3223_vm7, %v3169_v47, -inf  ;;  %v3172_v11 = vadd.f32 %v3744_v21, %v3011_v32  ;;  %v3689_v52 = vpop.f32.mrb[195].mxu0  ;;  %v3032_v8 = vadd.f32 %v5307_v58, %v5273_v36  ;;  %v3035_v15 = vadd.f32 %v5310_v19, %v5273_v36 }
 0x4a0   :  { %v3280_v60 = vmax.f32 %v3278_v9, %v3279_v22  ;;  %v3097_v17 = vadd.f32 %v3687_v30, %v2936_v27  ;;  %v3690_v18 = vadd.f32 %v3689_v52, %v3688_v4  ;;  %v3246_v4 = vrot.slane %v3245_v44, 2 }
 0x4a1   :  { %v3281_v26 = vsel %vm3223_vm7, %v3172_v11, -inf  ;;  %v3745_v50 = vpop.f32.mrb[104].mxu1 }
 0x4a2   :  { %v3282_v42 = vmax.f32 %v3280_v60, %v3281_v26  ;;  %v3100_v16 = vadd.f32 %v3690_v18, %v2939_v7  ;;  %v3746_v63 = vpop.f32.mrb[105].mxu1  ;;  %v3224_v43 = vsel %vm3223_vm7, %v3097_v17, -inf  ;;  %v3259_v18 = vrot.slane %v3258_v49, 2 }
 0x4a3   :  { %v3747_v6 = vadd.f32 %v3746_v63, %v3745_v50  ;;  %v3748_v33 = vpop.f32.mrb[106].mxu1  ;;  %v3272_v26 = vrot.slane %v3271_v10, 2 }
 0x4a4   :  { %v3225_v35 = vsel %vm3223_vm7, %v3100_v16, -inf  ;;  %v3691_v54 = vpop.f32.mrb[196].mxu0  ;;  %v3749_v53 = vpop.f32.mrb[107].mxu1  ;;  %v3283_v9 = vrot.slane %v3282_v42, 4  ;;  %v3247_v16 = vmax.f32 %v3245_v44, %v3246_v4  ;;  %v3260_v28 = vmax.f32 %v3258_v49, %v3259_v18 }
 0x4a5   :  { %v3226_v40 = vmax.f32 %v3224_v43, %v3225_v35  ;;  %v3177_v31 = vadd.f32 %v3747_v6, %v3016_v14  ;;  %v3692_v45 = vpop.f32.mrb[197].mxu0  ;;  %v3750_v1 = vadd.f32 %v3749_v53, %v3748_v33 }
 0x4a6   :  { %v3693_v5 = vadd.f32 %v3692_v45, %v3691_v54  ;;  %v3694_v61 = vpop.f32.mrb[198].mxu0  ;;  %v3284_v22 = vmax.f32 %v3282_v42, %v3283_v9  ;;  %v3273_v54 = vmax.f32 %v3271_v10, %v3272_v26  ;;  %v3261_v41 = vrot.slane %v3260_v28, 1 }
 0x4a7   :  { %v3180_v62 = vadd.f32 %v3750_v1, %v3019_v25  ;;  %v3695_v38 = vpop.f32.mrb[199].mxu0  ;;  %v3289_v24 = vsel %vm3223_vm7, %v3177_v31, -inf  ;;  %v3248_v31 = vrot.slane %v3247_v16, 1 }
 0x4a8   :  { %v3105_v2 = vadd.f32 %v3693_v5, %v2944_v29  ;;  %v3696_v23 = vadd.f32 %v3695_v38, %v3694_v61  ;;  %v3285_v63 = vrot.slane %v3284_v22, 2  ;;  %v3274_v38 = vrot.slane %v3273_v54, 1 }
 0x4a9   :  { %v3290_v57 = vsel %vm3223_vm7, %v3180_v62, -inf  ;;  %v3751_v0 = vpop.f32.mrb[108].mxu1 }
 0x4aa   :  { %v3227_v3 = vsel %vm3223_vm7, %v3105_v2, -inf  ;;  %v3291_v32 = vmax.f32 %v3289_v24, %v3290_v57  ;;  %v3108_v48 = vadd.f32 %v3696_v23, %v2947_v56  ;;  %v3752_v47 = vpop.f32.mrb[109].mxu1  ;;  %v3286_v45 = vmax.f32 %v3284_v22, %v3285_v63 }
 0x4ab   :  { %v3228_v21 = vmax.f32 %v3226_v40, %v3227_v3  ;;  %v3753_v27 = vadd.f32 %v3752_v47, %v3751_v0  ;;  %v3754_v30 = vpop.f32.mrb[110].mxu1  ;;  %v3249_v23 = vmax.f32 %v3247_v16, %v3248_v31  ;;  %v3262_v3 = vmax.f32 %v3260_v28, %v3261_v41 }
 0x4ac   :  { %v3229_v11 = vsel %vm3223_vm7, %v3108_v48, -inf  ;;  %v3755_v52 = vpop.f32.mrb[111].mxu1  ;;  %v3287_v58 = vrot.slane %v3286_v45, 1  ;;  %v3040_v47 = vadd.f32 %v5319_v34, %v5273_v36  ;;  %v3059_v41 = vadd.f32 %v5343_v59, %v5273_v36 }
 0x4ad   :  { %v3230_v7 = vmax.f32 %v3228_v21, %v3229_v11  ;;  %v3185_v60 = vadd.f32 %v3753_v27, %v3024_v37  ;;  %v3756_v17 = vadd.f32 %v3755_v52, %v3754_v30  ;;  %v3275_v37 = vmax.f32 %v3273_v54, %v3274_v38 }
 0x4ae   :  { %v3288_v30 = vmax.f32 %v3286_v45, %v3287_v58  ;;  %v3043_v52 = vadd.f32 %v5321_v13, %v5273_v36  ;;  %v3048_v13 = vadd.f32 %v5329_v39, %v5273_v36 }
 0x4af   :  { %v3231_v50 = vrot.slane %v3230_v7, 4  ;;  %v3292_v12 = vsel %vm3223_vm7, %v3185_v60, -inf  ;;  %v3188_v20 = vadd.f32 %v3756_v17, %v3027_v46 }
 0x4b0   :  { %v3293_v14 = vmax.f32 %v3291_v32, %v3292_v12 }
 0x4b1   :  { %v3232_v6 = vmax.f32 %v3230_v7, %v3231_v50  ;;  %v3294_v42 = vsel %vm3223_vm7, %v3188_v20, -inf  ;;  %v3757_v33 = vpop.f32.mrb[112].mxu1 }
 0x4b2   :  { %v3295_v43 = vmax.f32 %v3293_v14, %v3294_v42  ;;  %v3758_v35 = vpop.f32.mrb[113].mxu1 }
 0x4b3   :  { %v3233_v53 = vrot.slane %v3232_v6, 2  ;;  %v3759_v25 = vadd.f32 %v3758_v35, %v3757_v33  ;;  %v3760_v40 = vpop.f32.mrb[114].mxu1 }
 0x4b4   :  { %v3296_v1 = vrot.slane %v3295_v43, 4  ;;  %v3761_v29 = vpop.f32.mrb[115].mxu1 }
 0x4b5   :  { %v3234_v5 = vmax.f32 %v3232_v6, %v3233_v53  ;;  %v3193_v61 = vadd.f32 %v3759_v25, %v3032_v8  ;;  %v3762_v56 = vadd.f32 %v3761_v29, %v3760_v40 }
 0x4b6   :  { %v3297_v62 = vmax.f32 %v3295_v43, %v3296_v1  ;;  %v3051_v43 = vadd.f32 %v5332_v51, %v5273_v36 }
 0x4b7   :  { %v3235_v44 = vrot.slane %v3234_v5, 1  ;;  %v3196_v9 = vadd.f32 %v3762_v56, %v3035_v15  ;;  %v3302_v57 = vsel %vm3223_vm7, %v3193_v61, -inf  ;;  %v3056_v15 = vadd.f32 %v5341_v55, %v5273_v36 }
 0x4b8   :  { %v3298_v2 = vrot.slane %v3297_v62, 2 }
 0x4b9   :  { %v3236_v24 = vmax.f32 %v3234_v5, %v3235_v44  ;;  %v3303_v0 = vsel %vm3223_vm7, %v3196_v9, -inf  ;;  %v3763_v49 = vpop.f32.mrb[116].mxu1 }
 0x4ba   :  { %v3299_v32 = vmax.f32 %v3297_v62, %v3298_v2  ;;  %v3304_v19 = vmax.f32 %v3302_v57, %v3303_v0  ;;  %v3764_v48 = vpop.f32.mrb[117].mxu1 }
 0x4bb   :  { %v3336_v10 = vsel %vm889_vm0, %v3249_v23, %v3236_v24  ;;  %v3765_v21 = vadd.f32 %v3764_v48, %v3763_v49  ;;  %v3766_v27 = vpop.f32.mrb[118].mxu1 }
 0x4bc   :  { %v3300_v4 = vrot.slane %v3299_v32, 1  ;;  %v3767_v22 = vpop.f32.mrb[119].mxu1  ;;  %v3337_v11 = vsel %vm891_vm1, %v3262_v3, %v3336_v10 }
 0x4bd   :  { %v3201_v46 = vadd.f32 %v3765_v21, %v3040_v47  ;;  %v3768_v7 = vadd.f32 %v3767_v22, %v3766_v27  ;;  %v3338_v60 = vsel %vm893_vm2, %v3275_v37, %v3337_v11 }
 0x4be   :  { %v3301_v17 = vmax.f32 %v3299_v32, %v3300_v4  ;;  %v3339_v34 = vsel %vm895_vm3, %v3288_v30, %v3338_v60 }
 0x4bf   :  { %v3305_v18 = vsel %vm3223_vm7, %v3201_v46, -inf  ;;  %v3204_v26 = vadd.f32 %v3768_v7, %v3043_v52 }
 0x4c0   :  { %v3306_v50 = vmax.f32 %v3304_v19, %v3305_v18  ;;  %v3340_v12 = vsel %vm897_vm4, %v3301_v17, %v3339_v34 }
 0x4c1   :  { %v3307_v20 = vsel %vm3223_vm7, %v3204_v26, -inf  ;;  %v3769_v16 = vpop.f32.mrb[120].mxu1 }
 0x4c2   :  { %v3308_v63 = vmax.f32 %v3306_v50, %v3307_v20  ;;  %v3770_v14 = vpop.f32.mrb[121].mxu1 }
 0x4c3   :  { %v3771_v6 = vadd.f32 %v3770_v14, %v3769_v16  ;;  %v3772_v42 = vpop.f32.mrb[122].mxu1 }
 0x4c4   :  { %v3309_v33 = vrot.slane %v3308_v63, 4  ;;  %v3773_v28 = vpop.f32.mrb[123].mxu1 }
 0x4c5   :  { %v3209_v35 = vadd.f32 %v3771_v6, %v3048_v13  ;;  %v3774_v8 = vadd.f32 %v3773_v28, %v3772_v42 }
 0x4c6   :  { %v3310_v54 = vmax.f32 %v3308_v63, %v3309_v33 }
 0x4c7   :  { %v3212_v53 = vadd.f32 %v3774_v8, %v3051_v43  ;;  %v3315_v40 = vsel %vm3223_vm7, %v3209_v35, -inf }
 0x4c8   :  { %v3311_v25 = vrot.slane %v3310_v54, 2 }
 0x4c9   :  { %v3316_v31 = vsel %vm3223_vm7, %v3212_v53, -inf  ;;  %v3775_v45 = vpop.f32.mrb[124].mxu1 }
 0x4ca   :  { %v3312_v1 = vmax.f32 %v3310_v54, %v3311_v25  ;;  %v3317_v29 = vmax.f32 %v3315_v40, %v3316_v31  ;;  %v3776_v39 = vpop.f32.mrb[125].mxu1 }
 0x4cb   :  { %v3777_v5 = vadd.f32 %v3776_v39, %v3775_v45  ;;  %v3778_v61 = vpop.f32.mrb[126].mxu1 }
 0x4cc   :  { %v3313_v56 = vrot.slane %v3312_v1, 1  ;;  %v3779_v51 = vpop.f32.mrb[127].mxu1 }
 0x4cd   :  { %v3217_v62 = vadd.f32 %v3777_v5, %v3056_v15  ;;  %v3780_v38 = vadd.f32 %v3779_v51, %v3778_v61 }
 0x4ce   :  { %v3314_v44 = vmax.f32 %v3312_v1, %v3313_v56 }
 0x4cf   :  { %v3318_v9 = vsel %vm3223_vm7, %v3217_v62, -inf  ;;  %v3220_v58 = vadd.f32 %v3780_v38, %v3059_v41 }
 0x4d0   :  { %v3319_v2 = vmax.f32 %v3317_v29, %v3318_v9  ;;  %v3341_v23 = vsel %vm899_vm5, %v3314_v44, %v3340_v12 }
 0x4d1   :  { %v3320_v24 = vsel %vm3223_vm7, %v3220_v58, -inf }
 0x4d2   :  { %v3321_v57 = vmax.f32 %v3319_v2, %v3320_v24 }
 0x4d4   :  { %v3322_v55 = vrot.slane %v3321_v57, 4 }
 0x4d6   :  { %v3323_v0 = vmax.f32 %v3321_v57, %v3322_v55 }
 0x4d8   :  { %v3324_v49 = vrot.slane %v3323_v0, 2 }
 0x4da   :  { %v3325_v3 = vmax.f32 %v3323_v0, %v3324_v49 }
 0x4dc   :  { %v3326_v32 = vrot.slane %v3325_v3, 1 }
 0x4de   :  { %v3327_v36 = vmax.f32 %v3325_v3, %v3326_v32 }
 0x4e0   :  { %v3342_v59 = vsel %vm901_vm6, %v3327_v36, %v3341_v23 }
 0x4e1   :  { %3344 = vst.msk [vmem:[#allocation16] sm:$0xff] %vm3223_vm7, %v3342_v59 }
 0x4e2   :  { %4265 = shalt.err (!%p4262_p12)
}
 0x4e3   :  { %s4266_s15 = scalar_lea.hbm %s5435_s8, 128 }
 0x4e4   :  { %p4267_p13 = scmp.ne.s32.totalorder %s5435_s8, %s4266_s15  ;;  %p4270_p0 = scmp.lt.u32.totalorder %s4266_s15, %s5435_s8 }
 0x4e6   :  { %p4272_p1 = pnand %p4270_p0, %p4267_p13 }
 0x4e8   :  { %4275 = shalt.err (!%p4272_p1)
}
 0x4e9   :  { %3354 = dma.vmem_to_hbm [thread:$0]  %s3352_s10, 128, %s5435_s8, [#allocation4]  }
 0x4ea   :  { %4286 = dma.done.wait [#allocation4], 128  }
 0x4eb   :  { %4287 = vsyncadd [#allocation4], 4294967168 }
 0x4ec   :  { %3358 = vsyncpa [#allocation3], 1 }
 0x4ed   :  { %3359 = vsyncpa [#allocation6], 1 }
 0x4ee   :  { %3360 = vsyncpa [#allocation9], 1 }
 0x4ef   :  { %3361 = vsyncpa [#allocation12], 1 }
 0x4f0   :  { %3362 = vsyncpa [#allocation15], 1 }
 0x4f1   :  { %3363 = vsyncpa [#allocation4], 1 }

</bundles_post_ra>
